<compile_context>
chip_gen: v5e
topology: v5e:2x2
jax: 0.10.0
libtpu: 0.0.40
codegen_flags: <defaults>
</compile_context>

<pallas_src>
import jax
import jax.numpy as jnp
from jax.experimental import pallas as pl
from jax.experimental.pallas import tpu as pltpu

KSIZE = 5    # Conv2d kernel size
POOL_K = 2   # AvgPool2d(kernel_size=2, ...)
POOL_S = 5   # AvgPool2d(..., stride=5) -- as written in the reference module


def _round_up(x, m):
    return ((x + m - 1) // m) * m


def _num_tensorcores():
    """2 TensorCores per chip on v7x (and megacore v4/v5p); else 1."""
    try:
        kind = jax.devices()[0].device_kind.lower()
        if any(tag in kind for tag in ("v7", "v4", "v5p")):
            return 2
    except Exception:
        pass
    return 1


_NUM_TC = _num_tensorcores()


# ----------------------------------------------------------------------------
# Fused Conv (im2col matmul) + bias + Tanh + 2x2 AvgPool kernel
# ----------------------------------------------------------------------------
def _conv_tanh_pool_kernel(p_ref, w_ref, b_ref, o_ref):
    """p_ref: (4, tm, Kp) bf16 -- im2col patches for the 4 pool-window corners
    w_ref: (Kp, Np)      bf16 -- conv weights (K x C_out, padded to 128 lanes)
    b_ref: (1, Np)       f32  -- conv bias (padded)
    o_ref: (tm, Np)      bf16 -- pooled activation tile (lane-dense store)
    """
    ncorn, tm, kp = p_ref.shape
    # Merge the 4 corners along M: one long MXU stream instead of 4 short
    # push/drain sequences.  Reshape is layout-preserving (tm % 8 == 0).
    p = p_ref[...].reshape(ncorn * tm, kp)
    h = jnp.dot(p, w_ref[...], preferred_element_type=jnp.float32)
    h = jnp.tanh(h + b_ref[...])          # (1, Np) bias: implicit sublane bcast
    acc = h[0:tm]
    for c in range(1, ncorn):             # 3 VALU adds (sublane-aligned slices)
        acc = acc + h[c * tm:(c + 1) * tm]
    o_ref[...] = (acc * (1.0 / ncorn)).astype(o_ref.dtype)


def _extract_pool_corner_patches(x, ksize, pool_k, pool_s):
    """x: (N, H, W, C) -> (pool_k**2, N*OH*OW, ksize*ksize*C).

    Gathers im2col patches only for conv positions that feed the AvgPool
    output (for kernel 2 / stride 5 that is ~4/25 of the conv output), using
    static strided slices (cheap, fusible XLA copies -- no gather hardware,
    no index tensors, no 6-D transpose).
    """
    n, h, w, c = x.shape
    h1 = h - ksize + 1
    w1 = w - ksize + 1
    oh = (h1 - pool_k) // pool_s + 1
    ow = (w1 - pool_k) // pool_s + 1
    corners = []
    for di in range(pool_k):
        for dj in range(pool_k):
            slabs = []
            for ki in range(ksize):        # (ki, kj, c) order matches the
                for kj in range(ksize):    # HWIO weight reshape below.
                    s = x[:, di + ki::pool_s, dj + kj::pool_s, :]
                    slabs.append(s[:, :oh, :ow, :])
            p = jnp.concatenate(slabs, axis=-1)        # (n, oh, ow, k*k*c)
            corners.append(p.reshape(n * oh * ow, ksize * ksize * c))
    return jnp.stack(corners, axis=0), (n, oh, ow)


def _conv_tanh_pool_stage(x_nhwc, w_hwio, b):
    kh, kw, cin, cout = w_hwio.shape
    x_bf16 = x_nhwc.astype(jnp.bfloat16)    # cast BEFORE the patch extraction
    patches, (n, oh, ow) = _extract_pool_corner_patches(
        x_bf16, kh, POOL_K, POOL_S)
    ncorn, m, k = patches.shape

    kp = _round_up(k, 128)        # pad reduction dim to the lane width
    np_ = _round_up(cout, 128)    # pad output channels -> unmasked vst

    # Generation-aware grid: 1 step on single-TC chips, 2 balanced steps on
    # dual-TC chips.  Per-step VMEM footprint stays a few MiB at most.
    n_tiles = _NUM_TC if m >= 128 * _NUM_TC else 1
    tm = _round_up(pl.cdiv(m, n_tiles), 8)
    mp = tm * n_tiles

    patches = jnp.pad(patches, ((0, 0), (0, mp - m), (0, kp - k)))
    wmat = jnp.pad(w_hwio.reshape(kh * kw * cin, cout).astype(jnp.bfloat16),
                   ((0, kp - k), (0, np_ - cout)))
    bias = jnp.pad(b.astype(jnp.float32), (0, np_ - cout)).reshape(1, np_)

    out = pl.pallas_call(
        _conv_tanh_pool_kernel,
        out_shape=jax.ShapeDtypeStruct((mp, np_), jnp.bfloat16),
        grid_spec=pltpu.PrefetchScalarGridSpec(
            num_scalar_prefetch=0,
            grid=(n_tiles,),
            in_specs=[
                pl.BlockSpec((ncorn, tm, kp), lambda i: (0, i, 0)),
                pl.BlockSpec((kp, np_), lambda i: (0, 0)),
                pl.BlockSpec((1, np_), lambda i: (0, 0)),
            ],
            out_specs=pl.BlockSpec((tm, np_), lambda i: (i, 0)),
        ),
        compiler_params=pltpu.CompilerParams(
            dimension_semantics=("parallel",),   # shards over v7x's 2 TCs
        ),
    )(patches, wmat, bias)

    return out[:m, :cout].reshape(n, oh, ow, cout)


# ----------------------------------------------------------------------------
# Fused FC head: Linear->Tanh->Linear->Tanh->Linear->Sigmoid (128-lane padded)
# ----------------------------------------------------------------------------
def _fc_head_kernel(x_ref, w1_ref, b1_ref, w2_ref, b2_ref, w3_ref, b3_ref, o_ref):
    h = jnp.dot(x_ref[...], w1_ref[...], preferred_element_type=jnp.float32)
    h = jnp.tanh(h + b1_ref[...]).astype(jnp.bfloat16)
    h = jnp.dot(h, w2_ref[...], preferred_element_type=jnp.float32)
    h = jnp.tanh(h + b2_ref[...]).astype(jnp.bfloat16)
    h = jnp.dot(h, w3_ref[...], preferred_element_type=jnp.float32) + b3_ref[...]
    o_ref[...] = jax.nn.sigmoid(h)   # EUP path; padded lanes sliced in wrapper


def _fc_head(flat, fw1, fb1, fw2, fb2, fw3, fb3):
    n, f = flat.shape
    bp = _round_up(max(n, 8), 8)
    fp = _round_up(f, 128)
    h1p = _round_up(fw1.shape[1], 128)
    h2p = _round_up(fw2.shape[1], 128)
    h3p = _round_up(fw3.shape[1], 128)

    x = jnp.pad(flat.astype(jnp.bfloat16), ((0, bp - n), (0, fp - f)))

    def pad_w(w, rp, cp):
        r, c = w.shape
        return jnp.pad(w.astype(jnp.bfloat16), ((0, rp - r), (0, cp - c)))

    def pad_b(b, cp):
        return jnp.pad(b.astype(jnp.float32), (0, cp - b.shape[0])).reshape(1, cp)

    w1, b1 = pad_w(fw1, fp, h1p), pad_b(fb1, h1p)
    w2, b2 = pad_w(fw2, h1p, h2p), pad_b(fb2, h2p)
    w3, b3 = pad_w(fw3, h2p, h3p), pad_b(fb3, h3p)

    out = pl.pallas_call(
        _fc_head_kernel,
        out_shape=jax.ShapeDtypeStruct((bp, h3p), jnp.float32),
        grid_spec=pltpu.PrefetchScalarGridSpec(
            num_scalar_prefetch=0,
            grid=(1,),
            in_specs=[
                pl.BlockSpec((bp, fp), lambda i: (0, 0)),
                pl.BlockSpec((fp, h1p), lambda i: (0, 0)),
                pl.BlockSpec((1, h1p), lambda i: (0, 0)),
                pl.BlockSpec((h1p, h2p), lambda i: (0, 0)),
                pl.BlockSpec((1, h2p), lambda i: (0, 0)),
                pl.BlockSpec((h2p, h3p), lambda i: (0, 0)),
                pl.BlockSpec((1, h3p), lambda i: (0, 0)),
            ],
            out_specs=pl.BlockSpec((bp, h3p), lambda i: (0, 0)),
        ),
        compiler_params=pltpu.CompilerParams(
            dimension_semantics=("arbitrary",),
        ),
    )(x, w1, b1, w2, b2, w3, b3)

    return out[:n, :fw3.shape[1]]


# ----------------------------------------------------------------------------
# Full forward pass (matches the PyTorch module semantics)
# ----------------------------------------------------------------------------
def cnn_forward(x_nchw, params):
    x = jnp.transpose(x_nchw, (0, 2, 3, 1))                       # NCHW -> NHWC
    y = _conv_tanh_pool_stage(x, params["w1"], params["b1"])
    y = _conv_tanh_pool_stage(y, params["w2"], params["b2"])
    # PyTorch flattens in (C, H, W) order (tiny tensor; cheap XLA transpose).
    flat = jnp.transpose(y, (0, 3, 1, 2)).reshape(y.shape[0], -1)  # (N, 256)
    return _fc_head(flat, params["fw1"], params["fb1"],
                    params["fw2"], params["fb2"],
                    params["fw3"], params["fb3"])


# Pure-JAX reference (same bf16 feeding / f32 accumulation) for verification.
def cnn_reference(x_nchw, params):
    x = jnp.transpose(x_nchw, (0, 2, 3, 1))

    def stage(x, w, b):
        y = jax.lax.conv_general_dilated(
            x.astype(jnp.bfloat16), w.astype(jnp.bfloat16),
            window_strides=(1, 1), padding="VALID",
            dimension_numbers=("NHWC", "HWIO", "NHWC"),
            preferred_element_type=jnp.float32)
        y = jnp.tanh(y + b.astype(jnp.float32))
        y = jax.lax.reduce_window(y, 0.0, jax.lax.add,
                                  (1, POOL_K, POOL_K, 1),
                                  (1, POOL_S, POOL_S, 1), "VALID")
        return y / float(POOL_K * POOL_K)

    y = stage(x, params["w1"], params["b1"])
    y = stage(y, params["w2"], params["b2"])
    h = jnp.transpose(y, (0, 3, 1, 2)).reshape(y.shape[0], -1)

    def lin(h, w, b):
        return jnp.dot(h.astype(jnp.bfloat16), w.astype(jnp.bfloat16),
                       preferred_element_type=jnp.float32) + b.astype(jnp.float32)

    h = jnp.tanh(lin(h, params["fw1"], params["fb1"]))
    h = jnp.tanh(lin(h, params["fw2"], params["fb2"]))
    h = lin(h, params["fw3"], params["fb3"])
    return jax.nn.sigmoid(h)


if __name__ == "__main__":
    key = jax.random.PRNGKey(0)
    ks = jax.random.split(key, 12)

    # 106x106 input -> conv chain yields 16*4*4 = 256 features for the FC head.
    batch, cin, hin, win = 2, 3, 106, 106
    x = jax.random.normal(ks[0], (batch, cin, hin, win), jnp.float32)

    def uinit(k, shape, fan_in):
        bound = 1.0 / float(fan_in) ** 0.5
        return jax.random.uniform(k, shape, jnp.float32, -bound, bound)

    params = {
        "w1": uinit(ks[1], (KSIZE, KSIZE, 3, 6), KSIZE * KSIZE * 3),
        "b1": uinit(ks[2], (6,), KSIZE * KSIZE * 3),
        "w2": uinit(ks[3], (KSIZE, KSIZE, 6, 16), KSIZE * KSIZE * 6),
        "b2": uinit(ks[4], (16,), KSIZE * KSIZE * 6),
        "fw1": uinit(ks[5], (256, 120), 256),
        "fb1": uinit(ks[6], (120,), 256),
        "fw2": uinit(ks[7], (120, 48), 120),
        "fb2": uinit(ks[8], (48,), 120),
        "fw3": uinit(ks[9], (48, 1), 48),
        "fb3": uinit(ks[10], (1,), 48),
    }

    out = jax.block_until_ready(jax.jit(cnn_forward)(x, params))
    assert out.shape == (batch, 1), out.shape

    ref = jax.block_until_ready(jax.jit(cnn_reference)(x, params))
    err = float(jnp.max(jnp.abs(out - ref)))
    if err > 2e-2:
        raise AssertionError(f"Pallas output mismatch vs JAX reference: {err}")

    print("KERNEL_OK")
</pallas_src>

<mosaic_0001>
module attributes {stable_mosaic.version = 11 : i64} {
  func.func @_conv_tanh_pool_kernel(%arg0: i32, %arg1: memref<4x888x128xbf16, #tpu.memory_space<vmem>>, %arg2: memref<128x128xbf16, #tpu.memory_space<vmem>>, %arg3: memref<1x128xf32, #tpu.memory_space<vmem>>, %arg4: memref<888x128xbf16, #tpu.memory_space<vmem>>) attributes {dimension_semantics = [#tpu.dimension_semantics<parallel>], iteration_bounds = array<i64: 1>, scalar_prefetch = 0 : i64, scratch_operands = 0 : i64, tpu.core_type = #tpu.core_type<tc>, window_params = [{transform_indices = @transform_0, window_bounds = array<i64: 4, 888, 128>}, {pipeline_mode = #tpu.pipeline_mode<synchronous>, transform_indices = @transform_1, window_bounds = array<i64: 128, 128>}, {pipeline_mode = #tpu.pipeline_mode<synchronous>, transform_indices = @transform_2, window_bounds = array<i64: 1, 128>}, {transform_indices = @transform_3, window_bounds = array<i64: 888, 128>}]} {
    %c0 = arith.constant 0 : index
    %c0_0 = arith.constant 0 : index
    %c0_1 = arith.constant 0 : index
    %0 = vector.load %arg1[%c0, %c0_0, %c0_1] : memref<4x888x128xbf16, #tpu.memory_space<vmem>>, vector<4x888x128xbf16>
    %1 = vector.shape_cast %0 : vector<4x888x128xbf16> to vector<3552x128xbf16>
    %c0_2 = arith.constant 0 : index
    %c0_3 = arith.constant 0 : index
    %2 = vector.load %arg2[%c0_2, %c0_3] : memref<128x128xbf16, #tpu.memory_space<vmem>>, vector<128x128xbf16>
    %cst = arith.constant dense<0.000000e+00> : vector<3552x128xf32>
    %3 = tpu.matmul %1, %2, %cst {dimension_numbers = #tpu.dot_dimension_numbers<[1], [0], [0], [1], [0, 0, 1, 1], [], []>} : vector<3552x128xbf16>, vector<128x128xbf16>, vector<3552x128xf32> -> vector<3552x128xf32>
    %c0_4 = arith.constant 0 : index
    %c0_5 = arith.constant 0 : index
    %4 = vector.load %arg3[%c0_4, %c0_5] : memref<1x128xf32, #tpu.memory_space<vmem>>, vector<1x128xf32>
    %5 = vector.broadcast %4 : vector<1x128xf32> to vector<3552x128xf32>
    %6 = arith.addf %3, %5 : vector<3552x128xf32>
    %7 = math.tanh %6 : vector<3552x128xf32>
    %8 = vector.extract_strided_slice %7 {offsets = [0, 0], sizes = [888, 128], strides = [1, 1]} : vector<3552x128xf32> to vector<888x128xf32>
    %9 = vector.extract_strided_slice %7 {offsets = [888, 0], sizes = [888, 128], strides = [1, 1]} : vector<3552x128xf32> to vector<888x128xf32>
    %10 = arith.addf %8, %9 : vector<888x128xf32>
    %11 = vector.extract_strided_slice %7 {offsets = [1776, 0], sizes = [888, 128], strides = [1, 1]} : vector<3552x128xf32> to vector<888x128xf32>
    %12 = arith.addf %10, %11 : vector<888x128xf32>
    %13 = vector.extract_strided_slice %7 {offsets = [2664, 0], sizes = [888, 128], strides = [1, 1]} : vector<3552x128xf32> to vector<888x128xf32>
    %14 = arith.addf %12, %13 : vector<888x128xf32>
    %cst_6 = arith.constant 2.500000e-01 : f32
    %15 = vector.broadcast %cst_6 : f32 to vector<888x128xf32>
    %16 = arith.mulf %14, %15 : vector<888x128xf32>
    %17 = arith.truncf %16 : vector<888x128xf32> to vector<888x128xbf16>
    %c0_7 = arith.constant 0 : index
    %c0_8 = arith.constant 0 : index
    %18 = vector.load %arg4[%c0_7, %c0_8] : memref<888x128xbf16, #tpu.memory_space<vmem>>, vector<888x128xbf16>
    tpu.vector_store %arg4[%c0_7, %c0_8], %17 {strides = array<i32>} : memref<888x128xbf16, #tpu.memory_space<vmem>>, vector<888x128xbf16>,
    return
  }
  func.func @transform_0(%arg0: i32) -> (i32, i32, i32) {
    %c0_i32 = arith.constant 0 : i32
    %c0_i32_0 = arith.constant 0 : i32
    %c0_i32_1 = arith.constant 0 : i32
    return %c0_i32, %arg0, %c0_i32_0 : i32, i32, i32
  }
  func.func @transform_1(%arg0: i32) -> (i32, i32) {
    %c0_i32 = arith.constant 0 : i32
    %c0_i32_0 = arith.constant 0 : i32
    %c0_i32_1 = arith.constant 0 : i32
    return %c0_i32, %c0_i32_0 : i32, i32
  }
  func.func @transform_2(%arg0: i32) -> (i32, i32) {
    %c0_i32 = arith.constant 0 : i32
    %c0_i32_0 = arith.constant 0 : i32
    %c0_i32_1 = arith.constant 0 : i32
    return %c0_i32, %c0_i32_0 : i32, i32
  }
  func.func @transform_3(%arg0: i32) -> (i32, i32) {
    %c0_i32 = arith.constant 0 : i32
    %c0_i32_0 = arith.constant 0 : i32
    return %arg0, %c0_i32 : i32, i32
  }
}

module attributes {stable_mosaic.version = 11 : i64} {
  func.func @_conv_tanh_pool_kernel(%arg0: i32, %arg1: memref<4x32x256xbf16, #tpu.memory_space<vmem>>, %arg2: memref<256x128xbf16, #tpu.memory_space<vmem>>, %arg3: memref<1x128xf32, #tpu.memory_space<vmem>>, %arg4: memref<32x128xbf16, #tpu.memory_space<vmem>>) attributes {dimension_semantics = [#tpu.dimension_semantics<parallel>], iteration_bounds = array<i64: 1>, scalar_prefetch = 0 : i64, scratch_operands = 0 : i64, tpu.core_type = #tpu.core_type<tc>, window_params = [{transform_indices = @transform_0, window_bounds = array<i64: 4, 32, 256>}, {pipeline_mode = #tpu.pipeline_mode<synchronous>, transform_indices = @transform_1, window_bounds = array<i64: 256, 128>}, {pipeline_mode = #tpu.pipeline_mode<synchronous>, transform_indices = @transform_2, window_bounds = array<i64: 1, 128>}, {transform_indices = @transform_3, window_bounds = array<i64: 32, 128>}]} {
    %c0 = arith.constant 0 : index
    %c0_0 = arith.constant 0 : index
    %c0_1 = arith.constant 0 : index
    %0 = vector.load %arg1[%c0, %c0_0, %c0_1] : memref<4x32x256xbf16, #tpu.memory_space<vmem>>, vector<4x32x256xbf16>
    %1 = vector.shape_cast %0 : vector<4x32x256xbf16> to vector<128x256xbf16>
    %c0_2 = arith.constant 0 : index
    %c0_3 = arith.constant 0 : index
    %2 = vector.load %arg2[%c0_2, %c0_3] : memref<256x128xbf16, #tpu.memory_space<vmem>>, vector<256x128xbf16>
    %cst = arith.constant dense<0.000000e+00> : vector<128x128xf32>
    %3 = tpu.matmul %1, %2, %cst {dimension_numbers = #tpu.dot_dimension_numbers<[1], [0], [0], [1], [0, 0, 1, 1], [], []>} : vector<128x256xbf16>, vector<256x128xbf16>, vector<128x128xf32> -> vector<128x128xf32>
    %c0_4 = arith.constant 0 : index
    %c0_5 = arith.constant 0 : index
    %4 = vector.load %arg3[%c0_4, %c0_5] : memref<1x128xf32, #tpu.memory_space<vmem>>, vector<1x128xf32>
    %5 = vector.broadcast %4 : vector<1x128xf32> to vector<128x128xf32>
    %6 = arith.addf %3, %5 : vector<128x128xf32>
    %7 = math.tanh %6 : vector<128x128xf32>
    %8 = vector.extract_strided_slice %7 {offsets = [0, 0], sizes = [32, 128], strides = [1, 1]} : vector<128x128xf32> to vector<32x128xf32>
    %9 = vector.extract_strided_slice %7 {offsets = [32, 0], sizes = [32, 128], strides = [1, 1]} : vector<128x128xf32> to vector<32x128xf32>
    %10 = arith.addf %8, %9 : vector<32x128xf32>
    %11 = vector.extract_strided_slice %7 {offsets = [64, 0], sizes = [32, 128], strides = [1, 1]} : vector<128x128xf32> to vector<32x128xf32>
    %12 = arith.addf %10, %11 : vector<32x128xf32>
    %13 = vector.extract_strided_slice %7 {offsets = [96, 0], sizes = [32, 128], strides = [1, 1]} : vector<128x128xf32> to vector<32x128xf32>
    %14 = arith.addf %12, %13 : vector<32x128xf32>
    %cst_6 = arith.constant 2.500000e-01 : f32
    %15 = vector.broadcast %cst_6 : f32 to vector<32x128xf32>
    %16 = arith.mulf %14, %15 : vector<32x128xf32>
    %17 = arith.truncf %16 : vector<32x128xf32> to vector<32x128xbf16>
    %c0_7 = arith.constant 0 : index
    %c0_8 = arith.constant 0 : index
    %18 = vector.load %arg4[%c0_7, %c0_8] : memref<32x128xbf16, #tpu.memory_space<vmem>>, vector<32x128xbf16>
    tpu.vector_store %arg4[%c0_7, %c0_8], %17 {strides = array<i32>} : memref<32x128xbf16, #tpu.memory_space<vmem>>, vector<32x128xbf16>,
    return
  }
  func.func @transform_0(%arg0: i32) -> (i32, i32, i32) {
    %c0_i32 = arith.constant 0 : i32
    %c0_i32_0 = arith.constant 0 : i32
    %c0_i32_1 = arith.constant 0 : i32
    return %c0_i32, %arg0, %c0_i32_0 : i32, i32, i32
  }
  func.func @transform_1(%arg0: i32) -> (i32, i32) {
    %c0_i32 = arith.constant 0 : i32
    %c0_i32_0 = arith.constant 0 : i32
    %c0_i32_1 = arith.constant 0 : i32
    return %c0_i32, %c0_i32_0 : i32, i32
  }
  func.func @transform_2(%arg0: i32) -> (i32, i32) {
    %c0_i32 = arith.constant 0 : i32
    %c0_i32_0 = arith.constant 0 : i32
    %c0_i32_1 = arith.constant 0 : i32
    return %c0_i32, %c0_i32_0 : i32, i32
  }
  func.func @transform_3(%arg0: i32) -> (i32, i32) {
    %c0_i32 = arith.constant 0 : i32
    %c0_i32_0 = arith.constant 0 : i32
    return %arg0, %c0_i32 : i32, i32
  }
}

module attributes {stable_mosaic.version = 11 : i64} {
  func.func @_fc_head_kernel(%arg0: i32, %arg1: memref<8x256xbf16, #tpu.memory_space<vmem>>, %arg2: memref<256x128xbf16, #tpu.memory_space<vmem>>, %arg3: memref<1x128xf32, #tpu.memory_space<vmem>>, %arg4: memref<128x128xbf16, #tpu.memory_space<vmem>>, %arg5: memref<1x128xf32, #tpu.memory_space<vmem>>, %arg6: memref<128x128xbf16, #tpu.memory_space<vmem>>, %arg7: memref<1x128xf32, #tpu.memory_space<vmem>>, %arg8: memref<8x128xf32, #tpu.memory_space<vmem>>) attributes {dimension_semantics = [#tpu.dimension_semantics<arbitrary>], iteration_bounds = array<i64: 1>, scalar_prefetch = 0 : i64, scratch_operands = 0 : i64, tpu.core_type = #tpu.core_type<tc>, window_params = [{pipeline_mode = #tpu.pipeline_mode<synchronous>, transform_indices = @transform_0, window_bounds = array<i64: 8, 256>}, {pipeline_mode = #tpu.pipeline_mode<synchronous>, transform_indices = @transform_1, window_bounds = array<i64: 256, 128>}, {pipeline_mode = #tpu.pipeline_mode<synchronous>, transform_indices = @transform_2, window_bounds = array<i64: 1, 128>}, {pipeline_mode = #tpu.pipeline_mode<synchronous>, transform_indices = @transform_3, window_bounds = array<i64: 128, 128>}, {pipeline_mode = #tpu.pipeline_mode<synchronous>, transform_indices = @transform_4, window_bounds = array<i64: 1, 128>}, {pipeline_mode = #tpu.pipeline_mode<synchronous>, transform_indices = @transform_5, window_bounds = array<i64: 128, 128>}, {pipeline_mode = #tpu.pipeline_mode<synchronous>, transform_indices = @transform_6, window_bounds = array<i64: 1, 128>}, {pipeline_mode = #tpu.pipeline_mode<synchronous>, transform_indices = @transform_7, window_bounds = array<i64: 8, 128>}]} {
    %c0 = arith.constant 0 : index
    %c0_0 = arith.constant 0 : index
    %0 = vector.load %arg1[%c0, %c0_0] : memref<8x256xbf16, #tpu.memory_space<vmem>>, vector<8x256xbf16>
    %c0_1 = arith.constant 0 : index
    %c0_2 = arith.constant 0 : index
    %1 = vector.load %arg2[%c0_1, %c0_2] : memref<256x128xbf16, #tpu.memory_space<vmem>>, vector<256x128xbf16>
    %cst = arith.constant dense<0.000000e+00> : vector<8x128xf32>
    %2 = tpu.matmul %0, %1, %cst {dimension_numbers = #tpu.dot_dimension_numbers<[1], [0], [0], [1], [0, 0, 1, 1], [], []>} : vector<8x256xbf16>, vector<256x128xbf16>, vector<8x128xf32> -> vector<8x128xf32>
    %c0_3 = arith.constant 0 : index
    %c0_4 = arith.constant 0 : index
    %3 = vector.load %arg3[%c0_3, %c0_4] : memref<1x128xf32, #tpu.memory_space<vmem>>, vector<1x128xf32>
    %4 = vector.broadcast %3 : vector<1x128xf32> to vector<8x128xf32>
    %5 = arith.addf %2, %4 : vector<8x128xf32>
    %6 = math.tanh %5 : vector<8x128xf32>
    %7 = arith.truncf %6 : vector<8x128xf32> to vector<8x128xbf16>
    %c0_5 = arith.constant 0 : index
    %c0_6 = arith.constant 0 : index
    %8 = vector.load %arg4[%c0_5, %c0_6] : memref<128x128xbf16, #tpu.memory_space<vmem>>, vector<128x128xbf16>
    %cst_7 = arith.constant dense<0.000000e+00> : vector<8x128xf32>
    %9 = tpu.matmul %7, %8, %cst_7 {dimension_numbers = #tpu.dot_dimension_numbers<[1], [0], [0], [1], [0, 0, 1, 1], [], []>} : vector<8x128xbf16>, vector<128x128xbf16>, vector<8x128xf32> -> vector<8x128xf32>
    %c0_8 = arith.constant 0 : index
    %c0_9 = arith.constant 0 : index
    %10 = vector.load %arg5[%c0_8, %c0_9] : memref<1x128xf32, #tpu.memory_space<vmem>>, vector<1x128xf32>
    %11 = vector.broadcast %10 : vector<1x128xf32> to vector<8x128xf32>
    %12 = arith.addf %9, %11 : vector<8x128xf32>
    %13 = math.tanh %12 : vector<8x128xf32>
    %14 = arith.truncf %13 : vector<8x128xf32> to vector<8x128xbf16>
    %c0_10 = arith.constant 0 : index
    %c0_11 = arith.constant 0 : index
    %15 = vector.load %arg6[%c0_10, %c0_11] : memref<128x128xbf16, #tpu.memory_space<vmem>>, vector<128x128xbf16>
    %cst_12 = arith.constant dense<0.000000e+00> : vector<8x128xf32>
    %16 = tpu.matmul %14, %15, %cst_12 {dimension_numbers = #tpu.dot_dimension_numbers<[1], [0], [0], [1], [0, 0, 1, 1], [], []>} : vector<8x128xbf16>, vector<128x128xbf16>, vector<8x128xf32> -> vector<8x128xf32>
    %c0_13 = arith.constant 0 : index
    %c0_14 = arith.constant 0 : index
    %17 = vector.load %arg7[%c0_13, %c0_14] : memref<1x128xf32, #tpu.memory_space<vmem>>, vector<1x128xf32>
    %18 = vector.broadcast %17 : vector<1x128xf32> to vector<8x128xf32>
    %19 = arith.addf %16, %18 : vector<8x128xf32>
    %20 = arith.negf %19 : vector<8x128xf32>
    %21 = math.exp %20 : vector<8x128xf32>
    %cst_15 = arith.constant 1.000000e+00 : f32
    %22 = vector.broadcast %cst_15 : f32 to vector<8x128xf32>
    %23 = arith.addf %22, %21 : vector<8x128xf32>
    %24 = arith.divf %22, %23 : vector<8x128xf32>
    %c0_16 = arith.constant 0 : index
    %c0_17 = arith.constant 0 : index
    %25 = vector.load %arg8[%c0_16, %c0_17] : memref<8x128xf32, #tpu.memory_space<vmem>>, vector<8x128xf32>
    tpu.vector_store %arg8[%c0_16, %c0_17], %24 {strides = array<i32>} : memref<8x128xf32, #tpu.memory_space<vmem>>, vector<8x128xf32>,
    return
  }
  func.func @transform_0(%arg0: i32) -> (i32, i32) {
    %c0_i32 = arith.constant 0 : i32
    %c0_i32_0 = arith.constant 0 : i32
    %c0_i32_1 = arith.constant 0 : i32
    return %c0_i32, %c0_i32_0 : i32, i32
  }
  func.func @transform_1(%arg0: i32) -> (i32, i32) {
    %c0_i32 = arith.constant 0 : i32
    %c0_i32_0 = arith.constant 0 : i32
    %c0_i32_1 = arith.constant 0 : i32
    return %c0_i32, %c0_i32_0 : i32, i32
  }
  func.func @transform_2(%arg0: i32) -> (i32, i32) {
    %c0_i32 = arith.constant 0 : i32
    %c0_i32_0 = arith.constant 0 : i32
    %c0_i32_1 = arith.constant 0 : i32
    return %c0_i32, %c0_i32_0 : i32, i32
  }
  func.func @transform_3(%arg0: i32) -> (i32, i32) {
    %c0_i32 = arith.constant 0 : i32
    %c0_i32_0 = arith.constant 0 : i32
    %c0_i32_1 = arith.constant 0 : i32
    return %c0_i32, %c0_i32_0 : i32, i32
  }
  func.func @transform_4(%arg0: i32) -> (i32, i32) {
    %c0_i32 = arith.constant 0 : i32
    %c0_i32_0 = arith.constant 0 : i32
    %c0_i32_1 = arith.constant 0 : i32
    return %c0_i32, %c0_i32_0 : i32, i32
  }
  func.func @transform_5(%arg0: i32) -> (i32, i32) {
    %c0_i32 = arith.constant 0 : i32
    %c0_i32_0 = arith.constant 0 : i32
    %c0_i32_1 = arith.constant 0 : i32
    return %c0_i32, %c0_i32_0 : i32, i32
  }
  func.func @transform_6(%arg0: i32) -> (i32, i32) {
    %c0_i32 = arith.constant 0 : i32
    %c0_i32_0 = arith.constant 0 : i32
    %c0_i32_1 = arith.constant 0 : i32
    return %c0_i32, %c0_i32_0 : i32, i32
  }
  func.func @transform_7(%arg0: i32) -> (i32, i32) {
    %c0_i32 = arith.constant 0 : i32
    %c0_i32_0 = arith.constant 0 : i32
    %c0_i32_1 = arith.constant 0 : i32
    return %c0_i32, %c0_i32_0 : i32, i32
  }
}

</mosaic_0001>

<bundles_post_ra>
// kernel: cnn_forward.3
= control target key start
LH: loop header
LB: loop body
LE: loop exit
PB: predicated region body
PF: predicated region fallthrough
CT: control target
= control target key end

     0   :  { %s7846_s1 = inlined_call_operand.vmem [shape: bf16[128,128], index: 1, kind: input, shape index: {}]   ;;  %s7847_s2 = inlined_call_operand.vmem [shape: f32[1,128], index: 2, kind: input, shape index: {}]   ;;  %s7848_s0 = inlined_call_operand.vmem [shape: bf16[4,888,128], index: 0, kind: input, shape index: {}]   ;;  %s7849_s3 = inlined_call_operand.vmem [shape: bf16[888,128], index: 3, kind: output, shape index: {}]  }
   0x1   :  { %v5240_v0 = vld [vmem:[%s7846_s1 + $0x38] sm:$0xff]  ;;  %v5239_v1 = vld [vmem:[%s7846_s1 + $0x30] sm:$0xff]  ;;  %v5238_v2 = vld [vmem:[%s7846_s1 + $0x28] sm:$0xff] }
   0x2   :  { %1858 = vmatpush.bf16.msra.mxu0 %v5240_v0  ;;  %5571 = vmatpush.bf16.msra.mxu2 %v5240_v0  ;;  %v5237_v3 = vld [vmem:[%s7846_s1 + $0x20] sm:$0xff]  ;;  %v5236_v4 = vld [vmem:[%s7846_s1 + $0x18] sm:$0xff]  ;;  %v5235_v5 = vld [vmem:[%s7846_s1 + $0x10] sm:$0xff] }
   0x3   :  { %5572 = vmatpush.bf16.msra.mxu3 %v5240_v0  ;;  %5570 = vmatpush.bf16.msra.mxu1 %v5240_v0  ;;  %v5234_v6 = vld [vmem:[%s7846_s1 + $0x8] sm:$0xff]  ;;  %v5233_v7 = vld [vmem:[%s7846_s1] sm:$0xff]  ;;  %v5121_v9 = vld [vmem:[%s7848_s0 + $0x370] sm:$0xff] }
   0x4   :  { %v5011_v8 = vld [vmem:[%s7848_s0] sm:$0xff]  ;;  %v5177_v10 = vld [vmem:[%s7848_s0 + $0x530] sm:$0xff]  ;;  %v5066_v11 = vld [vmem:[%s7848_s0 + $0x1b8] sm:$0xff] }
   0x5   :  { %v5012_v12 = vld [vmem:[%s7848_s0 + $0x8] sm:$0xff]  ;;  %v5122_v13 = vld [vmem:[%s7848_s0 + $0x378] sm:$0xff]  ;;  %v5067_v15 = vld [vmem:[%s7848_s0 + $0x1c0] sm:$0xff] }
   0x6   :  { %1859 = vmatpush.bf16.msra.mxu0 %v5239_v1  ;;  %5574 = vmatpush.bf16.msra.mxu2 %v5239_v1  ;;  %v5178_v14 = vld [vmem:[%s7848_s0 + $0x538] sm:$0xff]  ;;  %v5013_v16 = vld [vmem:[%s7848_s0 + $0x10] sm:$0xff]  ;;  %v5123_v17 = vld [vmem:[%s7848_s0 + $0x380] sm:$0xff] }
   0x7   :  { %5575 = vmatpush.bf16.msra.mxu3 %v5239_v1  ;;  %5573 = vmatpush.bf16.msra.mxu1 %v5239_v1  ;;  %v5179_v18 = vld [vmem:[%s7848_s0 + $0x540] sm:$0xff]  ;;  %v5068_v19 = vld [vmem:[%s7848_s0 + $0x1c8] sm:$0xff]  ;;  %v5014_v20 = vld [vmem:[%s7848_s0 + $0x18] sm:$0xff] }
   0x8   :  { %v5124_v21 = vld [vmem:[%s7848_s0 + $0x388] sm:$0xff]  ;;  %v5069_v23 = vld [vmem:[%s7848_s0 + $0x1d0] sm:$0xff]  ;;  %v5015_v24 = vld [vmem:[%s7848_s0 + $0x20] sm:$0xff] }
   0x9   :  { %v5180_v22 = vld [vmem:[%s7848_s0 + $0x548] sm:$0xff]  ;;  %v5125_v25 = vld [vmem:[%s7848_s0 + $0x390] sm:$0xff]  ;;  %v5070_v27 = vld [vmem:[%s7848_s0 + $0x1d8] sm:$0xff] }
   0xa   :  { %1860 = vmatpush.bf16.msra.mxu0 %v5238_v2  ;;  %5577 = vmatpush.bf16.msra.mxu2 %v5238_v2  ;;  %v5181_v26 = vld [vmem:[%s7848_s0 + $0x550] sm:$0xff]  ;;  %v5016_v28 = vld [vmem:[%s7848_s0 + $0x28] sm:$0xff]  ;;  %v5126_v29 = vld [vmem:[%s7848_s0 + $0x398] sm:$0xff] }
   0xb   :  { %5578 = vmatpush.bf16.msra.mxu3 %v5238_v2  ;;  %5576 = vmatpush.bf16.msra.mxu1 %v5238_v2  ;;  %v5182_v30 = vld [vmem:[%s7848_s0 + $0x558] sm:$0xff]  ;;  %v5071_v31 = vld [vmem:[%s7848_s0 + $0x1e0] sm:$0xff]  ;;  %v5017_v32 = vld [vmem:[%s7848_s0 + $0x30] sm:$0xff] }
   0xc   :  { %v5127_v33 = vld [vmem:[%s7848_s0 + $0x3a0] sm:$0xff]  ;;  %v5072_v35 = vld [vmem:[%s7848_s0 + $0x1e8] sm:$0xff]  ;;  %v5018_v36 = vld [vmem:[%s7848_s0 + $0x38] sm:$0xff] }
   0xd   :  { %v5183_v34 = vld [vmem:[%s7848_s0 + $0x560] sm:$0xff]  ;;  %v5128_v37 = vld [vmem:[%s7848_s0 + $0x3a8] sm:$0xff]  ;;  %v5073_v39 = vld [vmem:[%s7848_s0 + $0x1f0] sm:$0xff] }
   0xe   :  { %1861 = vmatpush.bf16.msra.mxu0 %v5237_v3  ;;  %5580 = vmatpush.bf16.msra.mxu2 %v5237_v3  ;;  %v5184_v38 = vld [vmem:[%s7848_s0 + $0x568] sm:$0xff]  ;;  %v5019_v40 = vld [vmem:[%s7848_s0 + $0x40] sm:$0xff]  ;;  %v5129_v41 = vld [vmem:[%s7848_s0 + $0x3b0] sm:$0xff] }
   0xf   :  { %5581 = vmatpush.bf16.msra.mxu3 %v5237_v3  ;;  %5579 = vmatpush.bf16.msra.mxu1 %v5237_v3  ;;  %v5185_v43 = vld [vmem:[%s7848_s0 + $0x570] sm:$0xff]  ;;  %v5074_v44 = vld [vmem:[%s7848_s0 + $0x1f8] sm:$0xff]  ;;  %v6645_v49 = vld [vmem:[%s7847_s2] ss:$0 sm:$0xff] }
  0x10   :  { %v5020_v56 = vld [vmem:[%s7848_s0 + $0x48] sm:$0xff]  ;;  %v5130_v57 = vld [vmem:[%s7848_s0 + $0x3b8] sm:$0xff]  ;;  %v5075_v60 = vld [vmem:[%s7848_s0 + $0x200] sm:$0xff] }
  0x11   :  { %v5186_v59 = vld [vmem:[%s7848_s0 + $0x578] sm:$0xff] }
  0x12   :  { %1862 = vmatpush.bf16.msra.mxu0 %v5236_v4  ;;  %5583 = vmatpush.bf16.msra.mxu2 %v5236_v4 }
  0x13   :  { %5584 = vmatpush.bf16.msra.mxu3 %v5236_v4  ;;  %5582 = vmatpush.bf16.msra.mxu1 %v5236_v4 }
  0x16   :  { %1863 = vmatpush.bf16.msra.mxu0 %v5235_v5  ;;  %5586 = vmatpush.bf16.msra.mxu2 %v5235_v5 }
  0x17   :  { %5587 = vmatpush.bf16.msra.mxu3 %v5235_v5  ;;  %5585 = vmatpush.bf16.msra.mxu1 %v5235_v5 }
  0x1a   :  { %1864 = vmatpush.bf16.msra.mxu0 %v5234_v6  ;;  %5589 = vmatpush.bf16.msra.mxu2 %v5234_v6 }
  0x1b   :  { %5590 = vmatpush.bf16.msra.mxu3 %v5234_v6  ;;  %5588 = vmatpush.bf16.msra.mxu1 %v5234_v6 }
  0x1e   :  { %1865 = vmatpush.bf16.msra.mxu0 %v5233_v7  ;;  %5592 = vmatpush.bf16.msra.mxu2 %v5233_v7 }
  0x1f   :  { %5593 = vmatpush.bf16.msra.mxu3 %v5233_v7  ;;  %5591 = vmatpush.bf16.msra.mxu1 %v5233_v7 }
  0x21   :  { %1866 = vmatmul.bf16.vlgmr.msra.gmra.mxu0 %v5011_v8  ;;  %2416 = vmatmul.bf16.vlgmr.msra.gmra.mxu2 %v5121_v9 }
  0x22   :  { %2696 = vmatmul.bf16.vlgmr.msra.gmra.mxu3 %v5177_v10  ;;  %2141 = vmatmul.bf16.vlgmr.msra.gmra.mxu1 %v5066_v11 }
  0x31   :  { %1871 = vmatmul.bf16.gmra.mxu0 %v5012_v12  ;;  %2421 = vmatmul.bf16.gmra.mxu2 %v5122_v13 }
  0x32   :  { %2701 = vmatmul.bf16.gmra.mxu3 %v5178_v14  ;;  %2146 = vmatmul.bf16.gmra.mxu1 %v5067_v15 }
  0x41   :  { %1876 = vmatmul.bf16.gmra.mxu0 %v5013_v16  ;;  %2426 = vmatmul.bf16.gmra.mxu2 %v5123_v17 }
  0x42   :  { %2706 = vmatmul.bf16.gmra.mxu3 %v5179_v18  ;;  %2151 = vmatmul.bf16.gmra.mxu1 %v5068_v19  ;;  %v5021_v19 = vld [vmem:[%s7848_s0 + $0x50] sm:$0xff] }
  0x51   :  { %1881 = vmatmul.bf16.gmra.mxu0 %v5014_v20  ;;  %2431 = vmatmul.bf16.gmra.mxu2 %v5124_v21  ;;  %v5131_v20 = vld [vmem:[%s7848_s0 + $0x3c0] sm:$0xff] }
  0x52   :  { %2711 = vmatmul.bf16.gmra.mxu3 %v5180_v22  ;;  %2156 = vmatmul.bf16.gmra.mxu1 %v5069_v23  ;;  %v5187_v23 = vld [vmem:[%s7848_s0 + $0x580] sm:$0xff] }
  0x61   :  { %1886 = vmatmul.bf16.gmra.mxu0 %v5015_v24  ;;  %2436 = vmatmul.bf16.gmra.mxu2 %v5125_v25  ;;  %v5076_v24 = vld [vmem:[%s7848_s0 + $0x208] sm:$0xff] }
  0x62   :  { %2716 = vmatmul.bf16.gmra.mxu3 %v5181_v26  ;;  %2161 = vmatmul.bf16.gmra.mxu1 %v5070_v27 }
  0x71   :  { %1891 = vmatmul.bf16.gmra.mxu0 %v5016_v28  ;;  %2441 = vmatmul.bf16.gmra.mxu2 %v5126_v29 }
  0x72   :  { %2721 = vmatmul.bf16.gmra.mxu3 %v5182_v30  ;;  %2166 = vmatmul.bf16.gmra.mxu1 %v5071_v31 }
  0x81   :  { %1896 = vmatmul.bf16.gmra.mxu0 %v5017_v32  ;;  %2446 = vmatmul.bf16.gmra.mxu2 %v5127_v33 }
  0x82   :  { %2726 = vmatmul.bf16.gmra.mxu3 %v5183_v34  ;;  %2171 = vmatmul.bf16.gmra.mxu1 %v5072_v35 }
  0x91   :  { %1901 = vmatmul.bf16.gmra.mxu0 %v5018_v36  ;;  %2451 = vmatmul.bf16.gmra.mxu2 %v5128_v37 }
  0x92   :  { %2731 = vmatmul.bf16.gmra.mxu3 %v5184_v38  ;;  %2176 = vmatmul.bf16.gmra.mxu1 %v5073_v39 }
  0x9e   :  { %v1867_v42 = vpop.f32.mrf.mxu0 }
  0x9f   :  { %v2142_v45 = vpop.f32.mrf.mxu1  ;;  %v1868_v62 = vadd.f32 %v6645_v49, %v1867_v42 }
  0xa0   :  { %v2143_v51 = vadd.f32 %v6645_v49, %v2142_v45 }
  0xa1   :  { %1906 = vmatmul.bf16.gmra.mxu0 %v5019_v40  ;;  %2456 = vmatmul.bf16.gmra.mxu2 %v5129_v41 }
  0xa2   :  { %2736 = vmatmul.bf16.gmra.mxu3 %v5185_v43  ;;  %2181 = vmatmul.bf16.gmra.mxu1 %v5074_v44  ;;  %5595 = vtanh.f32 %v2143_v51 }
  0xa4   :  { %v6640_v46 = vpop.f32.mrf.mxu2 }
  0xa5   :  { %v2697_v47 = vpop.f32.mrf.mxu3 }
  0xa6   :  { %v1869_v48 = vpop.f32.mrf.mxu0  ;;  %v2698_v53 = vadd.f32 %v6645_v49, %v2697_v47 }
  0xa7   :  { %v2144_v50 = vpop.f32.mrf.mxu1  ;;  %v1870_v5 = vadd.f32 %v6645_v49, %v1869_v48 }
  0xa8   :  { %v2145_v63 = vadd.f32 %v6645_v49, %v2144_v50  ;;  %v5596_v0 = vpop.eup %5595 }
  0xac   :  { %v2419_v52 = vpop.f32.mrf.mxu2 }
  0xad   :  { %v2420_v54 = vadd.f32 %v6645_v49, %v2419_v52  ;;  %v2699_v55 = vpop.f32.mrf.mxu3 }
  0xae   :  { %v1872_v58 = vpop.f32.mrf.mxu0  ;;  %v2700_v13 = vadd.f32 %v6645_v49, %v2699_v55 }
  0xaf   :  { %5597 = vtanh.f32 %v2420_v54  ;;  %v2147_v61 = vpop.f32.mrf.mxu1  ;;  %v1873_v28 = vadd.f32 %v6645_v49, %v1872_v58  ;;  %v5022_v58 = vld [vmem:[%s7848_s0 + $0x58] sm:$0xff] }
  0xb0   :  { %5599 = vtanh.f32 %v2698_v53  ;;  %v2148_v9 = vadd.f32 %v6645_v49, %v2147_v61 }
  0xb1   :  { %1911 = vmatmul.bf16.gmra.mxu0 %v5020_v56  ;;  %2461 = vmatmul.bf16.gmra.mxu2 %v5130_v57  ;;  %5601 = vtanh.f32 %v1868_v62  ;;  %v5188_v62 = vld [vmem:[%s7848_s0 + $0x588] sm:$0xff] }
  0xb2   :  { %2741 = vmatmul.bf16.gmra.mxu3 %v5186_v59  ;;  %2186 = vmatmul.bf16.gmra.mxu1 %v5075_v60  ;;  %5603 = vtanh.f32 %v2145_v63  ;;  %v5132_v59 = vld [vmem:[%s7848_s0 + $0x3c8] sm:$0xff]  ;;  %v5077_v63 = vld [vmem:[%s7848_s0 + $0x210] sm:$0xff] }
  0xb4   :  { %v2422_v1 = vpop.f32.mrf.mxu2 }
  0xb5   :  { %v5598_v2 = vpop.eup %5597  ;;  %v2423_v3 = vadd.f32 %v6645_v49, %v2422_v1  ;;  %v2702_v4 = vpop.f32.mrf.mxu3 }
  0xb6   :  { %v3531_v6 = vadd.f32 %v5598_v2, %v5596_v0  ;;  %v1874_v7 = vpop.f32.mrf.mxu0  ;;  %v5600_v8 = vpop.eup %5599  ;;  %v2703_v16 = vadd.f32 %v6645_v49, %v2702_v4 }
  0xb7   :  { %v2149_v10 = vpop.f32.mrf.mxu1  ;;  %5605 = vtanh.f32 %v2423_v3  ;;  %v5602_v12 = vpop.eup %5601  ;;  %v1875_v39 = vadd.f32 %v6645_v49, %v1874_v7 }
  0xb8   :  { %v6667_v11 = vadd.f32 %v5600_v8, %v3531_v6  ;;  %5607 = vtanh.f32 %v1870_v5  ;;  %v5604_v14 = vpop.eup %5603  ;;  %v2150_v30 = vadd.f32 %v6645_v49, %v2149_v10 }
  0xb9   :  { %5609 = vtanh.f32 %v2148_v9  ;;  %v3421_v21 = vadd.f32 %v5604_v14, %v5602_v12 }
  0xba   :  { %5611 = vtanh.f32 %v2700_v13 }
  0xbc   :  { %v2424_v15 = vpop.f32.mrf.mxu2 }
  0xbd   :  { %v2425_v17 = vadd.f32 %v6645_v49, %v2424_v15  ;;  %v2704_v18 = vpop.f32.mrf.mxu3  ;;  %v5606_v25 = vpop.eup %5605 }
  0xbe   :  { %v1877_v22 = vpop.f32.mrf.mxu0  ;;  %v5608_v27 = vpop.eup %5607  ;;  %v3532_v31 = vadd.f32 %v5606_v25, %v3421_v21  ;;  %v2705_v51 = vadd.f32 %v6645_v49, %v2704_v18 }
  0xbf   :  { %5613 = vtanh.f32 %v2425_v17  ;;  %v2152_v26 = vpop.f32.mrf.mxu1  ;;  %v5610_v29 = vpop.eup %5609  ;;  %v1878_v3 = vadd.f32 %v6645_v49, %v1877_v22 }
  0xc0   :  { %5615 = vtanh.f32 %v2703_v16  ;;  %v5612_v32 = vpop.eup %5611  ;;  %v3422_v33 = vadd.f32 %v5610_v29, %v5608_v27  ;;  %v2153_v43 = vadd.f32 %v6645_v49, %v2152_v26 }
  0xc1   :  { %1916 = vmatmul.bf16.gmra.mxu0 %v5021_v19  ;;  %2466 = vmatmul.bf16.gmra.mxu2 %v5131_v20  ;;  %5617 = vtanh.f32 %v1873_v28  ;;  %v3643_v38 = vadd.f32 %v5612_v32, %v3532_v31  ;;  %v5023_v32 = vld [vmem:[%s7848_s0 + $0x60] sm:$0xff] }
  0xc2   :  { %2746 = vmatmul.bf16.gmra.mxu3 %v5187_v23  ;;  %2191 = vmatmul.bf16.gmra.mxu1 %v5076_v24  ;;  %5619 = vtanh.f32 %v2150_v30 }
  0xc3   :  { %v3754_v48 = vmul.f32 0.25, %v3643_v38 }
  0xc4   :  { %v2427_v34 = vpop.f32.mrf.mxu2 }
  0xc5   :  { %v5614_v35 = vpop.eup %5613  ;;  %v2428_v36 = vadd.f32 %v6645_v49, %v2427_v34  ;;  %v2707_v37 = vpop.f32.mrf.mxu3 }
  0xc6   :  { %v3533_v40 = vadd.f32 %v5614_v35, %v3422_v33  ;;  %v1879_v41 = vpop.f32.mrf.mxu0  ;;  %v5616_v42 = vpop.eup %5615  ;;  %v2708_v55 = vadd.f32 %v6645_v49, %v2707_v37  ;;  %v5133_v33 = vld [vmem:[%s7848_s0 + $0x3d0] sm:$0xff]  ;;  %v5078_v37 = vld [vmem:[%s7848_s0 + $0x218] sm:$0xff] }
  0xc7   :  { %v2154_v44 = vpop.f32.mrf.mxu1  ;;  %5621 = vtanh.f32 %v2428_v36  ;;  %v5618_v47 = vpop.eup %5617  ;;  %v1880_v15 = vadd.f32 %v6645_v49, %v1879_v41  ;;  %v5189_v36 = vld [vmem:[%s7848_s0 + $0x590] sm:$0xff] }
  0xc8   :  { %v3644_v45 = vadd.f32 %v5616_v42, %v3533_v40  ;;  %5623 = vtanh.f32 %v1875_v39  ;;  %v5620_v52 = vpop.eup %5619  ;;  %v2155_v5 = vadd.f32 %v6645_v49, %v2154_v44 }
  0xc9   :  { %5625 = vtanh.f32 %v2153_v43  ;;  %v3423_v60 = vadd.f32 %v5620_v52, %v5618_v47 }
  0xca   :  { %v3755_v50 = vmul.f32 0.25, %v3644_v45  ;;  %5627 = vtanh.f32 %v2705_v51 }
  0xcc   :  { %v5244_v53 = vpack.c.bf16 %v3755_v50, %v3754_v48  ;;  %v2429_v54 = vpop.f32.mrf.mxu2 }
  0xcd   :  { %v2430_v56 = vadd.f32 %v6645_v49, %v2429_v54  ;;  %v2709_v57 = vpop.f32.mrf.mxu3  ;;  %v5622_v0 = vpop.eup %5621 }
  0xce   :  { %5245 = vst [vmem:[%s7849_s3] sm:$0xff] %v5244_v53   ;;  %v1882_v61 = vpop.f32.mrf.mxu0  ;;  %v5624_v2 = vpop.eup %5623  ;;  %v3534_v6 = vadd.f32 %v5622_v0, %v3423_v60  ;;  %v2710_v25 = vadd.f32 %v6645_v49, %v2709_v57 }
  0xcf   :  { %5629 = vtanh.f32 %v2430_v56  ;;  %v2157_v1 = vpop.f32.mrf.mxu1  ;;  %v5626_v4 = vpop.eup %5625  ;;  %v1883_v41 = vadd.f32 %v6645_v49, %v1882_v61 }
  0xd0   :  { %5631 = vtanh.f32 %v2708_v55  ;;  %v5628_v7 = vpop.eup %5627  ;;  %v3424_v8 = vadd.f32 %v5626_v4, %v5624_v2  ;;  %v2158_v19 = vadd.f32 %v6645_v49, %v2157_v1 }
  0xd1   :  { %1921 = vmatmul.bf16.gmra.mxu0 %v5022_v58  ;;  %2471 = vmatmul.bf16.gmra.mxu2 %v5132_v59  ;;  %5633 = vtanh.f32 %v1878_v3  ;;  %v3645_v14 = vadd.f32 %v5628_v7, %v3534_v6  ;;  %v5024_v7 = vld [vmem:[%s7848_s0 + $0x68] sm:$0xff] }
  0xd2   :  { %2751 = vmatmul.bf16.gmra.mxu3 %v5188_v62  ;;  %2196 = vmatmul.bf16.gmra.mxu1 %v5077_v63  ;;  %5635 = vtanh.f32 %v2155_v5 }
  0xd3   :  { %v3756_v23 = vmul.f32 0.25, %v3645_v14 }
  0xd4   :  { %v2432_v9 = vpop.f32.mrf.mxu2 }
  0xd5   :  { %v5630_v10 = vpop.eup %5629  ;;  %v2433_v12 = vadd.f32 %v6645_v49, %v2432_v9  ;;  %v2712_v13 = vpop.f32.mrf.mxu3 }
  0xd6   :  { %v3535_v16 = vadd.f32 %v5630_v10, %v3424_v8  ;;  %v1884_v17 = vpop.f32.mrf.mxu0  ;;  %v5632_v18 = vpop.eup %5631  ;;  %v2713_v29 = vadd.f32 %v6645_v49, %v2712_v13  ;;  %v5134_v8 = vld [vmem:[%s7848_s0 + $0x3d8] sm:$0xff]  ;;  %v5079_v13 = vld [vmem:[%s7848_s0 + $0x220] sm:$0xff] }
  0xd7   :  { %v2159_v20 = vpop.f32.mrf.mxu1  ;;  %5637 = vtanh.f32 %v2433_v12  ;;  %v5634_v22 = vpop.eup %5633  ;;  %v1885_v54 = vadd.f32 %v6645_v49, %v1884_v17  ;;  %v5190_v12 = vld [vmem:[%s7848_s0 + $0x598] sm:$0xff] }
  0xd8   :  { %v3646_v21 = vadd.f32 %v5632_v18, %v3535_v16  ;;  %5639 = vtanh.f32 %v1880_v15  ;;  %v5636_v26 = vpop.eup %5635  ;;  %v2160_v43 = vadd.f32 %v6645_v49, %v2159_v20 }
  0xd9   :  { %5641 = vtanh.f32 %v2158_v19  ;;  %v3425_v34 = vadd.f32 %v5636_v26, %v5634_v22 }
  0xda   :  { %v3757_v24 = vmul.f32 0.25, %v3646_v21  ;;  %5643 = vtanh.f32 %v2710_v25 }
  0xdc   :  { %v5249_v27 = vpack.c.bf16 %v3757_v24, %v3756_v23  ;;  %v2434_v28 = vpop.f32.mrf.mxu2 }
  0xdd   :  { %v2435_v30 = vadd.f32 %v6645_v49, %v2434_v28  ;;  %v2714_v31 = vpop.f32.mrf.mxu3  ;;  %v5638_v38 = vpop.eup %5637 }
  0xde   :  { %5516 = vst [vmem:[%s7849_s3 + $0x8] sm:$0xff] %v5249_v27   ;;  %v1887_v35 = vpop.f32.mrf.mxu0  ;;  %v5640_v40 = vpop.eup %5639  ;;  %v3536_v44 = vadd.f32 %v5638_v38, %v3425_v34  ;;  %v2715_v0 = vadd.f32 %v6645_v49, %v2714_v31 }
  0xdf   :  { %5645 = vtanh.f32 %v2435_v30  ;;  %v2162_v39 = vpop.f32.mrf.mxu1  ;;  %v5642_v42 = vpop.eup %5641  ;;  %v1888_v17 = vadd.f32 %v6645_v49, %v1887_v35 }
  0xe0   :  { %5647 = vtanh.f32 %v2713_v29  ;;  %v5644_v45 = vpop.eup %5643  ;;  %v3426_v47 = vadd.f32 %v5642_v42, %v5640_v40  ;;  %v2163_v58 = vadd.f32 %v6645_v49, %v2162_v39 }
  0xe1   :  { %1926 = vmatmul.bf16.gmra.mxu0 %v5023_v32  ;;  %2476 = vmatmul.bf16.gmra.mxu2 %v5133_v33  ;;  %5649 = vtanh.f32 %v1883_v41  ;;  %v3647_v53 = vadd.f32 %v5644_v45, %v3536_v44  ;;  %v5025_v45 = vld [vmem:[%s7848_s0 + $0x70] sm:$0xff] }
  0xe2   :  { %2756 = vmatmul.bf16.gmra.mxu3 %v5189_v36  ;;  %2201 = vmatmul.bf16.gmra.mxu1 %v5078_v37  ;;  %5651 = vtanh.f32 %v2160_v43 }
  0xe3   :  { %v3758_v62 = vmul.f32 0.25, %v3647_v53 }
  0xe4   :  { %v2437_v48 = vpop.f32.mrf.mxu2 }
  0xe5   :  { %v5646_v50 = vpop.eup %5645  ;;  %v2438_v51 = vadd.f32 %v6645_v49, %v2437_v48  ;;  %v2717_v52 = vpop.f32.mrf.mxu3 }
  0xe6   :  { %v3537_v55 = vadd.f32 %v5646_v50, %v3426_v47  ;;  %v1889_v56 = vpop.f32.mrf.mxu0  ;;  %v5648_v57 = vpop.eup %5647  ;;  %v2718_v4 = vadd.f32 %v6645_v49, %v2717_v52  ;;  %v5135_v47 = vld [vmem:[%s7848_s0 + $0x3e0] sm:$0xff]  ;;  %v5080_v52 = vld [vmem:[%s7848_s0 + $0x228] sm:$0xff] }
  0xe7   :  { %v2164_v59 = vpop.f32.mrf.mxu1  ;;  %5653 = vtanh.f32 %v2438_v51  ;;  %v5650_v61 = vpop.eup %5649  ;;  %v1890_v28 = vadd.f32 %v6645_v49, %v1889_v56  ;;  %v5191_v51 = vld [vmem:[%s7848_s0 + $0x5a0] sm:$0xff] }
  0xe8   :  { %v3648_v60 = vadd.f32 %v5648_v57, %v3537_v55  ;;  %5655 = vtanh.f32 %v1885_v54  ;;  %v5652_v1 = vpop.eup %5651  ;;  %v2165_v19 = vadd.f32 %v6645_v49, %v2164_v59 }
  0xe9   :  { %5657 = vtanh.f32 %v2163_v58  ;;  %v3427_v9 = vadd.f32 %v5652_v1, %v5650_v61 }
  0xea   :  { %v3759_v63 = vmul.f32 0.25, %v3648_v60  ;;  %5659 = vtanh.f32 %v2715_v0 }
  0xec   :  { %v5254_v2 = vpack.c.bf16 %v3759_v63, %v3758_v62  ;;  %v2439_v3 = vpop.f32.mrf.mxu2 }
  0xed   :  { %v2440_v5 = vadd.f32 %v6645_v49, %v2439_v3  ;;  %v2719_v6 = vpop.f32.mrf.mxu3  ;;  %v5654_v14 = vpop.eup %5653 }
  0xee   :  { %5517 = vst [vmem:[%s7849_s3 + $0x10] sm:$0xff] %v5254_v2   ;;  %v1892_v10 = vpop.f32.mrf.mxu0  ;;  %v5656_v16 = vpop.eup %5655  ;;  %v3538_v20 = vadd.f32 %v5654_v14, %v3427_v9  ;;  %v2720_v38 = vadd.f32 %v6645_v49, %v2719_v6 }
  0xef   :  { %5661 = vtanh.f32 %v2440_v5  ;;  %v2167_v15 = vpop.f32.mrf.mxu1  ;;  %v5658_v18 = vpop.eup %5657  ;;  %v1893_v56 = vadd.f32 %v6645_v49, %v1892_v10 }
  0xf0   :  { %5663 = vtanh.f32 %v2718_v4  ;;  %v5660_v21 = vpop.eup %5659  ;;  %v3428_v22 = vadd.f32 %v5658_v18, %v5656_v16  ;;  %v2168_v32 = vadd.f32 %v6645_v49, %v2167_v15 }
  0xf1   :  { %1931 = vmatmul.bf16.gmra.mxu0 %v5024_v7  ;;  %2481 = vmatmul.bf16.gmra.mxu2 %v5134_v8  ;;  %5665 = vtanh.f32 %v1888_v17  ;;  %v3649_v27 = vadd.f32 %v5660_v21, %v3538_v20  ;;  %v5026_v21 = vld [vmem:[%s7848_s0 + $0x78] sm:$0xff] }
  0xf2   :  { %2761 = vmatmul.bf16.gmra.mxu3 %v5190_v12  ;;  %2206 = vmatmul.bf16.gmra.mxu1 %v5079_v13  ;;  %5667 = vtanh.f32 %v2165_v19 }
  0xf3   :  { %v3760_v36 = vmul.f32 0.25, %v3649_v27 }
  0xf4   :  { %v2442_v23 = vpop.f32.mrf.mxu2 }
  0xf5   :  { %v5662_v24 = vpop.eup %5661  ;;  %v2443_v25 = vadd.f32 %v6645_v49, %v2442_v23  ;;  %v2722_v26 = vpop.f32.mrf.mxu3 }
  0xf6   :  { %v3539_v29 = vadd.f32 %v5662_v24, %v3428_v22  ;;  %v1894_v30 = vpop.f32.mrf.mxu0  ;;  %v5664_v31 = vpop.eup %5663  ;;  %v2723_v42 = vadd.f32 %v6645_v49, %v2722_v26  ;;  %v5136_v22 = vld [vmem:[%s7848_s0 + $0x3e8] sm:$0xff]  ;;  %v5081_v26 = vld [vmem:[%s7848_s0 + $0x230] sm:$0xff] }
  0xf7   :  { %v2169_v33 = vpop.f32.mrf.mxu1  ;;  %5669 = vtanh.f32 %v2443_v25  ;;  %v5666_v35 = vpop.eup %5665  ;;  %v1895_v3 = vadd.f32 %v6645_v49, %v1894_v30  ;;  %v5192_v25 = vld [vmem:[%s7848_s0 + $0x5a8] sm:$0xff] }
  0xf8   :  { %v3650_v34 = vadd.f32 %v5664_v31, %v3539_v29  ;;  %5671 = vtanh.f32 %v1890_v28  ;;  %v5668_v39 = vpop.eup %5667  ;;  %v2170_v58 = vadd.f32 %v6645_v49, %v2169_v33 }
  0xf9   :  { %5673 = vtanh.f32 %v2168_v32  ;;  %v3429_v48 = vadd.f32 %v5668_v39, %v5666_v35 }
  0xfa   :  { %v3761_v37 = vmul.f32 0.25, %v3650_v34  ;;  %5675 = vtanh.f32 %v2720_v38 }
  0xfc   :  { %v5259_v40 = vpack.c.bf16 %v3761_v37, %v3760_v36  ;;  %v2444_v41 = vpop.f32.mrf.mxu2 }
  0xfd   :  { %v2445_v43 = vadd.f32 %v6645_v49, %v2444_v41  ;;  %v2724_v44 = vpop.f32.mrf.mxu3  ;;  %v5670_v53 = vpop.eup %5669 }
  0xfe   :  { %5518 = vst [vmem:[%s7849_s3 + $0x18] sm:$0xff] %v5259_v40   ;;  %v1897_v50 = vpop.f32.mrf.mxu0  ;;  %v5672_v55 = vpop.eup %5671  ;;  %v3540_v59 = vadd.f32 %v5670_v53, %v3429_v48  ;;  %v2725_v14 = vadd.f32 %v6645_v49, %v2724_v44 }
  0xff   :  { %5677 = vtanh.f32 %v2445_v43  ;;  %v2172_v54 = vpop.f32.mrf.mxu1  ;;  %v5674_v57 = vpop.eup %5673  ;;  %v1898_v30 = vadd.f32 %v6645_v49, %v1897_v50 }
 0x100   :  { %5679 = vtanh.f32 %v2723_v42  ;;  %v5676_v60 = vpop.eup %5675  ;;  %v3430_v61 = vadd.f32 %v5674_v57, %v5672_v55  ;;  %v2173_v7 = vadd.f32 %v6645_v49, %v2172_v54 }
 0x101   :  { %1936 = vmatmul.bf16.gmra.mxu0 %v5025_v45  ;;  %2486 = vmatmul.bf16.gmra.mxu2 %v5135_v47  ;;  %5681 = vtanh.f32 %v1893_v56  ;;  %v3651_v2 = vadd.f32 %v5676_v60, %v3540_v59  ;;  %v5027_v60 = vld [vmem:[%s7848_s0 + $0x80] sm:$0xff] }
 0x102   :  { %2766 = vmatmul.bf16.gmra.mxu3 %v5191_v51  ;;  %2211 = vmatmul.bf16.gmra.mxu1 %v5080_v52  ;;  %5683 = vtanh.f32 %v2170_v58 }
 0x103   :  { %v3762_v12 = vmul.f32 0.25, %v3651_v2 }
 0x104   :  { %v2447_v62 = vpop.f32.mrf.mxu2 }
 0x105   :  { %v5678_v63 = vpop.eup %5677  ;;  %v2448_v0 = vadd.f32 %v6645_v49, %v2447_v62  ;;  %v2727_v1 = vpop.f32.mrf.mxu3 }
 0x106   :  { %v3541_v4 = vadd.f32 %v5678_v63, %v3430_v61  ;;  %v1899_v5 = vpop.f32.mrf.mxu0  ;;  %v5680_v6 = vpop.eup %5679  ;;  %v2728_v18 = vadd.f32 %v6645_v49, %v2727_v1  ;;  %v5137_v61 = vld [vmem:[%s7848_s0 + $0x3f0] sm:$0xff]  ;;  %v5082_v1 = vld [vmem:[%s7848_s0 + $0x238] sm:$0xff] }
 0x107   :  { %v2174_v8 = vpop.f32.mrf.mxu1  ;;  %5685 = vtanh.f32 %v2448_v0  ;;  %v5682_v10 = vpop.eup %5681  ;;  %v1900_v41 = vadd.f32 %v6645_v49, %v1899_v5  ;;  %v5193_v0 = vld [vmem:[%s7848_s0 + $0x5b0] sm:$0xff] }
 0x108   :  { %v3652_v9 = vadd.f32 %v5680_v6, %v3541_v4  ;;  %5687 = vtanh.f32 %v1895_v3  ;;  %v5684_v15 = vpop.eup %5683  ;;  %v2175_v32 = vadd.f32 %v6645_v49, %v2174_v8 }
 0x109   :  { %5689 = vtanh.f32 %v2173_v7  ;;  %v3431_v23 = vadd.f32 %v5684_v15, %v5682_v10 }
 0x10a   :  { %v3763_v13 = vmul.f32 0.25, %v3652_v9  ;;  %5691 = vtanh.f32 %v2725_v14 }
 0x10c   :  { %v5264_v16 = vpack.c.bf16 %v3763_v13, %v3762_v12  ;;  %v2449_v17 = vpop.f32.mrf.mxu2 }
 0x10d   :  { %v2450_v19 = vadd.f32 %v6645_v49, %v2449_v17  ;;  %v2729_v20 = vpop.f32.mrf.mxu3  ;;  %v5686_v27 = vpop.eup %5685 }
 0x10e   :  { %5519 = vst [vmem:[%s7849_s3 + $0x20] sm:$0xff] %v5264_v16   ;;  %v1902_v24 = vpop.f32.mrf.mxu0  ;;  %v5688_v29 = vpop.eup %5687  ;;  %v3542_v33 = vadd.f32 %v5686_v27, %v3431_v23  ;;  %v2730_v53 = vadd.f32 %v6645_v49, %v2729_v20 }
 0x10f   :  { %5693 = vtanh.f32 %v2450_v19  ;;  %v2177_v28 = vpop.f32.mrf.mxu1  ;;  %v5690_v31 = vpop.eup %5689  ;;  %v1903_v5 = vadd.f32 %v6645_v49, %v1902_v24 }
 0x110   :  { %5695 = vtanh.f32 %v2728_v18  ;;  %v5692_v34 = vpop.eup %5691  ;;  %v3432_v35 = vadd.f32 %v5690_v31, %v5688_v29  ;;  %v2178_v45 = vadd.f32 %v6645_v49, %v2177_v28 }
 0x111   :  { %1941 = vmatmul.bf16.gmra.mxu0 %v5026_v21  ;;  %2491 = vmatmul.bf16.gmra.mxu2 %v5136_v22  ;;  %5697 = vtanh.f32 %v1898_v30  ;;  %v3653_v40 = vadd.f32 %v5692_v34, %v3542_v33  ;;  %v5028_v34 = vld [vmem:[%s7848_s0 + $0x88] sm:$0xff] }
 0x112   :  { %2771 = vmatmul.bf16.gmra.mxu3 %v5192_v25  ;;  %2216 = vmatmul.bf16.gmra.mxu1 %v5081_v26  ;;  %5699 = vtanh.f32 %v2175_v32 }
 0x113   :  { %v3764_v51 = vmul.f32 0.25, %v3653_v40 }
 0x114   :  { %v2452_v36 = vpop.f32.mrf.mxu2 }
 0x115   :  { %v5694_v37 = vpop.eup %5693  ;;  %v2453_v38 = vadd.f32 %v6645_v49, %v2452_v36  ;;  %v2732_v39 = vpop.f32.mrf.mxu3 }
 0x116   :  { %v3543_v42 = vadd.f32 %v5694_v37, %v3432_v35  ;;  %v1904_v43 = vpop.f32.mrf.mxu0  ;;  %v5696_v44 = vpop.eup %5695  ;;  %v2733_v57 = vadd.f32 %v6645_v49, %v2732_v39  ;;  %v5138_v35 = vld [vmem:[%s7848_s0 + $0x3f8] sm:$0xff]  ;;  %v5083_v39 = vld [vmem:[%s7848_s0 + $0x240] sm:$0xff] }
 0x117   :  { %v2179_v47 = vpop.f32.mrf.mxu1  ;;  %5701 = vtanh.f32 %v2453_v38  ;;  %v5698_v50 = vpop.eup %5697  ;;  %v1905_v17 = vadd.f32 %v6645_v49, %v1904_v43  ;;  %v5194_v38 = vld [vmem:[%s7848_s0 + $0x5b8] sm:$0xff] }
 0x118   :  { %v3654_v48 = vadd.f32 %v5696_v44, %v3543_v42  ;;  %5703 = vtanh.f32 %v1900_v41  ;;  %v5700_v54 = vpop.eup %5699  ;;  %v2180_v7 = vadd.f32 %v6645_v49, %v2179_v47 }
 0x119   :  { %5705 = vtanh.f32 %v2178_v45  ;;  %v3433_v62 = vadd.f32 %v5700_v54, %v5698_v50 }
 0x11a   :  { %v3765_v52 = vmul.f32 0.25, %v3654_v48  ;;  %5707 = vtanh.f32 %v2730_v53 }
 0x11c   :  { %v5269_v55 = vpack.c.bf16 %v3765_v52, %v3764_v51  ;;  %v2454_v56 = vpop.f32.mrf.mxu2 }
 0x11d   :  { %v2455_v58 = vadd.f32 %v6645_v49, %v2454_v56  ;;  %v2734_v59 = vpop.f32.mrf.mxu3  ;;  %v5702_v2 = vpop.eup %5701 }
 0x11e   :  { %5520 = vst [vmem:[%s7849_s3 + $0x28] sm:$0xff] %v5269_v55   ;;  %v1907_v63 = vpop.f32.mrf.mxu0  ;;  %v5704_v4 = vpop.eup %5703  ;;  %v3544_v8 = vadd.f32 %v5702_v2, %v3433_v62  ;;  %v2735_v27 = vadd.f32 %v6645_v49, %v2734_v59 }
 0x11f   :  { %5709 = vtanh.f32 %v2455_v58  ;;  %v2182_v3 = vpop.f32.mrf.mxu1  ;;  %v5706_v6 = vpop.eup %5705  ;;  %v1908_v43 = vadd.f32 %v6645_v49, %v1907_v63 }
 0x120   :  { %5711 = vtanh.f32 %v2733_v57  ;;  %v5708_v9 = vpop.eup %5707  ;;  %v3434_v10 = vadd.f32 %v5706_v6, %v5704_v4  ;;  %v2183_v21 = vadd.f32 %v6645_v49, %v2182_v3 }
 0x121   :  { %1946 = vmatmul.bf16.gmra.mxu0 %v5027_v60  ;;  %2496 = vmatmul.bf16.gmra.mxu2 %v5137_v61  ;;  %5713 = vtanh.f32 %v1903_v5  ;;  %v3655_v16 = vadd.f32 %v5708_v9, %v3544_v8  ;;  %v5029_v9 = vld [vmem:[%s7848_s0 + $0x90] sm:$0xff] }
 0x122   :  { %2776 = vmatmul.bf16.gmra.mxu3 %v5193_v0  ;;  %2221 = vmatmul.bf16.gmra.mxu1 %v5082_v1  ;;  %5715 = vtanh.f32 %v2180_v7 }
 0x123   :  { %v3766_v25 = vmul.f32 0.25, %v3655_v16 }
 0x124   :  { %v2457_v12 = vpop.f32.mrf.mxu2 }
 0x125   :  { %v5710_v13 = vpop.eup %5709  ;;  %v2458_v14 = vadd.f32 %v6645_v49, %v2457_v12  ;;  %v2737_v15 = vpop.f32.mrf.mxu3 }
 0x126   :  { %v3545_v18 = vadd.f32 %v5710_v13, %v3434_v10  ;;  %v1909_v19 = vpop.f32.mrf.mxu0  ;;  %v5712_v20 = vpop.eup %5711  ;;  %v2738_v31 = vadd.f32 %v6645_v49, %v2737_v15  ;;  %v5139_v10 = vld [vmem:[%s7848_s0 + $0x400] sm:$0xff]  ;;  %v5084_v15 = vld [vmem:[%s7848_s0 + $0x248] sm:$0xff] }
 0x127   :  { %v2184_v22 = vpop.f32.mrf.mxu1  ;;  %5717 = vtanh.f32 %v2458_v14  ;;  %v5714_v24 = vpop.eup %5713  ;;  %v1910_v56 = vadd.f32 %v6645_v49, %v1909_v19  ;;  %v5195_v14 = vld [vmem:[%s7848_s0 + $0x5c0] sm:$0xff] }
 0x128   :  { %v3656_v23 = vadd.f32 %v5712_v20, %v3545_v18  ;;  %5719 = vtanh.f32 %v1905_v17  ;;  %v5716_v28 = vpop.eup %5715  ;;  %v2185_v45 = vadd.f32 %v6645_v49, %v2184_v22 }
 0x129   :  { %5721 = vtanh.f32 %v2183_v21  ;;  %v3435_v36 = vadd.f32 %v5716_v28, %v5714_v24 }
 0x12a   :  { %v3767_v26 = vmul.f32 0.25, %v3656_v23  ;;  %5723 = vtanh.f32 %v2735_v27 }
 0x12c   :  { %v5274_v29 = vpack.c.bf16 %v3767_v26, %v3766_v25  ;;  %v2459_v30 = vpop.f32.mrf.mxu2 }
 0x12d   :  { %v2460_v32 = vadd.f32 %v6645_v49, %v2459_v30  ;;  %v2739_v33 = vpop.f32.mrf.mxu3  ;;  %v5718_v40 = vpop.eup %5717 }
 0x12e   :  { %5521 = vst [vmem:[%s7849_s3 + $0x30] sm:$0xff] %v5274_v29   ;;  %v1912_v37 = vpop.f32.mrf.mxu0  ;;  %v5720_v42 = vpop.eup %5719  ;;  %v3546_v47 = vadd.f32 %v5718_v40, %v3435_v36  ;;  %v2740_v2 = vadd.f32 %v6645_v49, %v2739_v33 }
 0x12f   :  { %5725 = vtanh.f32 %v2460_v32  ;;  %v2187_v41 = vpop.f32.mrf.mxu1  ;;  %v5722_v44 = vpop.eup %5721  ;;  %v1913_v19 = vadd.f32 %v6645_v49, %v1912_v37 }
 0x130   :  { %5727 = vtanh.f32 %v2738_v31  ;;  %v5724_v48 = vpop.eup %5723  ;;  %v3436_v50 = vadd.f32 %v5722_v44, %v5720_v42  ;;  %v2188_v60 = vadd.f32 %v6645_v49, %v2187_v41 }
 0x131   :  { %1951 = vmatmul.bf16.gmra.mxu0 %v5028_v34  ;;  %2501 = vmatmul.bf16.gmra.mxu2 %v5138_v35  ;;  %5729 = vtanh.f32 %v1908_v43  ;;  %v3657_v55 = vadd.f32 %v5724_v48, %v3546_v47  ;;  %v5030_v48 = vld [vmem:[%s7848_s0 + $0x98] sm:$0xff] }
 0x132   :  { %2781 = vmatmul.bf16.gmra.mxu3 %v5194_v38  ;;  %2226 = vmatmul.bf16.gmra.mxu1 %v5083_v39  ;;  %5731 = vtanh.f32 %v2185_v45 }
 0x133   :  { %v3768_v0 = vmul.f32 0.25, %v3657_v55 }
 0x134   :  { %v2462_v51 = vpop.f32.mrf.mxu2 }
 0x135   :  { %v5726_v52 = vpop.eup %5725  ;;  %v2463_v53 = vadd.f32 %v6645_v49, %v2462_v51  ;;  %v2742_v54 = vpop.f32.mrf.mxu3 }
 0x136   :  { %v3547_v57 = vadd.f32 %v5726_v52, %v3436_v50  ;;  %v1914_v58 = vpop.f32.mrf.mxu0  ;;  %v5728_v59 = vpop.eup %5727  ;;  %v2743_v6 = vadd.f32 %v6645_v49, %v2742_v54  ;;  %v5140_v50 = vld [vmem:[%s7848_s0 + $0x408] sm:$0xff]  ;;  %v5085_v54 = vld [vmem:[%s7848_s0 + $0x250] sm:$0xff] }
 0x137   :  { %v2189_v61 = vpop.f32.mrf.mxu1  ;;  %5733 = vtanh.f32 %v2463_v53  ;;  %v5730_v63 = vpop.eup %5729  ;;  %v1915_v30 = vadd.f32 %v6645_v49, %v1914_v58  ;;  %v5196_v53 = vld [vmem:[%s7848_s0 + $0x5c8] sm:$0xff] }
 0x138   :  { %v3658_v62 = vadd.f32 %v5728_v59, %v3547_v57  ;;  %5735 = vtanh.f32 %v1910_v56  ;;  %v5732_v3 = vpop.eup %5731  ;;  %v2190_v21 = vadd.f32 %v6645_v49, %v2189_v61 }
 0x139   :  { %5737 = vtanh.f32 %v2188_v60  ;;  %v3437_v12 = vadd.f32 %v5732_v3, %v5730_v63 }
 0x13a   :  { %v3769_v1 = vmul.f32 0.25, %v3658_v62  ;;  %5739 = vtanh.f32 %v2740_v2  ;;  %v6896_v2 = vld [vmem:[%s7847_s2] ss:$0 sm:$0xff] }
 0x13c   :  { %v5279_v4 = vpack.c.bf16 %v3769_v1, %v3768_v0  ;;  %v2464_v5 = vpop.f32.mrf.mxu2 }
 0x13d   :  { %v2465_v7 = vadd.f32 %v6645_v49, %v2464_v5  ;;  %v2744_v8 = vpop.f32.mrf.mxu3  ;;  %v5734_v16 = vpop.eup %5733 }
 0x13e   :  { %5522 = vst [vmem:[%s7849_s3 + $0x38] sm:$0xff] %v5279_v4   ;;  %v1917_v13 = vpop.f32.mrf.mxu0  ;;  %v5736_v18 = vpop.eup %5735  ;;  %v3548_v22 = vadd.f32 %v5734_v16, %v3437_v12  ;;  %v2745_v40 = vadd.f32 %v6645_v49, %v2744_v8 }
 0x13f   :  { %5741 = vtanh.f32 %v2465_v7  ;;  %v2192_v17 = vpop.f32.mrf.mxu1  ;;  %v5738_v20 = vpop.eup %5737  ;;  %v1918_v58 = vadd.f32 %v6645_v49, %v1917_v13 }
 0x140   :  { %5743 = vtanh.f32 %v2743_v6  ;;  %v5740_v23 = vpop.eup %5739  ;;  %v3438_v24 = vadd.f32 %v5738_v20, %v5736_v18  ;;  %v2193_v34 = vadd.f32 %v6645_v49, %v2192_v17 }
 0x141   :  { %1956 = vmatmul.bf16.gmra.mxu0 %v5029_v9  ;;  %2506 = vmatmul.bf16.gmra.mxu2 %v5139_v10  ;;  %5745 = vtanh.f32 %v1913_v19  ;;  %v3659_v29 = vadd.f32 %v5740_v23, %v3548_v22  ;;  %v5031_v23 = vld [vmem:[%s7848_s0 + $0xa0] sm:$0xff] }
 0x142   :  { %2786 = vmatmul.bf16.gmra.mxu3 %v5195_v14  ;;  %2231 = vmatmul.bf16.gmra.mxu1 %v5084_v15  ;;  %5747 = vtanh.f32 %v2190_v21 }
 0x143   :  { %v3770_v38 = vmul.f32 0.25, %v3659_v29 }
 0x144   :  { %v2467_v25 = vpop.f32.mrf.mxu2 }
 0x145   :  { %v5742_v26 = vpop.eup %5741  ;;  %v2468_v27 = vadd.f32 %v6645_v49, %v2467_v25  ;;  %v2747_v28 = vpop.f32.mrf.mxu3 }
 0x146   :  { %v3549_v31 = vadd.f32 %v5742_v26, %v3438_v24  ;;  %v1919_v32 = vpop.f32.mrf.mxu0  ;;  %v5744_v33 = vpop.eup %5743  ;;  %v2748_v44 = vadd.f32 %v6645_v49, %v2747_v28  ;;  %v5141_v24 = vld [vmem:[%s7848_s0 + $0x410] sm:$0xff]  ;;  %v5086_v28 = vld [vmem:[%s7848_s0 + $0x258] sm:$0xff] }
 0x147   :  { %v2194_v35 = vpop.f32.mrf.mxu1  ;;  %5749 = vtanh.f32 %v2468_v27  ;;  %v5746_v37 = vpop.eup %5745  ;;  %v1920_v5 = vadd.f32 %v6896_v2, %v1919_v32  ;;  %v5197_v27 = vld [vmem:[%s7848_s0 + $0x5d0] sm:$0xff] }
 0x148   :  { %v3660_v36 = vadd.f32 %v5744_v33, %v3549_v31  ;;  %5751 = vtanh.f32 %v1915_v30  ;;  %v5748_v41 = vpop.eup %5747  ;;  %v2195_v60 = vadd.f32 %v6645_v49, %v2194_v35 }
 0x149   :  { %5753 = vtanh.f32 %v2193_v34  ;;  %v3439_v51 = vadd.f32 %v5748_v41, %v5746_v37 }
 0x14a   :  { %v3771_v39 = vmul.f32 0.25, %v3660_v36  ;;  %5755 = vtanh.f32 %v2745_v40 }
 0x14c   :  { %v5284_v42 = vpack.c.bf16 %v3771_v39, %v3770_v38  ;;  %v2469_v43 = vpop.f32.mrf.mxu2 }
 0x14d   :  { %v2470_v45 = vadd.f32 %v6645_v49, %v2469_v43  ;;  %v2749_v47 = vpop.f32.mrf.mxu3  ;;  %v5750_v55 = vpop.eup %5749 }
 0x14e   :  { %5523 = vst [vmem:[%s7849_s3 + $0x40] sm:$0xff] %v5284_v42   ;;  %v1922_v52 = vpop.f32.mrf.mxu0  ;;  %v5752_v57 = vpop.eup %5751  ;;  %v3550_v61 = vadd.f32 %v5750_v55, %v3439_v51  ;;  %v2750_v16 = vadd.f32 %v6896_v2, %v2749_v47 }
 0x14f   :  { %5757 = vtanh.f32 %v2470_v45  ;;  %v2197_v56 = vpop.f32.mrf.mxu1  ;;  %v5754_v59 = vpop.eup %5753  ;;  %v1923_v32 = vadd.f32 %v6896_v2, %v1922_v52 }
 0x150   :  { %5759 = vtanh.f32 %v2748_v44  ;;  %v5756_v62 = vpop.eup %5755  ;;  %v3440_v63 = vadd.f32 %v5754_v59, %v5752_v57  ;;  %v2198_v9 = vadd.f32 %v6896_v2, %v2197_v56 }
 0x151   :  { %1961 = vmatmul.bf16.gmra.mxu0 %v5030_v48  ;;  %2511 = vmatmul.bf16.gmra.mxu2 %v5140_v50  ;;  %5761 = vtanh.f32 %v1918_v58  ;;  %v3661_v49 = vadd.f32 %v5756_v62, %v3550_v61  ;;  %v5032_v62 = vld [vmem:[%s7848_s0 + $0xa8] sm:$0xff] }
 0x152   :  { %2791 = vmatmul.bf16.gmra.mxu3 %v5196_v53  ;;  %2236 = vmatmul.bf16.gmra.mxu1 %v5085_v54  ;;  %5763 = vtanh.f32 %v2195_v60 }
 0x153   :  { %v3772_v14 = vmul.f32 0.25, %v3661_v49 }
 0x154   :  { %v2472_v0 = vpop.f32.mrf.mxu2 }
 0x155   :  { %v5758_v1 = vpop.eup %5757  ;;  %v2473_v3 = vadd.f32 %v6896_v2, %v2472_v0  ;;  %v2752_v4 = vpop.f32.mrf.mxu3 }
 0x156   :  { %v3551_v6 = vadd.f32 %v5758_v1, %v3440_v63  ;;  %v1924_v7 = vpop.f32.mrf.mxu0  ;;  %v5760_v8 = vpop.eup %5759  ;;  %v2753_v20 = vadd.f32 %v6896_v2, %v2752_v4  ;;  %v5142_v63 = vld [vmem:[%s7848_s0 + $0x418] sm:$0xff]  ;;  %v5087_v4 = vld [vmem:[%s7848_s0 + $0x260] sm:$0xff] }
 0x157   :  { %v2199_v10 = vpop.f32.mrf.mxu1  ;;  %5765 = vtanh.f32 %v2473_v3  ;;  %v5762_v13 = vpop.eup %5761  ;;  %v1925_v43 = vadd.f32 %v6896_v2, %v1924_v7  ;;  %v5198_v3 = vld [vmem:[%s7848_s0 + $0x5d8] sm:$0xff] }
 0x158   :  { %v3662_v12 = vadd.f32 %v5760_v8, %v3551_v6  ;;  %5767 = vtanh.f32 %v1920_v5  ;;  %v5764_v17 = vpop.eup %5763  ;;  %v2200_v34 = vadd.f32 %v6896_v2, %v2199_v10 }
 0x159   :  { %5769 = vtanh.f32 %v2198_v9  ;;  %v3441_v25 = vadd.f32 %v5764_v17, %v5762_v13 }
 0x15a   :  { %v3773_v15 = vmul.f32 0.25, %v3662_v12  ;;  %5771 = vtanh.f32 %v2750_v16 }
 0x15c   :  { %v5289_v18 = vpack.c.bf16 %v3773_v15, %v3772_v14  ;;  %v2474_v19 = vpop.f32.mrf.mxu2 }
 0x15d   :  { %v2475_v21 = vadd.f32 %v6896_v2, %v2474_v19  ;;  %v2754_v22 = vpop.f32.mrf.mxu3  ;;  %v5766_v29 = vpop.eup %5765 }
 0x15e   :  { %5524 = vst [vmem:[%s7849_s3 + $0x48] sm:$0xff] %v5289_v18   ;;  %v1927_v26 = vpop.f32.mrf.mxu0  ;;  %v5768_v31 = vpop.eup %5767  ;;  %v3552_v35 = vadd.f32 %v5766_v29, %v3441_v25  ;;  %v2755_v55 = vadd.f32 %v6896_v2, %v2754_v22 }
 0x15f   :  { %5773 = vtanh.f32 %v2475_v21  ;;  %v2202_v30 = vpop.f32.mrf.mxu1  ;;  %v5770_v33 = vpop.eup %5769  ;;  %v1928_v7 = vadd.f32 %v6896_v2, %v1927_v26 }
 0x160   :  { %5775 = vtanh.f32 %v2753_v20  ;;  %v5772_v36 = vpop.eup %5771  ;;  %v3442_v37 = vadd.f32 %v5770_v33, %v5768_v31  ;;  %v2203_v48 = vadd.f32 %v6896_v2, %v2202_v30 }
 0x161   :  { %1966 = vmatmul.bf16.gmra.mxu0 %v5031_v23  ;;  %2516 = vmatmul.bf16.gmra.mxu2 %v5141_v24  ;;  %5777 = vtanh.f32 %v1923_v32  ;;  %v3663_v42 = vadd.f32 %v5772_v36, %v3552_v35  ;;  %v5033_v36 = vld [vmem:[%s7848_s0 + $0xb0] sm:$0xff] }
 0x162   :  { %2796 = vmatmul.bf16.gmra.mxu3 %v5197_v27  ;;  %2241 = vmatmul.bf16.gmra.mxu1 %v5086_v28  ;;  %5779 = vtanh.f32 %v2200_v34 }
 0x163   :  { %v3774_v53 = vmul.f32 0.25, %v3663_v42 }
 0x164   :  { %v2477_v38 = vpop.f32.mrf.mxu2 }
 0x165   :  { %v5774_v39 = vpop.eup %5773  ;;  %v2478_v40 = vadd.f32 %v6896_v2, %v2477_v38  ;;  %v2757_v41 = vpop.f32.mrf.mxu3 }
 0x166   :  { %v3553_v44 = vadd.f32 %v5774_v39, %v3442_v37  ;;  %v1929_v45 = vpop.f32.mrf.mxu0  ;;  %v5776_v47 = vpop.eup %5775  ;;  %v2758_v59 = vadd.f32 %v6896_v2, %v2757_v41  ;;  %v5143_v37 = vld [vmem:[%s7848_s0 + $0x420] sm:$0xff]  ;;  %v5088_v41 = vld [vmem:[%s7848_s0 + $0x268] sm:$0xff] }
 0x167   :  { %v2204_v50 = vpop.f32.mrf.mxu1  ;;  %5781 = vtanh.f32 %v2478_v40  ;;  %v5778_v52 = vpop.eup %5777  ;;  %v1930_v19 = vadd.f32 %v6896_v2, %v1929_v45  ;;  %v5199_v40 = vld [vmem:[%s7848_s0 + $0x5e0] sm:$0xff] }
 0x168   :  { %v3664_v51 = vadd.f32 %v5776_v47, %v3553_v44  ;;  %5783 = vtanh.f32 %v1925_v43  ;;  %v5780_v56 = vpop.eup %5779  ;;  %v2205_v9 = vadd.f32 %v6896_v2, %v2204_v50 }
 0x169   :  { %5785 = vtanh.f32 %v2203_v48  ;;  %v3443_v0 = vadd.f32 %v5780_v56, %v5778_v52 }
 0x16a   :  { %v3775_v54 = vmul.f32 0.25, %v3664_v51  ;;  %5787 = vtanh.f32 %v2755_v55 }
 0x16c   :  { %v5294_v57 = vpack.c.bf16 %v3775_v54, %v3774_v53  ;;  %v2479_v58 = vpop.f32.mrf.mxu2 }
 0x16d   :  { %v2480_v60 = vadd.f32 %v6896_v2, %v2479_v58  ;;  %v2759_v61 = vpop.f32.mrf.mxu3  ;;  %v5782_v49 = vpop.eup %5781 }
 0x16e   :  { %5525 = vst [vmem:[%s7849_s3 + $0x50] sm:$0xff] %v5294_v57   ;;  %v1932_v1 = vpop.f32.mrf.mxu0  ;;  %v5784_v6 = vpop.eup %5783  ;;  %v3554_v10 = vadd.f32 %v5782_v49, %v3443_v0  ;;  %v2760_v29 = vadd.f32 %v6896_v2, %v2759_v61 }
 0x16f   :  { %5789 = vtanh.f32 %v2480_v60  ;;  %v2207_v5 = vpop.f32.mrf.mxu1  ;;  %v5786_v8 = vpop.eup %5785  ;;  %v1933_v45 = vadd.f32 %v6896_v2, %v1932_v1 }
 0x170   :  { %5791 = vtanh.f32 %v2758_v59  ;;  %v5788_v12 = vpop.eup %5787  ;;  %v3444_v13 = vadd.f32 %v5786_v8, %v5784_v6  ;;  %v2208_v23 = vadd.f32 %v6896_v2, %v2207_v5 }
 0x171   :  { %1971 = vmatmul.bf16.gmra.mxu0 %v5032_v62  ;;  %2521 = vmatmul.bf16.gmra.mxu2 %v5142_v63  ;;  %5793 = vtanh.f32 %v1928_v7  ;;  %v3665_v18 = vadd.f32 %v5788_v12, %v3554_v10  ;;  %v5034_v12 = vld [vmem:[%s7848_s0 + $0xb8] sm:$0xff] }
 0x172   :  { %2801 = vmatmul.bf16.gmra.mxu3 %v5198_v3  ;;  %2246 = vmatmul.bf16.gmra.mxu1 %v5087_v4  ;;  %5795 = vtanh.f32 %v2205_v9 }
 0x173   :  { %v3776_v27 = vmul.f32 0.25, %v3665_v18 }
 0x174   :  { %v2482_v14 = vpop.f32.mrf.mxu2 }
 0x175   :  { %v5790_v15 = vpop.eup %5789  ;;  %v2483_v16 = vadd.f32 %v6896_v2, %v2482_v14  ;;  %v2762_v17 = vpop.f32.mrf.mxu3 }
 0x176   :  { %v3555_v20 = vadd.f32 %v5790_v15, %v3444_v13  ;;  %v1934_v21 = vpop.f32.mrf.mxu0  ;;  %v5792_v22 = vpop.eup %5791  ;;  %v2763_v33 = vadd.f32 %v6896_v2, %v2762_v17  ;;  %v5144_v13 = vld [vmem:[%s7848_s0 + $0x428] sm:$0xff]  ;;  %v5089_v17 = vld [vmem:[%s7848_s0 + $0x270] sm:$0xff] }
 0x177   :  { %v2209_v24 = vpop.f32.mrf.mxu1  ;;  %5797 = vtanh.f32 %v2483_v16  ;;  %v5794_v26 = vpop.eup %5793  ;;  %v1935_v58 = vadd.f32 %v6896_v2, %v1934_v21  ;;  %v5200_v16 = vld [vmem:[%s7848_s0 + $0x5e8] sm:$0xff] }
 0x178   :  { %v3666_v25 = vadd.f32 %v5792_v22, %v3555_v20  ;;  %5799 = vtanh.f32 %v1930_v19  ;;  %v5796_v30 = vpop.eup %5795  ;;  %v2210_v48 = vadd.f32 %v6896_v2, %v2209_v24 }
 0x179   :  { %5801 = vtanh.f32 %v2208_v23  ;;  %v3445_v38 = vadd.f32 %v5796_v30, %v5794_v26 }
 0x17a   :  { %v3777_v28 = vmul.f32 0.25, %v3666_v25  ;;  %5803 = vtanh.f32 %v2760_v29 }
 0x17c   :  { %v5299_v31 = vpack.c.bf16 %v3777_v28, %v3776_v27  ;;  %v2484_v32 = vpop.f32.mrf.mxu2 }
 0x17d   :  { %v2485_v34 = vadd.f32 %v6896_v2, %v2484_v32  ;;  %v2764_v35 = vpop.f32.mrf.mxu3  ;;  %v5798_v42 = vpop.eup %5797 }
 0x17e   :  { %5526 = vst [vmem:[%s7849_s3 + $0x58] sm:$0xff] %v5299_v31   ;;  %v1937_v39 = vpop.f32.mrf.mxu0  ;;  %v5800_v44 = vpop.eup %5799  ;;  %v3556_v50 = vadd.f32 %v5798_v42, %v3445_v38  ;;  %v2765_v49 = vadd.f32 %v6896_v2, %v2764_v35 }
 0x17f   :  { %5805 = vtanh.f32 %v2485_v34  ;;  %v2212_v43 = vpop.f32.mrf.mxu1  ;;  %v5802_v47 = vpop.eup %5801  ;;  %v1938_v21 = vadd.f32 %v6896_v2, %v1937_v39 }
 0x180   :  { %5807 = vtanh.f32 %v2763_v33  ;;  %v5804_v51 = vpop.eup %5803  ;;  %v3446_v52 = vadd.f32 %v5802_v47, %v5800_v44  ;;  %v2213_v62 = vadd.f32 %v6896_v2, %v2212_v43 }
 0x181   :  { %1976 = vmatmul.bf16.gmra.mxu0 %v5033_v36  ;;  %2526 = vmatmul.bf16.gmra.mxu2 %v5143_v37  ;;  %5809 = vtanh.f32 %v1933_v45  ;;  %v3667_v57 = vadd.f32 %v5804_v51, %v3556_v50  ;;  %v5035_v51 = vld [vmem:[%s7848_s0 + $0xc0] sm:$0xff] }
 0x182   :  { %2806 = vmatmul.bf16.gmra.mxu3 %v5199_v40  ;;  %2251 = vmatmul.bf16.gmra.mxu1 %v5088_v41  ;;  %5811 = vtanh.f32 %v2210_v48 }
 0x183   :  { %v3778_v3 = vmul.f32 0.25, %v3667_v57 }
 0x184   :  { %v2487_v53 = vpop.f32.mrf.mxu2 }
 0x185   :  { %v5806_v54 = vpop.eup %5805  ;;  %v2488_v55 = vadd.f32 %v6896_v2, %v2487_v53  ;;  %v2767_v56 = vpop.f32.mrf.mxu3 }
 0x186   :  { %v3557_v59 = vadd.f32 %v5806_v54, %v3446_v52  ;;  %v1939_v60 = vpop.f32.mrf.mxu0  ;;  %v5808_v61 = vpop.eup %5807  ;;  %v2768_v8 = vadd.f32 %v6896_v2, %v2767_v56  ;;  %v5145_v52 = vld [vmem:[%s7848_s0 + $0x430] sm:$0xff]  ;;  %v5090_v56 = vld [vmem:[%s7848_s0 + $0x278] sm:$0xff] }
 0x187   :  { %v2214_v63 = vpop.f32.mrf.mxu1  ;;  %5813 = vtanh.f32 %v2488_v55  ;;  %v5810_v1 = vpop.eup %5809  ;;  %v1940_v32 = vadd.f32 %v6896_v2, %v1939_v60  ;;  %v5201_v55 = vld [vmem:[%s7848_s0 + $0x5f0] sm:$0xff] }
 0x188   :  { %v3668_v0 = vadd.f32 %v5808_v61, %v3557_v59  ;;  %5815 = vtanh.f32 %v1935_v58  ;;  %v5812_v5 = vpop.eup %5811  ;;  %v2215_v23 = vadd.f32 %v6896_v2, %v2214_v63 }
 0x189   :  { %5817 = vtanh.f32 %v2213_v62  ;;  %v3447_v14 = vadd.f32 %v5812_v5, %v5810_v1 }
 0x18a   :  { %v3779_v4 = vmul.f32 0.25, %v3668_v0  ;;  %5819 = vtanh.f32 %v2765_v49 }
 0x18c   :  { %v5304_v6 = vpack.c.bf16 %v3779_v4, %v3778_v3  ;;  %v2489_v7 = vpop.f32.mrf.mxu2 }
 0x18d   :  { %v2490_v9 = vadd.f32 %v6896_v2, %v2489_v7  ;;  %v2769_v10 = vpop.f32.mrf.mxu3  ;;  %v5814_v18 = vpop.eup %5813 }
 0x18e   :  { %5527 = vst [vmem:[%s7849_s3 + $0x60] sm:$0xff] %v5304_v6   ;;  %v1942_v15 = vpop.f32.mrf.mxu0  ;;  %v5816_v20 = vpop.eup %5815  ;;  %v3558_v24 = vadd.f32 %v5814_v18, %v3447_v14  ;;  %v2770_v42 = vadd.f32 %v6896_v2, %v2769_v10 }
 0x18f   :  { %5821 = vtanh.f32 %v2490_v9  ;;  %v2217_v19 = vpop.f32.mrf.mxu1  ;;  %v5818_v22 = vpop.eup %5817  ;;  %v1943_v60 = vadd.f32 %v6896_v2, %v1942_v15 }
 0x190   :  { %5823 = vtanh.f32 %v2768_v8  ;;  %v5820_v25 = vpop.eup %5819  ;;  %v3448_v26 = vadd.f32 %v5818_v22, %v5816_v20  ;;  %v2218_v36 = vadd.f32 %v6896_v2, %v2217_v19 }
 0x191   :  { %1981 = vmatmul.bf16.gmra.mxu0 %v5034_v12  ;;  %2531 = vmatmul.bf16.gmra.mxu2 %v5144_v13  ;;  %5825 = vtanh.f32 %v1938_v21  ;;  %v3669_v31 = vadd.f32 %v5820_v25, %v3558_v24  ;;  %v5036_v25 = vld [vmem:[%s7848_s0 + $0xc8] sm:$0xff] }
 0x192   :  { %2811 = vmatmul.bf16.gmra.mxu3 %v5200_v16  ;;  %2256 = vmatmul.bf16.gmra.mxu1 %v5089_v17  ;;  %5827 = vtanh.f32 %v2215_v23 }
 0x193   :  { %v3780_v40 = vmul.f32 0.25, %v3669_v31 }
 0x194   :  { %v2492_v27 = vpop.f32.mrf.mxu2 }
 0x195   :  { %v5822_v28 = vpop.eup %5821  ;;  %v2493_v29 = vadd.f32 %v6896_v2, %v2492_v27  ;;  %v2772_v30 = vpop.f32.mrf.mxu3 }
 0x196   :  { %v3559_v33 = vadd.f32 %v5822_v28, %v3448_v26  ;;  %v1944_v34 = vpop.f32.mrf.mxu0  ;;  %v5824_v35 = vpop.eup %5823  ;;  %v2773_v47 = vadd.f32 %v6896_v2, %v2772_v30  ;;  %v5146_v26 = vld [vmem:[%s7848_s0 + $0x438] sm:$0xff]  ;;  %v5091_v30 = vld [vmem:[%s7848_s0 + $0x280] sm:$0xff] }
 0x197   :  { %v2219_v37 = vpop.f32.mrf.mxu1  ;;  %5829 = vtanh.f32 %v2493_v29  ;;  %v5826_v39 = vpop.eup %5825  ;;  %v1945_v7 = vadd.f32 %v6896_v2, %v1944_v34  ;;  %v5202_v29 = vld [vmem:[%s7848_s0 + $0x5f8] sm:$0xff] }
 0x198   :  { %v3670_v38 = vadd.f32 %v5824_v35, %v3559_v33  ;;  %5831 = vtanh.f32 %v1940_v32  ;;  %v5828_v43 = vpop.eup %5827  ;;  %v2220_v62 = vadd.f32 %v6896_v2, %v2219_v37 }
 0x199   :  { %5833 = vtanh.f32 %v2218_v36  ;;  %v3449_v53 = vadd.f32 %v5828_v43, %v5826_v39 }
 0x19a   :  { %v3781_v41 = vmul.f32 0.25, %v3670_v38  ;;  %5835 = vtanh.f32 %v2770_v42 }
 0x19c   :  { %v5309_v44 = vpack.c.bf16 %v3781_v41, %v3780_v40  ;;  %v2494_v45 = vpop.f32.mrf.mxu2 }
 0x19d   :  { %v2495_v48 = vadd.f32 %v6896_v2, %v2494_v45  ;;  %v2774_v50 = vpop.f32.mrf.mxu3  ;;  %v5830_v57 = vpop.eup %5829 }
 0x19e   :  { %5528 = vst [vmem:[%s7849_s3 + $0x68] sm:$0xff] %v5309_v44   ;;  %v1947_v54 = vpop.f32.mrf.mxu0  ;;  %v5832_v59 = vpop.eup %5831  ;;  %v3560_v63 = vadd.f32 %v5830_v57, %v3449_v53  ;;  %v2775_v18 = vadd.f32 %v6896_v2, %v2774_v50 }
 0x19f   :  { %5837 = vtanh.f32 %v2495_v48  ;;  %v2222_v58 = vpop.f32.mrf.mxu1  ;;  %v5834_v61 = vpop.eup %5833  ;;  %v1948_v34 = vadd.f32 %v6896_v2, %v1947_v54 }
 0x1a0   :  { %5839 = vtanh.f32 %v2773_v47  ;;  %v5836_v0 = vpop.eup %5835  ;;  %v3450_v1 = vadd.f32 %v5834_v61, %v5832_v59  ;;  %v2223_v12 = vadd.f32 %v6896_v2, %v2222_v58 }
 0x1a1   :  { %1986 = vmatmul.bf16.gmra.mxu0 %v5035_v51  ;;  %2536 = vmatmul.bf16.gmra.mxu2 %v5145_v52  ;;  %5841 = vtanh.f32 %v1943_v60  ;;  %v3671_v6 = vadd.f32 %v5836_v0, %v3560_v63  ;;  %v5037_v0 = vld [vmem:[%s7848_s0 + $0xd0] sm:$0xff] }
 0x1a2   :  { %2816 = vmatmul.bf16.gmra.mxu3 %v5201_v55  ;;  %2261 = vmatmul.bf16.gmra.mxu1 %v5090_v56  ;;  %5843 = vtanh.f32 %v2220_v62 }
 0x1a3   :  { %v3782_v16 = vmul.f32 0.25, %v3671_v6 }
 0x1a4   :  { %v2497_v3 = vpop.f32.mrf.mxu2 }
 0x1a5   :  { %v5838_v4 = vpop.eup %5837  ;;  %v2498_v49 = vadd.f32 %v6896_v2, %v2497_v3  ;;  %v2777_v5 = vpop.f32.mrf.mxu3 }
 0x1a6   :  { %v3561_v8 = vadd.f32 %v5838_v4, %v3450_v1  ;;  %v1949_v9 = vpop.f32.mrf.mxu0  ;;  %v5840_v10 = vpop.eup %5839  ;;  %v2778_v22 = vadd.f32 %v6896_v2, %v2777_v5  ;;  %v5147_v1 = vld [vmem:[%s7848_s0 + $0x440] sm:$0xff]  ;;  %v5092_v5 = vld [vmem:[%s7848_s0 + $0x288] sm:$0xff] }
 0x1a7   :  { %v2224_v13 = vpop.f32.mrf.mxu1  ;;  %5845 = vtanh.f32 %v2498_v49  ;;  %v5842_v15 = vpop.eup %5841  ;;  %v1950_v45 = vadd.f32 %v6896_v2, %v1949_v9  ;;  %v5203_v49 = vld [vmem:[%s7848_s0 + $0x600] sm:$0xff] }
 0x1a8   :  { %v3672_v14 = vadd.f32 %v5840_v10, %v3561_v8  ;;  %5847 = vtanh.f32 %v1945_v7  ;;  %v5844_v19 = vpop.eup %5843  ;;  %v2225_v36 = vadd.f32 %v6896_v2, %v2224_v13 }
 0x1a9   :  { %5849 = vtanh.f32 %v2223_v12  ;;  %v3451_v27 = vadd.f32 %v5844_v19, %v5842_v15 }
 0x1aa   :  { %v3783_v17 = vmul.f32 0.25, %v3672_v14  ;;  %5851 = vtanh.f32 %v2775_v18 }
 0x1ac   :  { %v5314_v20 = vpack.c.bf16 %v3783_v17, %v3782_v16  ;;  %v2499_v21 = vpop.f32.mrf.mxu2 }
 0x1ad   :  { %v2500_v23 = vadd.f32 %v6896_v2, %v2499_v21  ;;  %v2779_v24 = vpop.f32.mrf.mxu3  ;;  %v5846_v31 = vpop.eup %5845 }
 0x1ae   :  { %5529 = vst [vmem:[%s7849_s3 + $0x70] sm:$0xff] %v5314_v20   ;;  %v1952_v28 = vpop.f32.mrf.mxu0  ;;  %v5848_v33 = vpop.eup %5847  ;;  %v3562_v37 = vadd.f32 %v5846_v31, %v3451_v27  ;;  %v2780_v57 = vadd.f32 %v6896_v2, %v2779_v24 }
 0x1af   :  { %5853 = vtanh.f32 %v2500_v23  ;;  %v2227_v32 = vpop.f32.mrf.mxu1  ;;  %v5850_v35 = vpop.eup %5849  ;;  %v1953_v9 = vadd.f32 %v6896_v2, %v1952_v28 }
 0x1b0   :  { %5855 = vtanh.f32 %v2778_v22  ;;  %v5852_v38 = vpop.eup %5851  ;;  %v3452_v39 = vadd.f32 %v5850_v35, %v5848_v33  ;;  %v2228_v51 = vadd.f32 %v6896_v2, %v2227_v32 }
 0x1b1   :  { %1991 = vmatmul.bf16.gmra.mxu0 %v5036_v25  ;;  %2541 = vmatmul.bf16.gmra.mxu2 %v5146_v26  ;;  %5857 = vtanh.f32 %v1948_v34  ;;  %v3673_v44 = vadd.f32 %v5852_v38, %v3562_v37  ;;  %v5038_v38 = vld [vmem:[%s7848_s0 + $0xd8] sm:$0xff] }
 0x1b2   :  { %2821 = vmatmul.bf16.gmra.mxu3 %v5202_v29  ;;  %2266 = vmatmul.bf16.gmra.mxu1 %v5091_v30  ;;  %5859 = vtanh.f32 %v2225_v36 }
 0x1b3   :  { %v3784_v55 = vmul.f32 0.25, %v3673_v44 }
 0x1b4   :  { %v2502_v40 = vpop.f32.mrf.mxu2 }
 0x1b5   :  { %v5854_v41 = vpop.eup %5853  ;;  %v2503_v42 = vadd.f32 %v6896_v2, %v2502_v40  ;;  %v2782_v43 = vpop.f32.mrf.mxu3 }
 0x1b6   :  { %v3563_v47 = vadd.f32 %v5854_v41, %v3452_v39  ;;  %v1954_v48 = vpop.f32.mrf.mxu0  ;;  %v5856_v50 = vpop.eup %5855  ;;  %v2783_v61 = vadd.f32 %v6896_v2, %v2782_v43  ;;  %v5148_v39 = vld [vmem:[%s7848_s0 + $0x448] sm:$0xff]  ;;  %v5093_v43 = vld [vmem:[%s7848_s0 + $0x290] sm:$0xff] }
 0x1b7   :  { %v2229_v52 = vpop.f32.mrf.mxu1  ;;  %5861 = vtanh.f32 %v2503_v42  ;;  %v5858_v54 = vpop.eup %5857  ;;  %v1955_v21 = vadd.f32 %v6896_v2, %v1954_v48  ;;  %v5204_v42 = vld [vmem:[%s7848_s0 + $0x608] sm:$0xff] }
 0x1b8   :  { %v3674_v53 = vadd.f32 %v5856_v50, %v3563_v47  ;;  %5863 = vtanh.f32 %v1950_v45  ;;  %v5860_v58 = vpop.eup %5859  ;;  %v2230_v12 = vadd.f32 %v6896_v2, %v2229_v52 }
 0x1b9   :  { %5865 = vtanh.f32 %v2228_v51  ;;  %v3453_v3 = vadd.f32 %v5860_v58, %v5858_v54 }
 0x1ba   :  { %v3785_v56 = vmul.f32 0.25, %v3674_v53  ;;  %5867 = vtanh.f32 %v2780_v57 }
 0x1bc   :  { %v5319_v59 = vpack.c.bf16 %v3785_v56, %v3784_v55  ;;  %v2504_v60 = vpop.f32.mrf.mxu2 }
 0x1bd   :  { %v2505_v62 = vadd.f32 %v6896_v2, %v2504_v60  ;;  %v2784_v63 = vpop.f32.mrf.mxu3  ;;  %v5862_v6 = vpop.eup %5861 }
 0x1be   :  { %5530 = vst [vmem:[%s7849_s3 + $0x78] sm:$0xff] %v5319_v59   ;;  %v1957_v4 = vpop.f32.mrf.mxu0  ;;  %v5864_v8 = vpop.eup %5863  ;;  %v3564_v13 = vadd.f32 %v5862_v6, %v3453_v3  ;;  %v2785_v31 = vadd.f32 %v6896_v2, %v2784_v63 }
 0x1bf   :  { %5869 = vtanh.f32 %v2505_v62  ;;  %v2232_v7 = vpop.f32.mrf.mxu1  ;;  %v5866_v10 = vpop.eup %5865  ;;  %v1958_v48 = vadd.f32 %v6896_v2, %v1957_v4 }
 0x1c0   :  { %5871 = vtanh.f32 %v2783_v61  ;;  %v5868_v14 = vpop.eup %5867  ;;  %v3454_v15 = vadd.f32 %v5866_v10, %v5864_v8  ;;  %v2233_v25 = vadd.f32 %v6896_v2, %v2232_v7 }
 0x1c1   :  { %1996 = vmatmul.bf16.gmra.mxu0 %v5037_v0  ;;  %2546 = vmatmul.bf16.gmra.mxu2 %v5147_v1  ;;  %5873 = vtanh.f32 %v1953_v9  ;;  %v3675_v20 = vadd.f32 %v5868_v14, %v3564_v13  ;;  %v5039_v14 = vld [vmem:[%s7848_s0 + $0xe0] sm:$0xff] }
 0x1c2   :  { %2826 = vmatmul.bf16.gmra.mxu3 %v5203_v49  ;;  %2271 = vmatmul.bf16.gmra.mxu1 %v5092_v5  ;;  %5875 = vtanh.f32 %v2230_v12 }
 0x1c3   :  { %v3786_v29 = vmul.f32 0.25, %v3675_v20 }
 0x1c4   :  { %v2507_v16 = vpop.f32.mrf.mxu2 }
 0x1c5   :  { %v5870_v17 = vpop.eup %5869  ;;  %v2508_v18 = vadd.f32 %v6896_v2, %v2507_v16  ;;  %v2787_v19 = vpop.f32.mrf.mxu3 }
 0x1c6   :  { %v3565_v22 = vadd.f32 %v5870_v17, %v3454_v15  ;;  %v1959_v23 = vpop.f32.mrf.mxu0  ;;  %v5872_v24 = vpop.eup %5871  ;;  %v2788_v35 = vadd.f32 %v6896_v2, %v2787_v19  ;;  %v5149_v15 = vld [vmem:[%s7848_s0 + $0x450] sm:$0xff]  ;;  %v5094_v19 = vld [vmem:[%s7848_s0 + $0x298] sm:$0xff] }
 0x1c7   :  { %v2234_v26 = vpop.f32.mrf.mxu1  ;;  %5877 = vtanh.f32 %v2508_v18  ;;  %v5874_v28 = vpop.eup %5873  ;;  %v1960_v60 = vadd.f32 %v6896_v2, %v1959_v23  ;;  %v5205_v18 = vld [vmem:[%s7848_s0 + $0x610] sm:$0xff] }
 0x1c8   :  { %v3676_v27 = vadd.f32 %v5872_v24, %v3565_v22  ;;  %5879 = vtanh.f32 %v1955_v21  ;;  %v5876_v32 = vpop.eup %5875  ;;  %v2235_v51 = vadd.f32 %v6896_v2, %v2234_v26 }
 0x1c9   :  { %5881 = vtanh.f32 %v2233_v25  ;;  %v3455_v40 = vadd.f32 %v5876_v32, %v5874_v28 }
 0x1ca   :  { %v3787_v30 = vmul.f32 0.25, %v3676_v27  ;;  %5883 = vtanh.f32 %v2785_v31 }
 0x1cc   :  { %v5324_v33 = vpack.c.bf16 %v3787_v30, %v3786_v29  ;;  %v2509_v34 = vpop.f32.mrf.mxu2 }
 0x1cd   :  { %v2510_v36 = vadd.f32 %v6896_v2, %v2509_v34  ;;  %v2789_v37 = vpop.f32.mrf.mxu3  ;;  %v5878_v44 = vpop.eup %5877 }
 0x1ce   :  { %5531 = vst [vmem:[%s7849_s3 + $0x80] sm:$0xff] %v5324_v33   ;;  %v1962_v41 = vpop.f32.mrf.mxu0  ;;  %v5880_v47 = vpop.eup %5879  ;;  %v3566_v52 = vadd.f32 %v5878_v44, %v3455_v40  ;;  %v2790_v6 = vadd.f32 %v6896_v2, %v2789_v37 }
 0x1cf   :  { %5885 = vtanh.f32 %v2510_v36  ;;  %v2237_v45 = vpop.f32.mrf.mxu1  ;;  %v5882_v50 = vpop.eup %5881  ;;  %v1963_v23 = vadd.f32 %v6896_v2, %v1962_v41 }
 0x1d0   :  { %5887 = vtanh.f32 %v2788_v35  ;;  %v5884_v53 = vpop.eup %5883  ;;  %v3456_v54 = vadd.f32 %v5882_v50, %v5880_v47  ;;  %v2238_v0 = vadd.f32 %v6896_v2, %v2237_v45 }
 0x1d1   :  { %2001 = vmatmul.bf16.gmra.mxu0 %v5038_v38  ;;  %2551 = vmatmul.bf16.gmra.mxu2 %v5148_v39  ;;  %5889 = vtanh.f32 %v1958_v48  ;;  %v3677_v59 = vadd.f32 %v5884_v53, %v3566_v52  ;;  %v5040_v53 = vld [vmem:[%s7848_s0 + $0xe8] sm:$0xff] }
 0x1d2   :  { %2831 = vmatmul.bf16.gmra.mxu3 %v5204_v42  ;;  %2276 = vmatmul.bf16.gmra.mxu1 %v5093_v43  ;;  %5891 = vtanh.f32 %v2235_v51 }
 0x1d3   :  { %v3788_v49 = vmul.f32 0.25, %v3677_v59 }
 0x1d4   :  { %v2512_v55 = vpop.f32.mrf.mxu2 }
 0x1d5   :  { %v5886_v56 = vpop.eup %5885  ;;  %v2513_v57 = vadd.f32 %v6896_v2, %v2512_v55  ;;  %v2792_v58 = vpop.f32.mrf.mxu3 }
 0x1d6   :  { %v3567_v61 = vadd.f32 %v5886_v56, %v3456_v54  ;;  %v1964_v62 = vpop.f32.mrf.mxu0  ;;  %v5888_v63 = vpop.eup %5887  ;;  %v2793_v10 = vadd.f32 %v6896_v2, %v2792_v58  ;;  %v5150_v54 = vld [vmem:[%s7848_s0 + $0x458] sm:$0xff]  ;;  %v5095_v58 = vld [vmem:[%s7848_s0 + $0x2a0] sm:$0xff] }
 0x1d7   :  { %v2239_v1 = vpop.f32.mrf.mxu1  ;;  %5893 = vtanh.f32 %v2513_v57  ;;  %v5890_v4 = vpop.eup %5889  ;;  %v1965_v34 = vadd.f32 %v6896_v2, %v1964_v62  ;;  %v5206_v57 = vld [vmem:[%s7848_s0 + $0x618] sm:$0xff] }
 0x1d8   :  { %v3678_v3 = vadd.f32 %v5888_v63, %v3567_v61  ;;  %5895 = vtanh.f32 %v1960_v60  ;;  %v5892_v7 = vpop.eup %5891  ;;  %v2240_v25 = vadd.f32 %v6896_v2, %v2239_v1 }
 0x1d9   :  { %5897 = vtanh.f32 %v2238_v0  ;;  %v3457_v16 = vadd.f32 %v5892_v7, %v5890_v4 }
 0x1da   :  { %v3789_v5 = vmul.f32 0.25, %v3678_v3  ;;  %5899 = vtanh.f32 %v2790_v6 }
 0x1dc   :  { %v5329_v8 = vpack.c.bf16 %v3789_v5, %v3788_v49  ;;  %v2514_v9 = vpop.f32.mrf.mxu2 }
 0x1dd   :  { %v2515_v12 = vadd.f32 %v6896_v2, %v2514_v9  ;;  %v2794_v13 = vpop.f32.mrf.mxu3  ;;  %v5894_v20 = vpop.eup %5893 }
 0x1de   :  { %5532 = vst [vmem:[%s7849_s3 + $0x88] sm:$0xff] %v5329_v8   ;;  %v1967_v17 = vpop.f32.mrf.mxu0  ;;  %v5896_v22 = vpop.eup %5895  ;;  %v3568_v26 = vadd.f32 %v5894_v20, %v3457_v16  ;;  %v2795_v44 = vadd.f32 %v6896_v2, %v2794_v13  ;;  %v7134_v20 = vld [vmem:[%s7847_s2] ss:$0 sm:$0xff] }
 0x1df   :  { %5901 = vtanh.f32 %v2515_v12  ;;  %v2242_v21 = vpop.f32.mrf.mxu1  ;;  %v5898_v24 = vpop.eup %5897  ;;  %v1968_v62 = vadd.f32 %v6896_v2, %v1967_v17 }
 0x1e0   :  { %5903 = vtanh.f32 %v2793_v10  ;;  %v5900_v27 = vpop.eup %5899  ;;  %v3458_v28 = vadd.f32 %v5898_v24, %v5896_v22  ;;  %v2243_v38 = vadd.f32 %v6896_v2, %v2242_v21 }
 0x1e1   :  { %2006 = vmatmul.bf16.gmra.mxu0 %v5039_v14  ;;  %2556 = vmatmul.bf16.gmra.mxu2 %v5149_v15  ;;  %5905 = vtanh.f32 %v1963_v23  ;;  %v3679_v33 = vadd.f32 %v5900_v27, %v3568_v26  ;;  %v5041_v27 = vld [vmem:[%s7848_s0 + $0xf0] sm:$0xff] }
 0x1e2   :  { %2836 = vmatmul.bf16.gmra.mxu3 %v5205_v18  ;;  %2281 = vmatmul.bf16.gmra.mxu1 %v5094_v19  ;;  %5907 = vtanh.f32 %v2240_v25 }
 0x1e3   :  { %v3790_v42 = vmul.f32 0.25, %v3679_v33 }
 0x1e4   :  { %v2517_v29 = vpop.f32.mrf.mxu2 }
 0x1e5   :  { %v5902_v30 = vpop.eup %5901  ;;  %v2518_v31 = vadd.f32 %v6896_v2, %v2517_v29  ;;  %v2797_v32 = vpop.f32.mrf.mxu3 }
 0x1e6   :  { %v3569_v35 = vadd.f32 %v5902_v30, %v3458_v28  ;;  %v1969_v36 = vpop.f32.mrf.mxu0  ;;  %v5904_v37 = vpop.eup %5903  ;;  %v2798_v50 = vadd.f32 %v6896_v2, %v2797_v32  ;;  %v5151_v28 = vld [vmem:[%s7848_s0 + $0x460] sm:$0xff]  ;;  %v5096_v32 = vld [vmem:[%s7848_s0 + $0x2a8] sm:$0xff] }
 0x1e7   :  { %v2244_v39 = vpop.f32.mrf.mxu1  ;;  %5909 = vtanh.f32 %v2518_v31  ;;  %v5906_v41 = vpop.eup %5905  ;;  %v1970_v9 = vadd.f32 %v6896_v2, %v1969_v36  ;;  %v5207_v31 = vld [vmem:[%s7848_s0 + $0x620] sm:$0xff] }
 0x1e8   :  { %v3680_v40 = vadd.f32 %v5904_v37, %v3569_v35  ;;  %5911 = vtanh.f32 %v1965_v34  ;;  %v5908_v45 = vpop.eup %5907  ;;  %v2245_v0 = vadd.f32 %v6896_v2, %v2244_v39 }
 0x1e9   :  { %5913 = vtanh.f32 %v2243_v38  ;;  %v3459_v55 = vadd.f32 %v5908_v45, %v5906_v41 }
 0x1ea   :  { %v3791_v43 = vmul.f32 0.25, %v3680_v40  ;;  %5915 = vtanh.f32 %v2795_v44 }
 0x1ec   :  { %v5334_v47 = vpack.c.bf16 %v3791_v43, %v3790_v42  ;;  %v2519_v48 = vpop.f32.mrf.mxu2 }
 0x1ed   :  { %v2520_v51 = vadd.f32 %v6896_v2, %v2519_v48  ;;  %v2799_v52 = vpop.f32.mrf.mxu3  ;;  %v5910_v59 = vpop.eup %5909 }
 0x1ee   :  { %5533 = vst [vmem:[%s7849_s3 + $0x90] sm:$0xff] %v5334_v47   ;;  %v1972_v56 = vpop.f32.mrf.mxu0  ;;  %v5912_v61 = vpop.eup %5911  ;;  %v3570_v1 = vadd.f32 %v5910_v59, %v3459_v55  ;;  %v2800_v21 = vadd.f32 %v7134_v20, %v2799_v52 }
 0x1ef   :  { %5917 = vtanh.f32 %v2520_v51  ;;  %v2247_v60 = vpop.f32.mrf.mxu1  ;;  %v5914_v63 = vpop.eup %5913  ;;  %v1973_v36 = vadd.f32 %v7134_v20, %v1972_v56 }
 0x1f0   :  { %5919 = vtanh.f32 %v2798_v50  ;;  %v5916_v3 = vpop.eup %5915  ;;  %v3460_v4 = vadd.f32 %v5914_v63, %v5912_v61  ;;  %v2248_v14 = vadd.f32 %v6896_v2, %v2247_v60 }
 0x1f1   :  { %2011 = vmatmul.bf16.gmra.mxu0 %v5040_v53  ;;  %2561 = vmatmul.bf16.gmra.mxu2 %v5150_v54  ;;  %5921 = vtanh.f32 %v1968_v62  ;;  %v3681_v8 = vadd.f32 %v5916_v3, %v3570_v1  ;;  %v5042_v3 = vld [vmem:[%s7848_s0 + $0xf8] sm:$0xff] }
 0x1f2   :  { %2841 = vmatmul.bf16.gmra.mxu3 %v5206_v57  ;;  %2286 = vmatmul.bf16.gmra.mxu1 %v5095_v58  ;;  %5923 = vtanh.f32 %v2245_v0 }
 0x1f3   :  { %v3792_v18 = vmul.f32 0.25, %v3681_v8 }
 0x1f4   :  { %v2522_v49 = vpop.f32.mrf.mxu2 }
 0x1f5   :  { %v5918_v5 = vpop.eup %5917  ;;  %v2523_v6 = vadd.f32 %v6896_v2, %v2522_v49  ;;  %v2802_v7 = vpop.f32.mrf.mxu3 }
 0x1f6   :  { %v3571_v10 = vadd.f32 %v5918_v5, %v3460_v4  ;;  %v1974_v12 = vpop.f32.mrf.mxu0  ;;  %v5920_v13 = vpop.eup %5919  ;;  %v2803_v2 = vadd.f32 %v7134_v20, %v2802_v7  ;;  %v5152_v4 = vld [vmem:[%s7848_s0 + $0x468] sm:$0xff]  ;;  %v5097_v7 = vld [vmem:[%s7848_s0 + $0x2b0] sm:$0xff] }
 0x1f7   :  { %v2249_v15 = vpop.f32.mrf.mxu1  ;;  %5925 = vtanh.f32 %v2523_v6  ;;  %v5922_v17 = vpop.eup %5921  ;;  %v1975_v48 = vadd.f32 %v7134_v20, %v1974_v12  ;;  %v5208_v6 = vld [vmem:[%s7848_s0 + $0x628] sm:$0xff] }
 0x1f8   :  { %v3682_v16 = vadd.f32 %v5920_v13, %v3571_v10  ;;  %5927 = vtanh.f32 %v1970_v9  ;;  %v5924_v22 = vpop.eup %5923  ;;  %v2250_v38 = vadd.f32 %v7134_v20, %v2249_v15 }
 0x1f9   :  { %5929 = vtanh.f32 %v2248_v14  ;;  %v3461_v29 = vadd.f32 %v5924_v22, %v5922_v17 }
 0x1fa   :  { %v3793_v19 = vmul.f32 0.25, %v3682_v16  ;;  %5931 = vtanh.f32 %v2800_v21 }
 0x1fc   :  { %v5339_v23 = vpack.c.bf16 %v3793_v19, %v3792_v18  ;;  %v2524_v24 = vpop.f32.mrf.mxu2 }
 0x1fd   :  { %v2525_v25 = vadd.f32 %v7134_v20, %v2524_v24  ;;  %v2804_v26 = vpop.f32.mrf.mxu3  ;;  %v5926_v33 = vpop.eup %5925 }
 0x1fe   :  { %5534 = vst [vmem:[%s7849_s3 + $0x98] sm:$0xff] %v5339_v23   ;;  %v1977_v30 = vpop.f32.mrf.mxu0  ;;  %v5928_v35 = vpop.eup %5927  ;;  %v3572_v39 = vadd.f32 %v5926_v33, %v3461_v29  ;;  %v2805_v59 = vadd.f32 %v7134_v20, %v2804_v26 }
 0x1ff   :  { %5933 = vtanh.f32 %v2525_v25  ;;  %v2252_v34 = vpop.f32.mrf.mxu1  ;;  %v5930_v37 = vpop.eup %5929  ;;  %v1978_v12 = vadd.f32 %v7134_v20, %v1977_v30 }
 0x200   :  { %5935 = vtanh.f32 %v2803_v2  ;;  %v5932_v40 = vpop.eup %5931  ;;  %v3462_v41 = vadd.f32 %v5930_v37, %v5928_v35  ;;  %v2253_v53 = vadd.f32 %v7134_v20, %v2252_v34 }
 0x201   :  { %2016 = vmatmul.bf16.gmra.mxu0 %v5041_v27  ;;  %2566 = vmatmul.bf16.gmra.mxu2 %v5151_v28  ;;  %5937 = vtanh.f32 %v1973_v36  ;;  %v3683_v47 = vadd.f32 %v5932_v40, %v3572_v39  ;;  %v5043_v40 = vld [vmem:[%s7848_s0 + $0x100] sm:$0xff] }
 0x202   :  { %2846 = vmatmul.bf16.gmra.mxu3 %v5207_v31  ;;  %2291 = vmatmul.bf16.gmra.mxu1 %v5096_v32  ;;  %5939 = vtanh.f32 %v2250_v38 }
 0x203   :  { %v3794_v57 = vmul.f32 0.25, %v3683_v47 }
 0x204   :  { %v2527_v42 = vpop.f32.mrf.mxu2 }
 0x205   :  { %v5934_v43 = vpop.eup %5933  ;;  %v2528_v44 = vadd.f32 %v7134_v20, %v2527_v42  ;;  %v2807_v45 = vpop.f32.mrf.mxu3 }
 0x206   :  { %v3573_v50 = vadd.f32 %v5934_v43, %v3462_v41  ;;  %v1979_v51 = vpop.f32.mrf.mxu0  ;;  %v5936_v52 = vpop.eup %5935  ;;  %v2808_v63 = vadd.f32 %v7134_v20, %v2807_v45  ;;  %v5153_v41 = vld [vmem:[%s7848_s0 + $0x470] sm:$0xff]  ;;  %v5098_v45 = vld [vmem:[%s7848_s0 + $0x2b8] sm:$0xff] }
 0x207   :  { %v2254_v54 = vpop.f32.mrf.mxu1  ;;  %5941 = vtanh.f32 %v2528_v44  ;;  %v5938_v56 = vpop.eup %5937  ;;  %v1980_v24 = vadd.f32 %v7134_v20, %v1979_v51  ;;  %v5209_v44 = vld [vmem:[%s7848_s0 + $0x630] sm:$0xff] }
 0x208   :  { %v3684_v55 = vadd.f32 %v5936_v52, %v3573_v50  ;;  %5943 = vtanh.f32 %v1975_v48  ;;  %v5940_v60 = vpop.eup %5939  ;;  %v2255_v14 = vadd.f32 %v7134_v20, %v2254_v54 }
 0x209   :  { %5945 = vtanh.f32 %v2253_v53  ;;  %v3463_v49 = vadd.f32 %v5940_v60, %v5938_v56 }
 0x20a   :  { %v3795_v58 = vmul.f32 0.25, %v3684_v55  ;;  %5947 = vtanh.f32 %v2805_v59 }
 0x20c   :  { %v5344_v61 = vpack.c.bf16 %v3795_v58, %v3794_v57  ;;  %v2529_v62 = vpop.f32.mrf.mxu2 }
 0x20d   :  { %v2530_v0 = vadd.f32 %v7134_v20, %v2529_v62  ;;  %v2809_v1 = vpop.f32.mrf.mxu3  ;;  %v5942_v8 = vpop.eup %5941 }
 0x20e   :  { %5535 = vst [vmem:[%s7849_s3 + $0xa0] sm:$0xff] %v5344_v61   ;;  %v1982_v5 = vpop.f32.mrf.mxu0  ;;  %v5944_v10 = vpop.eup %5943  ;;  %v3574_v15 = vadd.f32 %v5942_v8, %v3463_v49  ;;  %v2810_v33 = vadd.f32 %v7134_v20, %v2809_v1 }
 0x20f   :  { %5949 = vtanh.f32 %v2530_v0  ;;  %v2257_v9 = vpop.f32.mrf.mxu1  ;;  %v5946_v13 = vpop.eup %5945  ;;  %v1983_v51 = vadd.f32 %v7134_v20, %v1982_v5 }
 0x210   :  { %5951 = vtanh.f32 %v2808_v63  ;;  %v5948_v16 = vpop.eup %5947  ;;  %v3464_v17 = vadd.f32 %v5946_v13, %v5944_v10  ;;  %v2258_v27 = vadd.f32 %v7134_v20, %v2257_v9 }
 0x211   :  { %2021 = vmatmul.bf16.gmra.mxu0 %v5042_v3  ;;  %2571 = vmatmul.bf16.gmra.mxu2 %v5152_v4  ;;  %5953 = vtanh.f32 %v1978_v12  ;;  %v3685_v23 = vadd.f32 %v5948_v16, %v3574_v15  ;;  %v5044_v16 = vld [vmem:[%s7848_s0 + $0x108] sm:$0xff] }
 0x212   :  { %2851 = vmatmul.bf16.gmra.mxu3 %v5208_v6  ;;  %2296 = vmatmul.bf16.gmra.mxu1 %v5097_v7  ;;  %5955 = vtanh.f32 %v2255_v14 }
 0x213   :  { %v3796_v31 = vmul.f32 0.25, %v3685_v23 }
 0x214   :  { %v2532_v18 = vpop.f32.mrf.mxu2 }
 0x215   :  { %v5950_v19 = vpop.eup %5949  ;;  %v2533_v21 = vadd.f32 %v7134_v20, %v2532_v18  ;;  %v2812_v22 = vpop.f32.mrf.mxu3 }
 0x216   :  { %v3575_v2 = vadd.f32 %v5950_v19, %v3464_v17  ;;  %v1984_v25 = vpop.f32.mrf.mxu0  ;;  %v5952_v26 = vpop.eup %5951  ;;  %v2813_v37 = vadd.f32 %v7134_v20, %v2812_v22  ;;  %v5154_v17 = vld [vmem:[%s7848_s0 + $0x478] sm:$0xff]  ;;  %v5099_v22 = vld [vmem:[%s7848_s0 + $0x2c0] sm:$0xff] }
 0x217   :  { %v2259_v28 = vpop.f32.mrf.mxu1  ;;  %5957 = vtanh.f32 %v2533_v21  ;;  %v5954_v30 = vpop.eup %5953  ;;  %v1985_v62 = vadd.f32 %v7134_v20, %v1984_v25  ;;  %v5210_v21 = vld [vmem:[%s7848_s0 + $0x638] sm:$0xff] }
 0x218   :  { %v3686_v29 = vadd.f32 %v5952_v26, %v3575_v2  ;;  %5959 = vtanh.f32 %v1980_v24  ;;  %v5956_v34 = vpop.eup %5955  ;;  %v2260_v53 = vadd.f32 %v7134_v20, %v2259_v28 }
 0x219   :  { %5961 = vtanh.f32 %v2258_v27  ;;  %v3465_v42 = vadd.f32 %v5956_v34, %v5954_v30 }
 0x21a   :  { %v3797_v32 = vmul.f32 0.25, %v3686_v29  ;;  %5963 = vtanh.f32 %v2810_v33 }
 0x21c   :  { %v5349_v35 = vpack.c.bf16 %v3797_v32, %v3796_v31  ;;  %v2534_v36 = vpop.f32.mrf.mxu2 }
 0x21d   :  { %v2535_v38 = vadd.f32 %v7134_v20, %v2534_v36  ;;  %v2814_v39 = vpop.f32.mrf.mxu3  ;;  %v5958_v47 = vpop.eup %5957 }
 0x21e   :  { %5536 = vst [vmem:[%s7849_s3 + $0xa8] sm:$0xff] %v5349_v35   ;;  %v1987_v43 = vpop.f32.mrf.mxu0  ;;  %v5960_v50 = vpop.eup %5959  ;;  %v3576_v54 = vadd.f32 %v5958_v47, %v3465_v42  ;;  %v2815_v8 = vadd.f32 %v7134_v20, %v2814_v39 }
 0x21f   :  { %5965 = vtanh.f32 %v2535_v38  ;;  %v2262_v48 = vpop.f32.mrf.mxu1  ;;  %v5962_v52 = vpop.eup %5961  ;;  %v1988_v25 = vadd.f32 %v7134_v20, %v1987_v43 }
 0x220   :  { %5967 = vtanh.f32 %v2813_v37  ;;  %v5964_v55 = vpop.eup %5963  ;;  %v3466_v56 = vadd.f32 %v5962_v52, %v5960_v50  ;;  %v2263_v3 = vadd.f32 %v7134_v20, %v2262_v48 }
 0x221   :  { %2026 = vmatmul.bf16.gmra.mxu0 %v5043_v40  ;;  %2576 = vmatmul.bf16.gmra.mxu2 %v5153_v41  ;;  %5969 = vtanh.f32 %v1983_v51  ;;  %v3687_v61 = vadd.f32 %v5964_v55, %v3576_v54  ;;  %v5045_v55 = vld [vmem:[%s7848_s0 + $0x110] sm:$0xff] }
 0x222   :  { %2856 = vmatmul.bf16.gmra.mxu3 %v5209_v44  ;;  %2301 = vmatmul.bf16.gmra.mxu1 %v5098_v45  ;;  %5971 = vtanh.f32 %v2260_v53 }
 0x223   :  { %v3798_v6 = vmul.f32 0.25, %v3687_v61 }
 0x224   :  { %v2537_v57 = vpop.f32.mrf.mxu2 }
 0x225   :  { %v5966_v58 = vpop.eup %5965  ;;  %v2538_v59 = vadd.f32 %v7134_v20, %v2537_v57  ;;  %v2817_v60 = vpop.f32.mrf.mxu3 }
 0x226   :  { %v3577_v63 = vadd.f32 %v5966_v58, %v3466_v56  ;;  %v1989_v0 = vpop.f32.mrf.mxu0  ;;  %v5968_v1 = vpop.eup %5967  ;;  %v2818_v13 = vadd.f32 %v7134_v20, %v2817_v60  ;;  %v5155_v56 = vld [vmem:[%s7848_s0 + $0x480] sm:$0xff]  ;;  %v5100_v60 = vld [vmem:[%s7848_s0 + $0x2c8] sm:$0xff] }
 0x227   :  { %v2264_v4 = vpop.f32.mrf.mxu1  ;;  %5973 = vtanh.f32 %v2538_v59  ;;  %v5970_v5 = vpop.eup %5969  ;;  %v1990_v36 = vadd.f32 %v7134_v20, %v1989_v0  ;;  %v5211_v59 = vld [vmem:[%s7848_s0 + $0x640] sm:$0xff] }
 0x228   :  { %v3688_v49 = vadd.f32 %v5968_v1, %v3577_v63  ;;  %5975 = vtanh.f32 %v1985_v62  ;;  %v5972_v9 = vpop.eup %5971  ;;  %v2265_v27 = vadd.f32 %v7134_v20, %v2264_v4 }
 0x229   :  { %5977 = vtanh.f32 %v2263_v3  ;;  %v3467_v18 = vadd.f32 %v5972_v9, %v5970_v5 }
 0x22a   :  { %v3799_v7 = vmul.f32 0.25, %v3688_v49  ;;  %5979 = vtanh.f32 %v2815_v8 }
 0x22c   :  { %v5354_v10 = vpack.c.bf16 %v3799_v7, %v3798_v6  ;;  %v2539_v12 = vpop.f32.mrf.mxu2 }
 0x22d   :  { %v2540_v14 = vadd.f32 %v7134_v20, %v2539_v12  ;;  %v2819_v15 = vpop.f32.mrf.mxu3  ;;  %v5974_v23 = vpop.eup %5973 }
 0x22e   :  { %5537 = vst [vmem:[%s7849_s3 + $0xb0] sm:$0xff] %v5354_v10   ;;  %v1992_v19 = vpop.f32.mrf.mxu0  ;;  %v5976_v2 = vpop.eup %5975  ;;  %v3578_v28 = vadd.f32 %v5974_v23, %v3467_v18  ;;  %v2820_v47 = vadd.f32 %v7134_v20, %v2819_v15 }
 0x22f   :  { %5981 = vtanh.f32 %v2540_v14  ;;  %v2267_v24 = vpop.f32.mrf.mxu1  ;;  %v5978_v26 = vpop.eup %5977  ;;  %v1993_v0 = vadd.f32 %v7134_v20, %v1992_v19 }
 0x230   :  { %5983 = vtanh.f32 %v2818_v13  ;;  %v5980_v29 = vpop.eup %5979  ;;  %v3468_v30 = vadd.f32 %v5978_v26, %v5976_v2  ;;  %v2268_v40 = vadd.f32 %v7134_v20, %v2267_v24 }
 0x231   :  { %2031 = vmatmul.bf16.gmra.mxu0 %v5044_v16  ;;  %2581 = vmatmul.bf16.gmra.mxu2 %v5154_v17  ;;  %5985 = vtanh.f32 %v1988_v25  ;;  %v3689_v35 = vadd.f32 %v5980_v29, %v3578_v28  ;;  %v5046_v29 = vld [vmem:[%s7848_s0 + $0x118] sm:$0xff] }
 0x232   :  { %2861 = vmatmul.bf16.gmra.mxu3 %v5210_v21  ;;  %2306 = vmatmul.bf16.gmra.mxu1 %v5099_v22  ;;  %5987 = vtanh.f32 %v2265_v27 }
 0x233   :  { %v3800_v44 = vmul.f32 0.25, %v3689_v35 }
 0x234   :  { %v2542_v31 = vpop.f32.mrf.mxu2 }
 0x235   :  { %v5982_v32 = vpop.eup %5981  ;;  %v2543_v33 = vadd.f32 %v7134_v20, %v2542_v31  ;;  %v2822_v34 = vpop.f32.mrf.mxu3 }
 0x236   :  { %v3579_v37 = vadd.f32 %v5982_v32, %v3468_v30  ;;  %v1994_v38 = vpop.f32.mrf.mxu0  ;;  %v5984_v39 = vpop.eup %5983  ;;  %v2823_v52 = vadd.f32 %v7134_v20, %v2822_v34  ;;  %v5156_v30 = vld [vmem:[%s7848_s0 + $0x488] sm:$0xff]  ;;  %v5101_v34 = vld [vmem:[%s7848_s0 + $0x2d0] sm:$0xff] }
 0x237   :  { %v2269_v41 = vpop.f32.mrf.mxu1  ;;  %5989 = vtanh.f32 %v2543_v33  ;;  %v5986_v43 = vpop.eup %5985  ;;  %v1995_v12 = vadd.f32 %v7134_v20, %v1994_v38  ;;  %v5212_v33 = vld [vmem:[%s7848_s0 + $0x648] sm:$0xff] }
 0x238   :  { %v3690_v42 = vadd.f32 %v5984_v39, %v3579_v37  ;;  %5991 = vtanh.f32 %v1990_v36  ;;  %v5988_v48 = vpop.eup %5987  ;;  %v2270_v3 = vadd.f32 %v7134_v20, %v2269_v41 }
 0x239   :  { %5993 = vtanh.f32 %v2268_v40  ;;  %v3469_v57 = vadd.f32 %v5988_v48, %v5986_v43 }
 0x23a   :  { %v3801_v45 = vmul.f32 0.25, %v3690_v42  ;;  %5995 = vtanh.f32 %v2820_v47 }
 0x23c   :  { %v5359_v50 = vpack.c.bf16 %v3801_v45, %v3800_v44  ;;  %v2544_v51 = vpop.f32.mrf.mxu2 }
 0x23d   :  { %v2545_v53 = vadd.f32 %v7134_v20, %v2544_v51  ;;  %v2824_v54 = vpop.f32.mrf.mxu3  ;;  %v5990_v61 = vpop.eup %5989 }
 0x23e   :  { %5538 = vst [vmem:[%s7849_s3 + $0xb8] sm:$0xff] %v5359_v50   ;;  %v1997_v58 = vpop.f32.mrf.mxu0  ;;  %v5992_v63 = vpop.eup %5991  ;;  %v3580_v4 = vadd.f32 %v5990_v61, %v3469_v57  ;;  %v2825_v23 = vadd.f32 %v7134_v20, %v2824_v54 }
 0x23f   :  { %5997 = vtanh.f32 %v2545_v53  ;;  %v2272_v62 = vpop.f32.mrf.mxu1  ;;  %v5994_v1 = vpop.eup %5993  ;;  %v1998_v38 = vadd.f32 %v7134_v20, %v1997_v58 }
 0x240   :  { %5999 = vtanh.f32 %v2823_v52  ;;  %v5996_v49 = vpop.eup %5995  ;;  %v3470_v5 = vadd.f32 %v5994_v1, %v5992_v63  ;;  %v2273_v16 = vadd.f32 %v7134_v20, %v2272_v62 }
 0x241   :  { %2036 = vmatmul.bf16.gmra.mxu0 %v5045_v55  ;;  %2586 = vmatmul.bf16.gmra.mxu2 %v5155_v56  ;;  %6001 = vtanh.f32 %v1993_v0  ;;  %v3691_v10 = vadd.f32 %v5996_v49, %v3580_v4  ;;  %v5047_v49 = vld [vmem:[%s7848_s0 + $0x120] sm:$0xff] }
 0x242   :  { %2866 = vmatmul.bf16.gmra.mxu3 %v5211_v59  ;;  %2311 = vmatmul.bf16.gmra.mxu1 %v5100_v60  ;;  %6003 = vtanh.f32 %v2270_v3 }
 0x243   :  { %v3802_v21 = vmul.f32 0.25, %v3691_v10 }
 0x244   :  { %v2547_v6 = vpop.f32.mrf.mxu2 }
 0x245   :  { %v5998_v7 = vpop.eup %5997  ;;  %v2548_v8 = vadd.f32 %v7134_v20, %v2547_v6  ;;  %v2827_v9 = vpop.f32.mrf.mxu3 }
 0x246   :  { %v3581_v13 = vadd.f32 %v5998_v7, %v3470_v5  ;;  %v1999_v14 = vpop.f32.mrf.mxu0  ;;  %v6000_v15 = vpop.eup %5999  ;;  %v2828_v26 = vadd.f32 %v7134_v20, %v2827_v9  ;;  %v5157_v5 = vld [vmem:[%s7848_s0 + $0x490] sm:$0xff]  ;;  %v5102_v9 = vld [vmem:[%s7848_s0 + $0x2d8] sm:$0xff] }
 0x247   :  { %v2274_v17 = vpop.f32.mrf.mxu1  ;;  %6005 = vtanh.f32 %v2548_v8  ;;  %v6002_v19 = vpop.eup %6001  ;;  %v2000_v51 = vadd.f32 %v7134_v20, %v1999_v14  ;;  %v5213_v8 = vld [vmem:[%s7848_s0 + $0x650] sm:$0xff] }
 0x248   :  { %v3692_v18 = vadd.f32 %v6000_v15, %v3581_v13  ;;  %6007 = vtanh.f32 %v1995_v12  ;;  %v6004_v24 = vpop.eup %6003  ;;  %v2275_v40 = vadd.f32 %v7134_v20, %v2274_v17 }
 0x249   :  { %6009 = vtanh.f32 %v2273_v16  ;;  %v3471_v31 = vadd.f32 %v6004_v24, %v6002_v19 }
 0x24a   :  { %v3803_v22 = vmul.f32 0.25, %v3692_v18  ;;  %6011 = vtanh.f32 %v2825_v23 }
 0x24c   :  { %v5364_v2 = vpack.c.bf16 %v3803_v22, %v3802_v21  ;;  %v2549_v25 = vpop.f32.mrf.mxu2 }
 0x24d   :  { %v2550_v27 = vadd.f32 %v7134_v20, %v2549_v25  ;;  %v2829_v28 = vpop.f32.mrf.mxu3  ;;  %v6006_v35 = vpop.eup %6005 }
 0x24e   :  { %5539 = vst [vmem:[%s7849_s3 + $0xc0] sm:$0xff] %v5364_v2   ;;  %v2002_v32 = vpop.f32.mrf.mxu0  ;;  %v6008_v37 = vpop.eup %6007  ;;  %v3582_v41 = vadd.f32 %v6006_v35, %v3471_v31  ;;  %v2830_v61 = vadd.f32 %v7134_v20, %v2829_v28 }
 0x24f   :  { %6013 = vtanh.f32 %v2550_v27  ;;  %v2277_v36 = vpop.f32.mrf.mxu1  ;;  %v6010_v39 = vpop.eup %6009  ;;  %v2003_v14 = vadd.f32 %v7134_v20, %v2002_v32 }
 0x250   :  { %6015 = vtanh.f32 %v2828_v26  ;;  %v6012_v42 = vpop.eup %6011  ;;  %v3472_v43 = vadd.f32 %v6010_v39, %v6008_v37  ;;  %v2278_v55 = vadd.f32 %v7134_v20, %v2277_v36 }
 0x251   :  { %2041 = vmatmul.bf16.gmra.mxu0 %v5046_v29  ;;  %2591 = vmatmul.bf16.gmra.mxu2 %v5156_v30  ;;  %6017 = vtanh.f32 %v1998_v38  ;;  %v3693_v50 = vadd.f32 %v6012_v42, %v3582_v41  ;;  %v5048_v42 = vld [vmem:[%s7848_s0 + $0x128] sm:$0xff] }
 0x252   :  { %2871 = vmatmul.bf16.gmra.mxu3 %v5212_v33  ;;  %2316 = vmatmul.bf16.gmra.mxu1 %v5101_v34  ;;  %6019 = vtanh.f32 %v2275_v40 }
 0x253   :  { %v3804_v59 = vmul.f32 0.25, %v3693_v50 }
 0x254   :  { %v2552_v44 = vpop.f32.mrf.mxu2 }
 0x255   :  { %v6014_v45 = vpop.eup %6013  ;;  %v2553_v47 = vadd.f32 %v7134_v20, %v2552_v44  ;;  %v2832_v48 = vpop.f32.mrf.mxu3 }
 0x256   :  { %v3583_v52 = vadd.f32 %v6014_v45, %v3472_v43  ;;  %v2004_v53 = vpop.f32.mrf.mxu0  ;;  %v6016_v54 = vpop.eup %6015  ;;  %v2833_v1 = vadd.f32 %v7134_v20, %v2832_v48  ;;  %v5158_v43 = vld [vmem:[%s7848_s0 + $0x498] sm:$0xff]  ;;  %v5103_v48 = vld [vmem:[%s7848_s0 + $0x2e0] sm:$0xff] }
 0x257   :  { %v2279_v56 = vpop.f32.mrf.mxu1  ;;  %6021 = vtanh.f32 %v2553_v47  ;;  %v6018_v58 = vpop.eup %6017  ;;  %v2005_v25 = vadd.f32 %v7134_v20, %v2004_v53  ;;  %v5214_v47 = vld [vmem:[%s7848_s0 + $0x658] sm:$0xff] }
 0x258   :  { %v3694_v57 = vadd.f32 %v6016_v54, %v3583_v52  ;;  %6023 = vtanh.f32 %v2000_v51  ;;  %v6020_v62 = vpop.eup %6019  ;;  %v2280_v16 = vadd.f32 %v7134_v20, %v2279_v56 }
 0x259   :  { %6025 = vtanh.f32 %v2278_v55  ;;  %v3473_v6 = vadd.f32 %v6020_v62, %v6018_v58 }
 0x25a   :  { %v3805_v60 = vmul.f32 0.25, %v3694_v57  ;;  %6027 = vtanh.f32 %v2830_v61 }
 0x25c   :  { %v5369_v63 = vpack.c.bf16 %v3805_v60, %v3804_v59  ;;  %v2554_v0 = vpop.f32.mrf.mxu2 }
 0x25d   :  { %v2555_v3 = vadd.f32 %v7134_v20, %v2554_v0  ;;  %v2834_v4 = vpop.f32.mrf.mxu3  ;;  %v6022_v10 = vpop.eup %6021 }
 0x25e   :  { %5540 = vst [vmem:[%s7849_s3 + $0xc8] sm:$0xff] %v5369_v63   ;;  %v2007_v7 = vpop.f32.mrf.mxu0  ;;  %v6024_v13 = vpop.eup %6023  ;;  %v3584_v17 = vadd.f32 %v6022_v10, %v3473_v6  ;;  %v2835_v35 = vadd.f32 %v7134_v20, %v2834_v4 }
 0x25f   :  { %6029 = vtanh.f32 %v2555_v3  ;;  %v2282_v12 = vpop.f32.mrf.mxu1  ;;  %v6026_v15 = vpop.eup %6025  ;;  %v2008_v53 = vadd.f32 %v7134_v20, %v2007_v7 }
 0x260   :  { %6031 = vtanh.f32 %v2833_v1  ;;  %v6028_v18 = vpop.eup %6027  ;;  %v3474_v19 = vadd.f32 %v6026_v15, %v6024_v13  ;;  %v2283_v29 = vadd.f32 %v7134_v20, %v2282_v12 }
 0x261   :  { %2046 = vmatmul.bf16.gmra.mxu0 %v5047_v49  ;;  %2596 = vmatmul.bf16.gmra.mxu2 %v5157_v5  ;;  %6033 = vtanh.f32 %v2003_v14  ;;  %v3695_v2 = vadd.f32 %v6028_v18, %v3584_v17  ;;  %v5049_v18 = vld [vmem:[%s7848_s0 + $0x130] sm:$0xff] }
 0x262   :  { %2876 = vmatmul.bf16.gmra.mxu3 %v5213_v8  ;;  %2321 = vmatmul.bf16.gmra.mxu1 %v5102_v9  ;;  %6035 = vtanh.f32 %v2280_v16 }
 0x263   :  { %v3806_v33 = vmul.f32 0.25, %v3695_v2 }
 0x264   :  { %v2557_v21 = vpop.f32.mrf.mxu2 }
 0x265   :  { %v6030_v22 = vpop.eup %6029  ;;  %v2558_v23 = vadd.f32 %v7134_v20, %v2557_v21  ;;  %v2837_v24 = vpop.f32.mrf.mxu3 }
 0x266   :  { %v3585_v26 = vadd.f32 %v6030_v22, %v3474_v19  ;;  %v2009_v27 = vpop.f32.mrf.mxu0  ;;  %v6032_v28 = vpop.eup %6031  ;;  %v2838_v39 = vadd.f32 %v7134_v20, %v2837_v24  ;;  %v5159_v19 = vld [vmem:[%s7848_s0 + $0x4a0] sm:$0xff]  ;;  %v5104_v24 = vld [vmem:[%s7848_s0 + $0x2e8] sm:$0xff] }
 0x267   :  { %v2284_v30 = vpop.f32.mrf.mxu1  ;;  %6037 = vtanh.f32 %v2558_v23  ;;  %v6034_v32 = vpop.eup %6033  ;;  %v2010_v0 = vadd.f32 %v7134_v20, %v2009_v27  ;;  %v5215_v23 = vld [vmem:[%s7848_s0 + $0x660] sm:$0xff] }
 0x268   :  { %v3696_v31 = vadd.f32 %v6032_v28, %v3585_v26  ;;  %6039 = vtanh.f32 %v2005_v25  ;;  %v6036_v36 = vpop.eup %6035  ;;  %v2285_v55 = vadd.f32 %v7134_v20, %v2284_v30 }
 0x269   :  { %6041 = vtanh.f32 %v2283_v29  ;;  %v3475_v44 = vadd.f32 %v6036_v36, %v6034_v32 }
 0x26a   :  { %v3807_v34 = vmul.f32 0.25, %v3696_v31  ;;  %6043 = vtanh.f32 %v2835_v35 }
 0x26c   :  { %v5374_v37 = vpack.c.bf16 %v3807_v34, %v3806_v33  ;;  %v2559_v38 = vpop.f32.mrf.mxu2 }
 0x26d   :  { %v2560_v40 = vadd.f32 %v7134_v20, %v2559_v38  ;;  %v2839_v41 = vpop.f32.mrf.mxu3  ;;  %v6038_v50 = vpop.eup %6037 }
 0x26e   :  { %5541 = vst [vmem:[%s7849_s3 + $0xd0] sm:$0xff] %v5374_v37   ;;  %v2012_v45 = vpop.f32.mrf.mxu0  ;;  %v6040_v52 = vpop.eup %6039  ;;  %v3586_v56 = vadd.f32 %v6038_v50, %v3475_v44  ;;  %v2840_v10 = vadd.f32 %v7134_v20, %v2839_v41 }
 0x26f   :  { %6045 = vtanh.f32 %v2560_v40  ;;  %v2287_v51 = vpop.f32.mrf.mxu1  ;;  %v6042_v54 = vpop.eup %6041  ;;  %v2013_v27 = vadd.f32 %v7134_v20, %v2012_v45 }
 0x270   :  { %6047 = vtanh.f32 %v2838_v39  ;;  %v6044_v57 = vpop.eup %6043  ;;  %v3476_v58 = vadd.f32 %v6042_v54, %v6040_v52  ;;  %v2288_v49 = vadd.f32 %v7134_v20, %v2287_v51 }
 0x271   :  { %2051 = vmatmul.bf16.gmra.mxu0 %v5048_v42  ;;  %2601 = vmatmul.bf16.gmra.mxu2 %v5158_v43  ;;  %6049 = vtanh.f32 %v2008_v53  ;;  %v3697_v63 = vadd.f32 %v6044_v57, %v3586_v56  ;;  %v5050_v57 = vld [vmem:[%s7848_s0 + $0x138] sm:$0xff] }
 0x272   :  { %2881 = vmatmul.bf16.gmra.mxu3 %v5214_v47  ;;  %2326 = vmatmul.bf16.gmra.mxu1 %v5103_v48  ;;  %6051 = vtanh.f32 %v2285_v55 }
 0x273   :  { %v3808_v8 = vmul.f32 0.25, %v3697_v63 }
 0x274   :  { %v2562_v59 = vpop.f32.mrf.mxu2 }
 0x275   :  { %v6046_v60 = vpop.eup %6045  ;;  %v2563_v61 = vadd.f32 %v7134_v20, %v2562_v59  ;;  %v2842_v62 = vpop.f32.mrf.mxu3 }
 0x276   :  { %v3587_v1 = vadd.f32 %v6046_v60, %v3476_v58  ;;  %v2014_v3 = vpop.f32.mrf.mxu0  ;;  %v6048_v4 = vpop.eup %6047  ;;  %v2843_v15 = vadd.f32 %v7134_v20, %v2842_v62  ;;  %v5160_v58 = vld [vmem:[%s7848_s0 + $0x4a8] sm:$0xff]  ;;  %v5105_v62 = vld [vmem:[%s7848_s0 + $0x2f0] sm:$0xff] }
 0x277   :  { %v2289_v5 = vpop.f32.mrf.mxu1  ;;  %6053 = vtanh.f32 %v2563_v61  ;;  %v6050_v7 = vpop.eup %6049  ;;  %v2015_v38 = vadd.f32 %v7134_v20, %v2014_v3  ;;  %v5216_v61 = vld [vmem:[%s7848_s0 + $0x668] sm:$0xff] }
 0x278   :  { %v3698_v6 = vadd.f32 %v6048_v4, %v3587_v1  ;;  %6055 = vtanh.f32 %v2010_v0  ;;  %v6052_v12 = vpop.eup %6051  ;;  %v2290_v29 = vadd.f32 %v7134_v20, %v2289_v5 }
 0x279   :  { %6057 = vtanh.f32 %v2288_v49  ;;  %v3477_v21 = vadd.f32 %v6052_v12, %v6050_v7 }
 0x27a   :  { %v3809_v9 = vmul.f32 0.25, %v3698_v6  ;;  %6059 = vtanh.f32 %v2840_v10 }
 0x27c   :  { %v5379_v13 = vpack.c.bf16 %v3809_v9, %v3808_v8  ;;  %v2564_v14 = vpop.f32.mrf.mxu2 }
 0x27d   :  { %v2565_v16 = vadd.f32 %v7134_v20, %v2564_v14  ;;  %v2844_v17 = vpop.f32.mrf.mxu3  ;;  %v6054_v2 = vpop.eup %6053 }
 0x27e   :  { %5542 = vst [vmem:[%s7849_s3 + $0xd8] sm:$0xff] %v5379_v13   ;;  %v2017_v22 = vpop.f32.mrf.mxu0  ;;  %v6056_v26 = vpop.eup %6055  ;;  %v3588_v30 = vadd.f32 %v6054_v2, %v3477_v21  ;;  %v2845_v50 = vadd.f32 %v7134_v20, %v2844_v17 }
 0x27f   :  { %6061 = vtanh.f32 %v2565_v16  ;;  %v2292_v25 = vpop.f32.mrf.mxu1  ;;  %v6058_v28 = vpop.eup %6057  ;;  %v2018_v3 = vadd.f32 %v7134_v20, %v2017_v22 }
 0x280   :  { %6063 = vtanh.f32 %v2843_v15  ;;  %v6060_v31 = vpop.eup %6059  ;;  %v3478_v32 = vadd.f32 %v6058_v28, %v6056_v26  ;;  %v2293_v42 = vadd.f32 %v7134_v20, %v2292_v25 }
 0x281   :  { %2056 = vmatmul.bf16.gmra.mxu0 %v5049_v18  ;;  %2606 = vmatmul.bf16.gmra.mxu2 %v5159_v19  ;;  %6065 = vtanh.f32 %v2013_v27  ;;  %v3699_v37 = vadd.f32 %v6060_v31, %v3588_v30  ;;  %v5051_v31 = vld [vmem:[%s7848_s0 + $0x140] sm:$0xff] }
 0x282   :  { %2886 = vmatmul.bf16.gmra.mxu3 %v5215_v23  ;;  %2331 = vmatmul.bf16.gmra.mxu1 %v5104_v24  ;;  %6067 = vtanh.f32 %v2290_v29 }
 0x283   :  { %v3810_v47 = vmul.f32 0.25, %v3699_v37 }
 0x284   :  { %v2567_v33 = vpop.f32.mrf.mxu2 }
 0x285   :  { %v6062_v34 = vpop.eup %6061  ;;  %v2568_v35 = vadd.f32 %v7134_v20, %v2567_v33  ;;  %v2847_v36 = vpop.f32.mrf.mxu3 }
 0x286   :  { %v3589_v39 = vadd.f32 %v6062_v34, %v3478_v32  ;;  %v2019_v40 = vpop.f32.mrf.mxu0  ;;  %v6064_v41 = vpop.eup %6063  ;;  %v2848_v54 = vadd.f32 %v7134_v20, %v2847_v36  ;;  %v5161_v32 = vld [vmem:[%s7848_s0 + $0x4b0] sm:$0xff] }
 0x287   :  { %v2294_v43 = vpop.f32.mrf.mxu1  ;;  %6069 = vtanh.f32 %v2568_v35  ;;  %v6066_v45 = vpop.eup %6065  ;;  %v2020_v14 = vadd.f32 %v7134_v20, %v2019_v40  ;;  %v5106_v35 = vld [vmem:[%s7848_s0 + $0x2f8] sm:$0xff] }
 0x288   :  { %v3700_v44 = vadd.f32 %v6064_v41, %v3589_v39  ;;  %6071 = vtanh.f32 %v2015_v38  ;;  %v6068_v51 = vpop.eup %6067  ;;  %v2295_v49 = vadd.f32 %v7134_v20, %v2294_v43  ;;  %v7387_v39 = vld [vmem:[%s7847_s2] ss:$0 sm:$0xff] }
 0x289   :  { %6073 = vtanh.f32 %v2293_v42  ;;  %v3479_v59 = vadd.f32 %v6068_v51, %v6066_v45 }
 0x28a   :  { %v3811_v48 = vmul.f32 0.25, %v3700_v44  ;;  %6075 = vtanh.f32 %v2845_v50 }
 0x28c   :  { %v5384_v52 = vpack.c.bf16 %v3811_v48, %v3810_v47  ;;  %v2569_v53 = vpop.f32.mrf.mxu2 }
 0x28d   :  { %v2570_v55 = vadd.f32 %v7134_v20, %v2569_v53  ;;  %v2849_v56 = vpop.f32.mrf.mxu3  ;;  %v6070_v63 = vpop.eup %6069 }
 0x28e   :  { %5543 = vst [vmem:[%s7849_s3 + $0xe0] sm:$0xff] %v5384_v52   ;;  %v2022_v60 = vpop.f32.mrf.mxu0  ;;  %v6072_v1 = vpop.eup %6071  ;;  %v3590_v5 = vadd.f32 %v6070_v63, %v3479_v59  ;;  %v2850_v2 = vadd.f32 %v7134_v20, %v2849_v56 }
 0x28f   :  { %6077 = vtanh.f32 %v2570_v55  ;;  %v2297_v0 = vpop.f32.mrf.mxu1  ;;  %v6074_v4 = vpop.eup %6073  ;;  %v2023_v40 = vadd.f32 %v7387_v39, %v2022_v60 }
 0x290   :  { %6079 = vtanh.f32 %v2848_v54  ;;  %v6076_v6 = vpop.eup %6075  ;;  %v3480_v7 = vadd.f32 %v6074_v4, %v6072_v1  ;;  %v2298_v18 = vadd.f32 %v7134_v20, %v2297_v0 }
 0x291   :  { %2061 = vmatmul.bf16.gmra.mxu0 %v5050_v57  ;;  %2611 = vmatmul.bf16.gmra.mxu2 %v5160_v58  ;;  %6081 = vtanh.f32 %v2018_v3  ;;  %v3701_v13 = vadd.f32 %v6076_v6, %v3590_v5  ;;  %v5052_v6 = vld [vmem:[%s7848_s0 + $0x148] sm:$0xff] }
 0x292   :  { %2891 = vmatmul.bf16.gmra.mxu3 %v5216_v61  ;;  %2336 = vmatmul.bf16.gmra.mxu1 %v5105_v62  ;;  %6083 = vtanh.f32 %v2295_v49 }
 0x293   :  { %v3812_v23 = vmul.f32 0.25, %v3701_v13 }
 0x294   :  { %v2572_v8 = vpop.f32.mrf.mxu2 }
 0x295   :  { %v6078_v9 = vpop.eup %6077  ;;  %v2573_v10 = vadd.f32 %v7134_v20, %v2572_v8  ;;  %v2852_v12 = vpop.f32.mrf.mxu3 }
 0x296   :  { %v3591_v15 = vadd.f32 %v6078_v9, %v3480_v7  ;;  %v2024_v16 = vpop.f32.mrf.mxu0  ;;  %v6080_v17 = vpop.eup %6079  ;;  %v2853_v28 = vadd.f32 %v7134_v20, %v2852_v12  ;;  %v5162_v7 = vld [vmem:[%s7848_s0 + $0x4b8] sm:$0xff]  ;;  %v5107_v12 = vld [vmem:[%s7848_s0 + $0x300] sm:$0xff] }
 0x297   :  { %v2299_v19 = vpop.f32.mrf.mxu1  ;;  %6085 = vtanh.f32 %v2573_v10  ;;  %v6082_v22 = vpop.eup %6081  ;;  %v2025_v53 = vadd.f32 %v7387_v39, %v2024_v16  ;;  %v5218_v10 = vld [vmem:[%s7848_s0 + $0x678] sm:$0xff] }
 0x298   :  { %v3702_v21 = vadd.f32 %v6080_v17, %v3591_v15  ;;  %6087 = vtanh.f32 %v2020_v14  ;;  %v6084_v25 = vpop.eup %6083  ;;  %v2300_v42 = vadd.f32 %v7387_v39, %v2299_v19 }
 0x299   :  { %6089 = vtanh.f32 %v2298_v18  ;;  %v3481_v33 = vadd.f32 %v6084_v25, %v6082_v22 }
 0x29a   :  { %v3813_v24 = vmul.f32 0.25, %v3702_v21  ;;  %6091 = vtanh.f32 %v2850_v2 }
 0x29c   :  { %v5389_v26 = vpack.c.bf16 %v3813_v24, %v3812_v23  ;;  %v2574_v27 = vpop.f32.mrf.mxu2 }
 0x29d   :  { %v2575_v29 = vadd.f32 %v7134_v20, %v2574_v27  ;;  %v2854_v30 = vpop.f32.mrf.mxu3  ;;  %v5217_v20 = vld [vmem:[%s7848_s0 + $0x670] sm:$0xff]  ;;  %v6086_v36 = vpop.eup %6085 }
 0x29e   :  { %5544 = vst [vmem:[%s7849_s3 + $0xe8] sm:$0xff] %v5389_v26   ;;  %v2027_v34 = vpop.f32.mrf.mxu0  ;;  %v6088_v38 = vpop.eup %6087  ;;  %v3592_v43 = vadd.f32 %v6086_v36, %v3481_v33  ;;  %v2855_v63 = vadd.f32 %v7387_v39, %v2854_v30 }
 0x29f   :  { %6093 = vtanh.f32 %v2575_v29  ;;  %v2302_v37 = vpop.f32.mrf.mxu1  ;;  %v6090_v41 = vpop.eup %6089  ;;  %v2028_v16 = vadd.f32 %v7387_v39, %v2027_v34 }
 0x2a0   :  { %6095 = vtanh.f32 %v2853_v28  ;;  %v6092_v44 = vpop.eup %6091  ;;  %v3482_v45 = vadd.f32 %v6090_v41, %v6088_v38  ;;  %v2303_v57 = vadd.f32 %v7387_v39, %v2302_v37 }
 0x2a1   :  { %2066 = vmatmul.bf16.gmra.mxu0 %v5051_v31  ;;  %2616 = vmatmul.bf16.gmra.mxu2 %v5161_v32  ;;  %6097 = vtanh.f32 %v2023_v40  ;;  %v3703_v52 = vadd.f32 %v6092_v44, %v3592_v43  ;;  %v5053_v44 = vld [vmem:[%s7848_s0 + $0x150] sm:$0xff] }
 0x2a2   :  { %2896 = vmatmul.bf16.gmra.mxu3 %v5217_v20  ;;  %2341 = vmatmul.bf16.gmra.mxu1 %v5106_v35  ;;  %6099 = vtanh.f32 %v2300_v42 }
 0x2a3   :  { %v3814_v61 = vmul.f32 0.25, %v3703_v52 }
 0x2a4   :  { %v2577_v47 = vpop.f32.mrf.mxu2 }
 0x2a5   :  { %v6094_v48 = vpop.eup %6093  ;;  %v2578_v50 = vadd.f32 %v7387_v39, %v2577_v47  ;;  %v2857_v51 = vpop.f32.mrf.mxu3 }
 0x2a6   :  { %v3593_v54 = vadd.f32 %v6094_v48, %v3482_v45  ;;  %v2029_v55 = vpop.f32.mrf.mxu0  ;;  %v6096_v56 = vpop.eup %6095  ;;  %v2858_v4 = vadd.f32 %v7387_v39, %v2857_v51  ;;  %v5163_v45 = vld [vmem:[%s7848_s0 + $0x4c0] sm:$0xff]  ;;  %v5108_v51 = vld [vmem:[%s7848_s0 + $0x308] sm:$0xff] }
 0x2a7   :  { %v2304_v58 = vpop.f32.mrf.mxu1  ;;  %6101 = vtanh.f32 %v2578_v50  ;;  %v6098_v60 = vpop.eup %6097  ;;  %v2030_v27 = vadd.f32 %v7387_v39, %v2029_v55  ;;  %v5219_v50 = vld [vmem:[%s7848_s0 + $0x680] sm:$0xff] }
 0x2a8   :  { %v3704_v59 = vadd.f32 %v6096_v56, %v3593_v54  ;;  %6103 = vtanh.f32 %v2025_v53  ;;  %v6100_v0 = vpop.eup %6099  ;;  %v2305_v18 = vadd.f32 %v7387_v39, %v2304_v58 }
 0x2a9   :  { %6105 = vtanh.f32 %v2303_v57  ;;  %v3483_v8 = vadd.f32 %v6100_v0, %v6098_v60 }
 0x2aa   :  { %v3815_v62 = vmul.f32 0.25, %v3704_v59  ;;  %6107 = vtanh.f32 %v2855_v63 }
 0x2ac   :  { %v5394_v1 = vpack.c.bf16 %v3815_v62, %v3814_v61  ;;  %v2579_v3 = vpop.f32.mrf.mxu2 }
 0x2ad   :  { %v2580_v49 = vadd.f32 %v7387_v39, %v2579_v3  ;;  %v2859_v5 = vpop.f32.mrf.mxu3  ;;  %v6102_v13 = vpop.eup %6101 }
 0x2ae   :  { %5545 = vst [vmem:[%s7849_s3 + $0xf0] sm:$0xff] %v5394_v1   ;;  %v2032_v9 = vpop.f32.mrf.mxu0  ;;  %v6104_v15 = vpop.eup %6103  ;;  %v3594_v19 = vadd.f32 %v6102_v13, %v3483_v8  ;;  %v2860_v36 = vadd.f32 %v7387_v39, %v2859_v5 }
 0x2af   :  { %6109 = vtanh.f32 %v2580_v49  ;;  %v2307_v14 = vpop.f32.mrf.mxu1  ;;  %v6106_v17 = vpop.eup %6105  ;;  %v2033_v55 = vadd.f32 %v7387_v39, %v2032_v9 }
 0x2b0   :  { %6111 = vtanh.f32 %v2858_v4  ;;  %v6108_v21 = vpop.eup %6107  ;;  %v3484_v22 = vadd.f32 %v6106_v17, %v6104_v15  ;;  %v2308_v31 = vadd.f32 %v7387_v39, %v2307_v14 }
 0x2b1   :  { %2071 = vmatmul.bf16.gmra.mxu0 %v5052_v6  ;;  %2621 = vmatmul.bf16.gmra.mxu2 %v5162_v7  ;;  %6113 = vtanh.f32 %v2028_v16  ;;  %v3705_v26 = vadd.f32 %v6108_v21, %v3594_v19  ;;  %v5054_v21 = vld [vmem:[%s7848_s0 + $0x158] sm:$0xff] }
 0x2b2   :  { %2901 = vmatmul.bf16.gmra.mxu3 %v5218_v10  ;;  %2346 = vmatmul.bf16.gmra.mxu1 %v5107_v12  ;;  %6115 = vtanh.f32 %v2305_v18 }
 0x2b3   :  { %v3816_v20 = vmul.f32 0.25, %v3705_v26 }
 0x2b4   :  { %v2582_v23 = vpop.f32.mrf.mxu2 }
 0x2b5   :  { %v6110_v24 = vpop.eup %6109  ;;  %v2583_v2 = vadd.f32 %v7387_v39, %v2582_v23  ;;  %v2862_v25 = vpop.f32.mrf.mxu3 }
 0x2b6   :  { %v3595_v28 = vadd.f32 %v6110_v24, %v3484_v22  ;;  %v2034_v29 = vpop.f32.mrf.mxu0  ;;  %v6112_v30 = vpop.eup %6111  ;;  %v2863_v41 = vadd.f32 %v7387_v39, %v2862_v25  ;;  %v5164_v22 = vld [vmem:[%s7848_s0 + $0x4c8] sm:$0xff]  ;;  %v5109_v25 = vld [vmem:[%s7848_s0 + $0x310] sm:$0xff] }
 0x2b7   :  { %v2309_v32 = vpop.f32.mrf.mxu1  ;;  %6117 = vtanh.f32 %v2583_v2  ;;  %v6114_v34 = vpop.eup %6113  ;;  %v2035_v3 = vadd.f32 %v7387_v39, %v2034_v29  ;;  %v5220_v2 = vld [vmem:[%s7848_s0 + $0x688] sm:$0xff] }
 0x2b8   :  { %v3706_v33 = vadd.f32 %v6112_v30, %v3595_v28  ;;  %6119 = vtanh.f32 %v2030_v27  ;;  %v6116_v37 = vpop.eup %6115  ;;  %v2310_v57 = vadd.f32 %v7387_v39, %v2309_v32 }
 0x2b9   :  { %6121 = vtanh.f32 %v2308_v31  ;;  %v3485_v47 = vadd.f32 %v6116_v37, %v6114_v34 }
 0x2ba   :  { %v3817_v35 = vmul.f32 0.25, %v3706_v33  ;;  %6123 = vtanh.f32 %v2860_v36 }
 0x2bc   :  { %v5399_v38 = vpack.c.bf16 %v3817_v35, %v3816_v20  ;;  %v2584_v40 = vpop.f32.mrf.mxu2 }
 0x2bd   :  { %v2585_v42 = vadd.f32 %v7387_v39, %v2584_v40  ;;  %v2864_v43 = vpop.f32.mrf.mxu3  ;;  %v6118_v52 = vpop.eup %6117 }
 0x2be   :  { %5546 = vst [vmem:[%s7849_s3 + $0xf8] sm:$0xff] %v5399_v38   ;;  %v2037_v48 = vpop.f32.mrf.mxu0  ;;  %v6120_v54 = vpop.eup %6119  ;;  %v3596_v58 = vadd.f32 %v6118_v52, %v3485_v47  ;;  %v2865_v13 = vadd.f32 %v7387_v39, %v2864_v43 }
 0x2bf   :  { %6125 = vtanh.f32 %v2585_v42  ;;  %v2312_v53 = vpop.f32.mrf.mxu1  ;;  %v6122_v56 = vpop.eup %6121  ;;  %v2038_v29 = vadd.f32 %v7387_v39, %v2037_v48 }
 0x2c0   :  { %6127 = vtanh.f32 %v2863_v41  ;;  %v6124_v59 = vpop.eup %6123  ;;  %v3486_v60 = vadd.f32 %v6122_v56, %v6120_v54  ;;  %v2313_v6 = vadd.f32 %v7387_v39, %v2312_v53 }
 0x2c1   :  { %2076 = vmatmul.bf16.gmra.mxu0 %v5053_v44  ;;  %2626 = vmatmul.bf16.gmra.mxu2 %v5163_v45  ;;  %6129 = vtanh.f32 %v2033_v55  ;;  %v3707_v1 = vadd.f32 %v6124_v59, %v3596_v58  ;;  %v5055_v59 = vld [vmem:[%s7848_s0 + $0x160] sm:$0xff] }
 0x2c2   :  { %2906 = vmatmul.bf16.gmra.mxu3 %v5219_v50  ;;  %2351 = vmatmul.bf16.gmra.mxu1 %v5108_v51  ;;  %6131 = vtanh.f32 %v2310_v57 }
 0x2c3   :  { %v3818_v10 = vmul.f32 0.25, %v3707_v1 }
 0x2c4   :  { %v2587_v61 = vpop.f32.mrf.mxu2 }
 0x2c5   :  { %v6126_v62 = vpop.eup %6125  ;;  %v2588_v63 = vadd.f32 %v7387_v39, %v2587_v61  ;;  %v2867_v0 = vpop.f32.mrf.mxu3 }
 0x2c6   :  { %v3597_v4 = vadd.f32 %v6126_v62, %v3486_v60  ;;  %v2039_v49 = vpop.f32.mrf.mxu0  ;;  %v6128_v5 = vpop.eup %6127  ;;  %v2868_v17 = vadd.f32 %v7387_v39, %v2867_v0  ;;  %v5165_v60 = vld [vmem:[%s7848_s0 + $0x4d0] sm:$0xff]  ;;  %v5110_v0 = vld [vmem:[%s7848_s0 + $0x318] sm:$0xff] }
 0x2c7   :  { %v2314_v7 = vpop.f32.mrf.mxu1  ;;  %6133 = vtanh.f32 %v2588_v63  ;;  %v6130_v9 = vpop.eup %6129  ;;  %v2040_v40 = vadd.f32 %v7387_v39, %v2039_v49  ;;  %v5221_v63 = vld [vmem:[%s7848_s0 + $0x690] sm:$0xff] }
 0x2c8   :  { %v3708_v8 = vadd.f32 %v6128_v5, %v3597_v4  ;;  %6135 = vtanh.f32 %v2035_v3  ;;  %v6132_v14 = vpop.eup %6131  ;;  %v2315_v31 = vadd.f32 %v7387_v39, %v2314_v7 }
 0x2c9   :  { %6137 = vtanh.f32 %v2313_v6  ;;  %v3487_v23 = vadd.f32 %v6132_v14, %v6130_v9 }
 0x2ca   :  { %v3819_v12 = vmul.f32 0.25, %v3708_v8  ;;  %6139 = vtanh.f32 %v2865_v13 }
 0x2cc   :  { %v5404_v15 = vpack.c.bf16 %v3819_v12, %v3818_v10  ;;  %v2589_v16 = vpop.f32.mrf.mxu2 }
 0x2cd   :  { %v2590_v18 = vadd.f32 %v7387_v39, %v2589_v16  ;;  %v2869_v19 = vpop.f32.mrf.mxu3  ;;  %v6134_v26 = vpop.eup %6133 }
 0x2ce   :  { %5547 = vst [vmem:[%s7849_s3 + $0x100] sm:$0xff] %v5404_v15   ;;  %v2042_v24 = vpop.f32.mrf.mxu0  ;;  %v6136_v28 = vpop.eup %6135  ;;  %v3598_v32 = vadd.f32 %v6134_v26, %v3487_v23  ;;  %v2870_v52 = vadd.f32 %v7387_v39, %v2869_v19 }
 0x2cf   :  { %6141 = vtanh.f32 %v2590_v18  ;;  %v2317_v27 = vpop.f32.mrf.mxu1  ;;  %v6138_v30 = vpop.eup %6137  ;;  %v2043_v49 = vadd.f32 %v7387_v39, %v2042_v24 }
 0x2d0   :  { %6143 = vtanh.f32 %v2868_v17  ;;  %v6140_v33 = vpop.eup %6139  ;;  %v3488_v34 = vadd.f32 %v6138_v30, %v6136_v28  ;;  %v2318_v44 = vadd.f32 %v7387_v39, %v2317_v27 }
 0x2d1   :  { %2081 = vmatmul.bf16.gmra.mxu0 %v5054_v21  ;;  %2631 = vmatmul.bf16.gmra.mxu2 %v5164_v22  ;;  %6145 = vtanh.f32 %v2038_v29  ;;  %v3709_v38 = vadd.f32 %v6140_v33, %v3598_v32  ;;  %v5056_v33 = vld [vmem:[%s7848_s0 + $0x168] sm:$0xff] }
 0x2d2   :  { %2911 = vmatmul.bf16.gmra.mxu3 %v5220_v2  ;;  %2356 = vmatmul.bf16.gmra.mxu1 %v5109_v25  ;;  %6147 = vtanh.f32 %v2315_v31 }
 0x2d3   :  { %v3820_v50 = vmul.f32 0.25, %v3709_v38 }
 0x2d4   :  { %v2592_v20 = vpop.f32.mrf.mxu2 }
 0x2d5   :  { %v6142_v35 = vpop.eup %6141  ;;  %v2593_v36 = vadd.f32 %v7387_v39, %v2592_v20  ;;  %v2872_v37 = vpop.f32.mrf.mxu3 }
 0x2d6   :  { %v3599_v41 = vadd.f32 %v6142_v35, %v3488_v34  ;;  %v2044_v42 = vpop.f32.mrf.mxu0  ;;  %v6144_v43 = vpop.eup %6143  ;;  %v2873_v56 = vadd.f32 %v7387_v39, %v2872_v37  ;;  %v5166_v34 = vld [vmem:[%s7848_s0 + $0x4d8] sm:$0xff]  ;;  %v5111_v37 = vld [vmem:[%s7848_s0 + $0x320] sm:$0xff] }
 0x2d7   :  { %v2319_v45 = vpop.f32.mrf.mxu1  ;;  %6149 = vtanh.f32 %v2593_v36  ;;  %v6146_v48 = vpop.eup %6145  ;;  %v2045_v16 = vadd.f32 %v7387_v39, %v2044_v42  ;;  %v5222_v36 = vld [vmem:[%s7848_s0 + $0x698] sm:$0xff] }
 0x2d8   :  { %v3710_v47 = vadd.f32 %v6144_v43, %v3599_v41  ;;  %6151 = vtanh.f32 %v2040_v40  ;;  %v6148_v53 = vpop.eup %6147  ;;  %v2320_v6 = vadd.f32 %v7387_v39, %v2319_v45 }
 0x2d9   :  { %6153 = vtanh.f32 %v2318_v44  ;;  %v3489_v61 = vadd.f32 %v6148_v53, %v6146_v48 }
 0x2da   :  { %v3821_v51 = vmul.f32 0.25, %v3710_v47  ;;  %6155 = vtanh.f32 %v2870_v52 }
 0x2dc   :  { %v5409_v54 = vpack.c.bf16 %v3821_v51, %v3820_v50  ;;  %v2594_v55 = vpop.f32.mrf.mxu2 }
 0x2dd   :  { %v2595_v57 = vadd.f32 %v7387_v39, %v2594_v55  ;;  %v2874_v58 = vpop.f32.mrf.mxu3  ;;  %v6150_v1 = vpop.eup %6149 }
 0x2de   :  { %5548 = vst [vmem:[%s7849_s3 + $0x108] sm:$0xff] %v5409_v54   ;;  %v2047_v62 = vpop.f32.mrf.mxu0  ;;  %v6152_v4 = vpop.eup %6151  ;;  %v3600_v7 = vadd.f32 %v6150_v1, %v3489_v61  ;;  %v2875_v26 = vadd.f32 %v7387_v39, %v2874_v58 }
 0x2df   :  { %6157 = vtanh.f32 %v2595_v57  ;;  %v2322_v3 = vpop.f32.mrf.mxu1  ;;  %v6154_v5 = vpop.eup %6153  ;;  %v2048_v42 = vadd.f32 %v7387_v39, %v2047_v62 }
 0x2e0   :  { %6159 = vtanh.f32 %v2873_v56  ;;  %v6156_v8 = vpop.eup %6155  ;;  %v3490_v9 = vadd.f32 %v6154_v5, %v6152_v4  ;;  %v2323_v21 = vadd.f32 %v7387_v39, %v2322_v3 }
 0x2e1   :  { %2086 = vmatmul.bf16.gmra.mxu0 %v5055_v59  ;;  %2636 = vmatmul.bf16.gmra.mxu2 %v5165_v60  ;;  %6161 = vtanh.f32 %v2043_v49  ;;  %v3711_v15 = vadd.f32 %v6156_v8, %v3600_v7  ;;  %v5057_v8 = vld [vmem:[%s7848_s0 + $0x170] sm:$0xff] }
 0x2e2   :  { %2916 = vmatmul.bf16.gmra.mxu3 %v5221_v63  ;;  %2361 = vmatmul.bf16.gmra.mxu1 %v5110_v0  ;;  %6163 = vtanh.f32 %v2320_v6 }
 0x2e3   :  { %v3822_v2 = vmul.f32 0.25, %v3711_v15 }
 0x2e4   :  { %v2597_v10 = vpop.f32.mrf.mxu2 }
 0x2e5   :  { %v6158_v12 = vpop.eup %6157  ;;  %v2598_v13 = vadd.f32 %v7387_v39, %v2597_v10  ;;  %v2877_v14 = vpop.f32.mrf.mxu3 }
 0x2e6   :  { %v3601_v17 = vadd.f32 %v6158_v12, %v3490_v9  ;;  %v2049_v18 = vpop.f32.mrf.mxu0  ;;  %v6160_v19 = vpop.eup %6159  ;;  %v2878_v30 = vadd.f32 %v7387_v39, %v2877_v14  ;;  %v5167_v9 = vld [vmem:[%s7848_s0 + $0x4e0] sm:$0xff]  ;;  %v5112_v14 = vld [vmem:[%s7848_s0 + $0x328] sm:$0xff] }
 0x2e7   :  { %v2324_v22 = vpop.f32.mrf.mxu1  ;;  %6165 = vtanh.f32 %v2598_v13  ;;  %v6162_v24 = vpop.eup %6161  ;;  %v2050_v55 = vadd.f32 %v7387_v39, %v2049_v18  ;;  %v5223_v13 = vld [vmem:[%s7848_s0 + $0x6a0] sm:$0xff] }
 0x2e8   :  { %v3712_v23 = vadd.f32 %v6160_v19, %v3601_v17  ;;  %6167 = vtanh.f32 %v2045_v16  ;;  %v6164_v27 = vpop.eup %6163  ;;  %v2325_v44 = vadd.f32 %v7387_v39, %v2324_v22 }
 0x2e9   :  { %6169 = vtanh.f32 %v2323_v21  ;;  %v3491_v20 = vadd.f32 %v6164_v27, %v6162_v24 }
 0x2ea   :  { %v3823_v25 = vmul.f32 0.25, %v3712_v23  ;;  %6171 = vtanh.f32 %v2875_v26 }
 0x2ec   :  { %v5414_v28 = vpack.c.bf16 %v3823_v25, %v3822_v2  ;;  %v2599_v29 = vpop.f32.mrf.mxu2 }
 0x2ed   :  { %v2600_v31 = vadd.f32 %v7387_v39, %v2599_v29  ;;  %v2879_v32 = vpop.f32.mrf.mxu3  ;;  %v6166_v38 = vpop.eup %6165 }
 0x2ee   :  { %5549 = vst [vmem:[%s7849_s3 + $0x110] sm:$0xff] %v5414_v28   ;;  %v2052_v35 = vpop.f32.mrf.mxu0  ;;  %v6168_v41 = vpop.eup %6167  ;;  %v3602_v45 = vadd.f32 %v6166_v38, %v3491_v20  ;;  %v2880_v1 = vadd.f32 %v7387_v39, %v2879_v32 }
 0x2ef   :  { %6173 = vtanh.f32 %v2600_v31  ;;  %v2327_v40 = vpop.f32.mrf.mxu1  ;;  %v6170_v43 = vpop.eup %6169  ;;  %v2053_v18 = vadd.f32 %v7387_v39, %v2052_v35 }
 0x2f0   :  { %6175 = vtanh.f32 %v2878_v30  ;;  %v6172_v47 = vpop.eup %6171  ;;  %v3492_v48 = vadd.f32 %v6170_v43, %v6168_v41  ;;  %v2328_v59 = vadd.f32 %v7387_v39, %v2327_v40 }
 0x2f1   :  { %2091 = vmatmul.bf16.gmra.mxu0 %v5056_v33  ;;  %2641 = vmatmul.bf16.gmra.mxu2 %v5166_v34  ;;  %6177 = vtanh.f32 %v2048_v42  ;;  %v3713_v54 = vadd.f32 %v6172_v47, %v3602_v45  ;;  %v5058_v47 = vld [vmem:[%s7848_s0 + $0x178] sm:$0xff] }
 0x2f2   :  { %2921 = vmatmul.bf16.gmra.mxu3 %v5222_v36  ;;  %2366 = vmatmul.bf16.gmra.mxu1 %v5111_v37  ;;  %6179 = vtanh.f32 %v2325_v44 }
 0x2f3   :  { %v3824_v63 = vmul.f32 0.25, %v3713_v54 }
 0x2f4   :  { %v2602_v50 = vpop.f32.mrf.mxu2 }
 0x2f5   :  { %v6174_v51 = vpop.eup %6173  ;;  %v2603_v52 = vadd.f32 %v7387_v39, %v2602_v50  ;;  %v2882_v53 = vpop.f32.mrf.mxu3 }
 0x2f6   :  { %v3603_v56 = vadd.f32 %v6174_v51, %v3492_v48  ;;  %v2054_v57 = vpop.f32.mrf.mxu0  ;;  %v6176_v58 = vpop.eup %6175  ;;  %v2883_v5 = vadd.f32 %v7387_v39, %v2882_v53  ;;  %v5168_v48 = vld [vmem:[%s7848_s0 + $0x4e8] sm:$0xff]  ;;  %v5113_v53 = vld [vmem:[%s7848_s0 + $0x330] sm:$0xff] }
 0x2f7   :  { %v2329_v60 = vpop.f32.mrf.mxu1  ;;  %6181 = vtanh.f32 %v2603_v52  ;;  %v6178_v62 = vpop.eup %6177  ;;  %v2055_v29 = vadd.f32 %v7387_v39, %v2054_v57  ;;  %v5224_v52 = vld [vmem:[%s7848_s0 + $0x6a8] sm:$0xff] }
 0x2f8   :  { %v3714_v61 = vadd.f32 %v6176_v58, %v3603_v56  ;;  %6183 = vtanh.f32 %v2050_v55  ;;  %v6180_v3 = vpop.eup %6179  ;;  %v2330_v21 = vadd.f32 %v7387_v39, %v2329_v60 }
 0x2f9   :  { %6185 = vtanh.f32 %v2328_v59  ;;  %v3493_v10 = vadd.f32 %v6180_v3, %v6178_v62 }
 0x2fa   :  { %v3825_v0 = vmul.f32 0.25, %v3714_v61  ;;  %6187 = vtanh.f32 %v2880_v1 }
 0x2fc   :  { %v5419_v4 = vpack.c.bf16 %v3825_v0, %v3824_v63  ;;  %v2604_v49 = vpop.f32.mrf.mxu2 }
 0x2fd   :  { %v2605_v6 = vadd.f32 %v7387_v39, %v2604_v49  ;;  %v2884_v7 = vpop.f32.mrf.mxu3  ;;  %v6182_v15 = vpop.eup %6181 }
 0x2fe   :  { %5550 = vst [vmem:[%s7849_s3 + $0x118] sm:$0xff] %v5419_v4   ;;  %v2057_v12 = vpop.f32.mrf.mxu0  ;;  %v6184_v17 = vpop.eup %6183  ;;  %v3604_v22 = vadd.f32 %v6182_v15, %v3493_v10  ;;  %v2885_v38 = vadd.f32 %v7387_v39, %v2884_v7 }
 0x2ff   :  { %6189 = vtanh.f32 %v2605_v6  ;;  %v2332_v16 = vpop.f32.mrf.mxu1  ;;  %v6186_v19 = vpop.eup %6185  ;;  %v2058_v57 = vadd.f32 %v7387_v39, %v2057_v12 }
 0x300   :  { %6191 = vtanh.f32 %v2883_v5  ;;  %v6188_v23 = vpop.eup %6187  ;;  %v3494_v24 = vadd.f32 %v6186_v19, %v6184_v17  ;;  %v2333_v33 = vadd.f32 %v7387_v39, %v2332_v16 }
 0x301   :  { %2096 = vmatmul.bf16.gmra.mxu0 %v5057_v8  ;;  %2646 = vmatmul.bf16.gmra.mxu2 %v5167_v9  ;;  %6193 = vtanh.f32 %v2053_v18  ;;  %v3715_v28 = vadd.f32 %v6188_v23, %v3604_v22  ;;  %v5059_v23 = vld [vmem:[%s7848_s0 + $0x180] sm:$0xff] }
 0x302   :  { %2926 = vmatmul.bf16.gmra.mxu3 %v5223_v13  ;;  %2371 = vmatmul.bf16.gmra.mxu1 %v5112_v14  ;;  %6195 = vtanh.f32 %v2330_v21 }
 0x303   :  { %v3826_v36 = vmul.f32 0.25, %v3715_v28 }
 0x304   :  { %v2607_v2 = vpop.f32.mrf.mxu2 }
 0x305   :  { %v6190_v25 = vpop.eup %6189  ;;  %v2608_v26 = vadd.f32 %v7387_v39, %v2607_v2  ;;  %v2887_v27 = vpop.f32.mrf.mxu3 }
 0x306   :  { %v3605_v30 = vadd.f32 %v6190_v25, %v3494_v24  ;;  %v2059_v31 = vpop.f32.mrf.mxu0  ;;  %v6192_v32 = vpop.eup %6191  ;;  %v2888_v43 = vadd.f32 %v7387_v39, %v2887_v27  ;;  %v5169_v24 = vld [vmem:[%s7848_s0 + $0x4f0] sm:$0xff]  ;;  %v5114_v27 = vld [vmem:[%s7848_s0 + $0x338] sm:$0xff] }
 0x307   :  { %v2334_v34 = vpop.f32.mrf.mxu1  ;;  %6197 = vtanh.f32 %v2608_v26  ;;  %v6194_v35 = vpop.eup %6193  ;;  %v2060_v49 = vadd.f32 %v7387_v39, %v2059_v31  ;;  %v5225_v26 = vld [vmem:[%s7848_s0 + $0x6b0] sm:$0xff] }
 0x308   :  { %v3716_v20 = vadd.f32 %v6192_v32, %v3605_v30  ;;  %6199 = vtanh.f32 %v2055_v29  ;;  %v6196_v40 = vpop.eup %6195  ;;  %v2335_v59 = vadd.f32 %v7387_v39, %v2334_v34 }
 0x309   :  { %6201 = vtanh.f32 %v2333_v33  ;;  %v3495_v50 = vadd.f32 %v6196_v40, %v6194_v35 }
 0x30a   :  { %v3827_v37 = vmul.f32 0.25, %v3716_v20  ;;  %6203 = vtanh.f32 %v2885_v38 }
 0x30c   :  { %v5424_v41 = vpack.c.bf16 %v3827_v37, %v3826_v36  ;;  %v2609_v42 = vpop.f32.mrf.mxu2 }
 0x30d   :  { %v2610_v44 = vadd.f32 %v7387_v39, %v2609_v42  ;;  %v2889_v45 = vpop.f32.mrf.mxu3  ;;  %v6198_v54 = vpop.eup %6197 }
 0x30e   :  { %5551 = vst [vmem:[%s7849_s3 + $0x120] sm:$0xff] %v5424_v41   ;;  %v2062_v51 = vpop.f32.mrf.mxu0  ;;  %v6200_v56 = vpop.eup %6199  ;;  %v3606_v60 = vadd.f32 %v6198_v54, %v3495_v50  ;;  %v2890_v15 = vadd.f32 %v7387_v39, %v2889_v45 }
 0x30f   :  { %6205 = vtanh.f32 %v2610_v44  ;;  %v2337_v55 = vpop.f32.mrf.mxu1  ;;  %v6202_v58 = vpop.eup %6201  ;;  %v2063_v31 = vadd.f32 %v7387_v39, %v2062_v51 }
 0x310   :  { %6207 = vtanh.f32 %v2888_v43  ;;  %v6204_v61 = vpop.eup %6203  ;;  %v3496_v62 = vadd.f32 %v6202_v58, %v6200_v56  ;;  %v2338_v8 = vadd.f32 %v7387_v39, %v2337_v55 }
 0x311   :  { %2101 = vmatmul.bf16.gmra.mxu0 %v5058_v47  ;;  %2651 = vmatmul.bf16.gmra.mxu2 %v5168_v48  ;;  %6209 = vtanh.f32 %v2058_v57  ;;  %v3717_v4 = vadd.f32 %v6204_v61, %v3606_v60  ;;  %v5060_v61 = vld [vmem:[%s7848_s0 + $0x188] sm:$0xff] }
 0x312   :  { %2931 = vmatmul.bf16.gmra.mxu3 %v5224_v52  ;;  %2376 = vmatmul.bf16.gmra.mxu1 %v5113_v53  ;;  %6211 = vtanh.f32 %v2335_v59 }
 0x313   :  { %v3828_v13 = vmul.f32 0.25, %v3717_v4 }
 0x314   :  { %v2612_v63 = vpop.f32.mrf.mxu2 }
 0x315   :  { %v6206_v0 = vpop.eup %6205  ;;  %v2613_v1 = vadd.f32 %v7387_v39, %v2612_v63  ;;  %v2892_v3 = vpop.f32.mrf.mxu3 }
 0x316   :  { %v3607_v5 = vadd.f32 %v6206_v0, %v3496_v62  ;;  %v2064_v6 = vpop.f32.mrf.mxu0  ;;  %v6208_v7 = vpop.eup %6207  ;;  %v2893_v19 = vadd.f32 %v7387_v39, %v2892_v3  ;;  %v5170_v62 = vld [vmem:[%s7848_s0 + $0x4f8] sm:$0xff]  ;;  %v5115_v3 = vld [vmem:[%s7848_s0 + $0x340] sm:$0xff] }
 0x317   :  { %v2339_v9 = vpop.f32.mrf.mxu1  ;;  %6213 = vtanh.f32 %v2613_v1  ;;  %v6210_v12 = vpop.eup %6209  ;;  %v2065_v42 = vadd.f32 %v7387_v39, %v2064_v6  ;;  %v5226_v1 = vld [vmem:[%s7848_s0 + $0x6b8] sm:$0xff] }
 0x318   :  { %v3718_v10 = vadd.f32 %v6208_v7, %v3607_v5  ;;  %6215 = vtanh.f32 %v2060_v49  ;;  %v6212_v16 = vpop.eup %6211  ;;  %v2340_v33 = vadd.f32 %v7387_v39, %v2339_v9 }
 0x319   :  { %6217 = vtanh.f32 %v2338_v8  ;;  %v3497_v2 = vadd.f32 %v6212_v16, %v6210_v12 }
 0x31a   :  { %v3829_v14 = vmul.f32 0.25, %v3718_v10  ;;  %6219 = vtanh.f32 %v2890_v15 }
 0x31c   :  { %v5429_v17 = vpack.c.bf16 %v3829_v14, %v3828_v13  ;;  %v2614_v18 = vpop.f32.mrf.mxu2 }
 0x31d   :  { %v2615_v21 = vadd.f32 %v7387_v39, %v2614_v18  ;;  %v2894_v22 = vpop.f32.mrf.mxu3  ;;  %v6214_v28 = vpop.eup %6213 }
 0x31e   :  { %5552 = vst [vmem:[%s7849_s3 + $0x128] sm:$0xff] %v5429_v17   ;;  %v2067_v25 = vpop.f32.mrf.mxu0  ;;  %v6216_v30 = vpop.eup %6215  ;;  %v3608_v34 = vadd.f32 %v6214_v28, %v3497_v2  ;;  %v2895_v54 = vadd.f32 %v7387_v39, %v2894_v22 }
 0x31f   :  { %6221 = vtanh.f32 %v2615_v21  ;;  %v2342_v29 = vpop.f32.mrf.mxu1  ;;  %v6218_v32 = vpop.eup %6217  ;;  %v2068_v6 = vadd.f32 %v7387_v39, %v2067_v25 }
 0x320   :  { %6223 = vtanh.f32 %v2893_v19  ;;  %v6220_v20 = vpop.eup %6219  ;;  %v3498_v35 = vadd.f32 %v6218_v32, %v6216_v30  ;;  %v2343_v47 = vadd.f32 %v7387_v39, %v2342_v29 }
 0x321   :  { %2106 = vmatmul.bf16.gmra.mxu0 %v5059_v23  ;;  %2656 = vmatmul.bf16.gmra.mxu2 %v5169_v24  ;;  %6225 = vtanh.f32 %v2063_v31  ;;  %v3719_v41 = vadd.f32 %v6220_v20, %v3608_v34  ;;  %v5061_v20 = vld [vmem:[%s7848_s0 + $0x190] sm:$0xff] }
 0x322   :  { %2936 = vmatmul.bf16.gmra.mxu3 %v5225_v26  ;;  %2381 = vmatmul.bf16.gmra.mxu1 %v5114_v27  ;;  %6227 = vtanh.f32 %v2340_v33 }
 0x323   :  { %v3830_v52 = vmul.f32 0.25, %v3719_v41 }
 0x324   :  { %v2617_v36 = vpop.f32.mrf.mxu2 }
 0x325   :  { %v6222_v37 = vpop.eup %6221  ;;  %v2618_v38 = vadd.f32 %v7387_v39, %v2617_v36  ;;  %v2897_v40 = vpop.f32.mrf.mxu3 }
 0x326   :  { %v3609_v43 = vadd.f32 %v6222_v37, %v3498_v35  ;;  %v2069_v44 = vpop.f32.mrf.mxu0  ;;  %v6224_v45 = vpop.eup %6223  ;;  %v2898_v58 = vadd.f32 %v7387_v39, %v2897_v40  ;;  %v5171_v35 = vld [vmem:[%s7848_s0 + $0x500] sm:$0xff]  ;;  %v5116_v40 = vld [vmem:[%s7848_s0 + $0x348] sm:$0xff] }
 0x327   :  { %v2344_v48 = vpop.f32.mrf.mxu1  ;;  %6229 = vtanh.f32 %v2618_v38  ;;  %v6226_v51 = vpop.eup %6225  ;;  %v2070_v18 = vadd.f32 %v7387_v39, %v2069_v44  ;;  %v5227_v38 = vld [vmem:[%s7848_s0 + $0x6c0] sm:$0xff] }
 0x328   :  { %v3720_v50 = vadd.f32 %v6224_v45, %v3609_v43  ;;  %6231 = vtanh.f32 %v2065_v42  ;;  %v6228_v55 = vpop.eup %6227  ;;  %v2345_v8 = vadd.f32 %v7387_v39, %v2344_v48 }
 0x329   :  { %6233 = vtanh.f32 %v2343_v47  ;;  %v3499_v63 = vadd.f32 %v6228_v55, %v6226_v51 }
 0x32a   :  { %v3831_v53 = vmul.f32 0.25, %v3720_v50  ;;  %6235 = vtanh.f32 %v2895_v54  ;;  %v7624_v54 = vld [vmem:[%s7847_s2] ss:$0 sm:$0xff] }
 0x32c   :  { %v5434_v56 = vpack.c.bf16 %v3831_v53, %v3830_v52  ;;  %v2619_v57 = vpop.f32.mrf.mxu2 }
 0x32d   :  { %v2620_v59 = vadd.f32 %v7387_v39, %v2619_v57  ;;  %v2899_v60 = vpop.f32.mrf.mxu3  ;;  %v6230_v4 = vpop.eup %6229 }
 0x32e   :  { %5553 = vst [vmem:[%s7849_s3 + $0x130] sm:$0xff] %v5434_v56   ;;  %v2072_v0 = vpop.f32.mrf.mxu0  ;;  %v6232_v5 = vpop.eup %6231  ;;  %v3610_v9 = vadd.f32 %v6230_v4, %v3499_v63  ;;  %v2900_v28 = vadd.f32 %v7387_v39, %v2899_v60 }
 0x32f   :  { %6237 = vtanh.f32 %v2620_v59  ;;  %v2347_v49 = vpop.f32.mrf.mxu1  ;;  %v6234_v7 = vpop.eup %6233  ;;  %v2073_v44 = vadd.f32 %v7387_v39, %v2072_v0 }
 0x330   :  { %6239 = vtanh.f32 %v2898_v58  ;;  %v6236_v10 = vpop.eup %6235  ;;  %v3500_v12 = vadd.f32 %v6234_v7, %v6232_v5  ;;  %v2348_v23 = vadd.f32 %v7387_v39, %v2347_v49 }
 0x331   :  { %2111 = vmatmul.bf16.gmra.mxu0 %v5060_v61  ;;  %2661 = vmatmul.bf16.gmra.mxu2 %v5170_v62  ;;  %6241 = vtanh.f32 %v2068_v6  ;;  %v3721_v17 = vadd.f32 %v6236_v10, %v3610_v9  ;;  %v5062_v10 = vld [vmem:[%s7848_s0 + $0x198] sm:$0xff] }
 0x332   :  { %2941 = vmatmul.bf16.gmra.mxu3 %v5226_v1  ;;  %2386 = vmatmul.bf16.gmra.mxu1 %v5115_v3  ;;  %6243 = vtanh.f32 %v2345_v8 }
 0x333   :  { %v3832_v26 = vmul.f32 0.25, %v3721_v17 }
 0x334   :  { %v2622_v13 = vpop.f32.mrf.mxu2 }
 0x335   :  { %v6238_v14 = vpop.eup %6237  ;;  %v2623_v15 = vadd.f32 %v7387_v39, %v2622_v13  ;;  %v2902_v16 = vpop.f32.mrf.mxu3 }
 0x336   :  { %v3611_v19 = vadd.f32 %v6238_v14, %v3500_v12  ;;  %v2074_v21 = vpop.f32.mrf.mxu0  ;;  %v6240_v22 = vpop.eup %6239  ;;  %v2903_v32 = vadd.f32 %v7387_v39, %v2902_v16  ;;  %v5172_v12 = vld [vmem:[%s7848_s0 + $0x508] sm:$0xff]  ;;  %v5117_v16 = vld [vmem:[%s7848_s0 + $0x350] sm:$0xff] }
 0x337   :  { %v2349_v24 = vpop.f32.mrf.mxu1  ;;  %6245 = vtanh.f32 %v2623_v15  ;;  %v6242_v25 = vpop.eup %6241  ;;  %v2075_v57 = vadd.f32 %v7624_v54, %v2074_v21  ;;  %v5228_v15 = vld [vmem:[%s7848_s0 + $0x6c8] sm:$0xff] }
 0x338   :  { %v3722_v2 = vadd.f32 %v6240_v22, %v3611_v19  ;;  %6247 = vtanh.f32 %v2070_v18  ;;  %v6244_v29 = vpop.eup %6243  ;;  %v2350_v47 = vadd.f32 %v7387_v39, %v2349_v24 }
 0x339   :  { %6249 = vtanh.f32 %v2348_v23  ;;  %v3501_v36 = vadd.f32 %v6244_v29, %v6242_v25 }
 0x33a   :  { %v3833_v27 = vmul.f32 0.25, %v3722_v2  ;;  %6251 = vtanh.f32 %v2900_v28 }
 0x33c   :  { %v5439_v30 = vpack.c.bf16 %v3833_v27, %v3832_v26  ;;  %v2624_v31 = vpop.f32.mrf.mxu2 }
 0x33d   :  { %v2625_v33 = vadd.f32 %v7387_v39, %v2624_v31  ;;  %v2904_v34 = vpop.f32.mrf.mxu3  ;;  %v6246_v41 = vpop.eup %6245 }
 0x33e   :  { %5554 = vst [vmem:[%s7849_s3 + $0x138] sm:$0xff] %v5439_v30   ;;  %v2077_v37 = vpop.f32.mrf.mxu0  ;;  %v6248_v43 = vpop.eup %6247  ;;  %v3612_v48 = vadd.f32 %v6246_v41, %v3501_v36  ;;  %v2905_v4 = vadd.f32 %v7624_v54, %v2904_v34 }
 0x33f   :  { %6253 = vtanh.f32 %v2625_v33  ;;  %v2352_v42 = vpop.f32.mrf.mxu1  ;;  %v6250_v45 = vpop.eup %6249  ;;  %v2078_v21 = vadd.f32 %v7624_v54, %v2077_v37 }
 0x340   :  { %6255 = vtanh.f32 %v2903_v32  ;;  %v6252_v50 = vpop.eup %6251  ;;  %v3502_v51 = vadd.f32 %v6250_v45, %v6248_v43  ;;  %v2353_v61 = vadd.f32 %v7624_v54, %v2352_v42 }
 0x341   :  { %2116 = vmatmul.bf16.gmra.mxu0 %v5061_v20  ;;  %2666 = vmatmul.bf16.gmra.mxu2 %v5171_v35  ;;  %6257 = vtanh.f32 %v2073_v44  ;;  %v3723_v39 = vadd.f32 %v6252_v50, %v3612_v48  ;;  %v5063_v50 = vld [vmem:[%s7848_s0 + $0x1a0] sm:$0xff] }
 0x342   :  { %2946 = vmatmul.bf16.gmra.mxu3 %v5227_v38  ;;  %2391 = vmatmul.bf16.gmra.mxu1 %v5116_v40  ;;  %6259 = vtanh.f32 %v2350_v47 }
 0x343   :  { %v3834_v1 = vmul.f32 0.25, %v3723_v39 }
 0x344   :  { %v2627_v52 = vpop.f32.mrf.mxu2 }
 0x345   :  { %v6254_v53 = vpop.eup %6253  ;;  %v2628_v55 = vadd.f32 %v7624_v54, %v2627_v52  ;;  %v2907_v56 = vpop.f32.mrf.mxu3 }
 0x346   :  { %v3613_v58 = vadd.f32 %v6254_v53, %v3502_v51  ;;  %v2079_v59 = vpop.f32.mrf.mxu0  ;;  %v6256_v60 = vpop.eup %6255  ;;  %v2908_v7 = vadd.f32 %v7624_v54, %v2907_v56  ;;  %v5173_v51 = vld [vmem:[%s7848_s0 + $0x510] sm:$0xff]  ;;  %v5118_v56 = vld [vmem:[%s7848_s0 + $0x358] sm:$0xff] }
 0x347   :  { %v2354_v62 = vpop.f32.mrf.mxu1  ;;  %6261 = vtanh.f32 %v2628_v55  ;;  %v6258_v0 = vpop.eup %6257  ;;  %v2080_v31 = vadd.f32 %v7624_v54, %v2079_v59  ;;  %v5229_v55 = vld [vmem:[%s7848_s0 + $0x6d0] sm:$0xff] }
 0x348   :  { %v3724_v63 = vadd.f32 %v6256_v60, %v3613_v58  ;;  %6263 = vtanh.f32 %v2075_v57  ;;  %v6260_v49 = vpop.eup %6259  ;;  %v2355_v23 = vadd.f32 %v7624_v54, %v2354_v62 }
 0x349   :  { %6265 = vtanh.f32 %v2353_v61  ;;  %v3503_v13 = vadd.f32 %v6260_v49, %v6258_v0 }
 0x34a   :  { %v3835_v3 = vmul.f32 0.25, %v3724_v63  ;;  %6267 = vtanh.f32 %v2905_v4 }
 0x34c   :  { %v5444_v5 = vpack.c.bf16 %v3835_v3, %v3834_v1  ;;  %v2629_v6 = vpop.f32.mrf.mxu2 }
 0x34d   :  { %v2630_v8 = vadd.f32 %v7624_v54, %v2629_v6  ;;  %v2909_v9 = vpop.f32.mrf.mxu3  ;;  %v6262_v17 = vpop.eup %6261 }
 0x34e   :  { %5555 = vst [vmem:[%s7849_s3 + $0x140] sm:$0xff] %v5444_v5   ;;  %v2082_v14 = vpop.f32.mrf.mxu0  ;;  %v6264_v19 = vpop.eup %6263  ;;  %v3614_v24 = vadd.f32 %v6262_v17, %v3503_v13  ;;  %v2910_v41 = vadd.f32 %v7624_v54, %v2909_v9 }
 0x34f   :  { %6269 = vtanh.f32 %v2630_v8  ;;  %v2357_v18 = vpop.f32.mrf.mxu1  ;;  %v6266_v22 = vpop.eup %6265  ;;  %v2083_v59 = vadd.f32 %v7624_v54, %v2082_v14 }
 0x350   :  { %6271 = vtanh.f32 %v2908_v7  ;;  %v6268_v2 = vpop.eup %6267  ;;  %v3504_v25 = vadd.f32 %v6266_v22, %v6264_v19  ;;  %v2358_v20 = vadd.f32 %v7624_v54, %v2357_v18 }
 0x351   :  { %2121 = vmatmul.bf16.gmra.mxu0 %v5062_v10  ;;  %2671 = vmatmul.bf16.gmra.mxu2 %v5172_v12  ;;  %6273 = vtanh.f32 %v2078_v21  ;;  %v3725_v30 = vadd.f32 %v6268_v2, %v3614_v24  ;;  %v5064_v2 = vld [vmem:[%s7848_s0 + $0x1a8] sm:$0xff] }
 0x352   :  { %2951 = vmatmul.bf16.gmra.mxu3 %v5228_v15  ;;  %2396 = vmatmul.bf16.gmra.mxu1 %v5117_v16  ;;  %6275 = vtanh.f32 %v2355_v23 }
 0x353   :  { %v3836_v38 = vmul.f32 0.25, %v3725_v30 }
 0x354   :  { %v2632_v26 = vpop.f32.mrf.mxu2 }
 0x355   :  { %v6270_v27 = vpop.eup %6269  ;;  %v2633_v28 = vadd.f32 %v7624_v54, %v2632_v26  ;;  %v2912_v29 = vpop.f32.mrf.mxu3 }
 0x356   :  { %v3615_v32 = vadd.f32 %v6270_v27, %v3504_v25  ;;  %v2084_v33 = vpop.f32.mrf.mxu0  ;;  %v6272_v34 = vpop.eup %6271  ;;  %v2913_v45 = vadd.f32 %v7624_v54, %v2912_v29  ;;  %v5174_v25 = vld [vmem:[%s7848_s0 + $0x518] sm:$0xff]  ;;  %v5119_v29 = vld [vmem:[%s7848_s0 + $0x360] sm:$0xff] }
 0x357   :  { %v2359_v35 = vpop.f32.mrf.mxu1  ;;  %6277 = vtanh.f32 %v2633_v28  ;;  %v6274_v37 = vpop.eup %6273  ;;  %v2085_v6 = vadd.f32 %v7624_v54, %v2084_v33  ;;  %v5230_v28 = vld [vmem:[%s7848_s0 + $0x6d8] sm:$0xff] }
 0x358   :  { %v3726_v36 = vadd.f32 %v6272_v34, %v3615_v32  ;;  %6279 = vtanh.f32 %v2080_v31  ;;  %v6276_v42 = vpop.eup %6275  ;;  %v2360_v61 = vadd.f32 %v7624_v54, %v2359_v35 }
 0x359   :  { %6281 = vtanh.f32 %v2358_v20  ;;  %v3505_v52 = vadd.f32 %v6276_v42, %v6274_v37 }
 0x35a   :  { %v3837_v40 = vmul.f32 0.25, %v3726_v36  ;;  %6283 = vtanh.f32 %v2910_v41 }
 0x35c   :  { %v5449_v43 = vpack.c.bf16 %v3837_v40, %v3836_v38  ;;  %v2634_v44 = vpop.f32.mrf.mxu2 }
 0x35d   :  { %v2635_v47 = vadd.f32 %v7624_v54, %v2634_v44  ;;  %v2914_v48 = vpop.f32.mrf.mxu3  ;;  %v6278_v39 = vpop.eup %6277 }
 0x35e   :  { %5556 = vst [vmem:[%s7849_s3 + $0x148] sm:$0xff] %v5449_v43   ;;  %v2087_v53 = vpop.f32.mrf.mxu0  ;;  %v6280_v58 = vpop.eup %6279  ;;  %v3616_v62 = vadd.f32 %v6278_v39, %v3505_v52  ;;  %v2915_v17 = vadd.f32 %v7624_v54, %v2914_v48 }
 0x35f   :  { %6285 = vtanh.f32 %v2635_v47  ;;  %v2362_v57 = vpop.f32.mrf.mxu1  ;;  %v6282_v60 = vpop.eup %6281  ;;  %v2088_v33 = vadd.f32 %v7624_v54, %v2087_v53 }
 0x360   :  { %6287 = vtanh.f32 %v2913_v45  ;;  %v6284_v63 = vpop.eup %6283  ;;  %v3506_v0 = vadd.f32 %v6282_v60, %v6280_v58  ;;  %v2363_v10 = vadd.f32 %v7624_v54, %v2362_v57 }
 0x361   :  { %2126 = vmatmul.bf16.gmra.mxu0 %v5063_v50  ;;  %2676 = vmatmul.bf16.gmra.mxu2 %v5173_v51  ;;  %6289 = vtanh.f32 %v2083_v59  ;;  %v3727_v5 = vadd.f32 %v6284_v63, %v3616_v62  ;;  %v5065_v63 = vld [vmem:[%s7848_s0 + $0x1b0] sm:$0xff] }
 0x362   :  { %2956 = vmatmul.bf16.gmra.mxu3 %v5229_v55  ;;  %2401 = vmatmul.bf16.gmra.mxu1 %v5118_v56  ;;  %6291 = vtanh.f32 %v2360_v61 }
 0x363   :  { %v3838_v15 = vmul.f32 0.25, %v3727_v5 }
 0x364   :  { %v2637_v1 = vpop.f32.mrf.mxu2 }
 0x365   :  { %v6286_v3 = vpop.eup %6285  ;;  %v2638_v4 = vadd.f32 %v7624_v54, %v2637_v1  ;;  %v2917_v49 = vpop.f32.mrf.mxu3 }
 0x366   :  { %v3617_v7 = vadd.f32 %v6286_v3, %v3506_v0  ;;  %v2089_v8 = vpop.f32.mrf.mxu0  ;;  %v6288_v9 = vpop.eup %6287  ;;  %v2918_v22 = vadd.f32 %v7624_v54, %v2917_v49  ;;  %v5175_v0 = vld [vmem:[%s7848_s0 + $0x520] sm:$0xff]  ;;  %v5120_v49 = vld [vmem:[%s7848_s0 + $0x368] sm:$0xff] }
 0x367   :  { %v2364_v12 = vpop.f32.mrf.mxu1  ;;  %6293 = vtanh.f32 %v2638_v4  ;;  %v6290_v14 = vpop.eup %6289  ;;  %v2090_v44 = vadd.f32 %v7624_v54, %v2089_v8  ;;  %v5231_v4 = vld [vmem:[%s7848_s0 + $0x6e0] sm:$0xff] }
 0x368   :  { %v3728_v13 = vadd.f32 %v6288_v9, %v3617_v7  ;;  %6295 = vtanh.f32 %v2085_v6  ;;  %v6292_v18 = vpop.eup %6291  ;;  %v2365_v20 = vadd.f32 %v7624_v54, %v2364_v12 }
 0x369   :  { %6297 = vtanh.f32 %v2363_v10  ;;  %v3507_v26 = vadd.f32 %v6292_v18, %v6290_v14 }
 0x36a   :  { %v3839_v16 = vmul.f32 0.25, %v3728_v13  ;;  %6299 = vtanh.f32 %v2915_v17 }
 0x36c   :  { %v5454_v19 = vpack.c.bf16 %v3839_v16, %v3838_v15  ;;  %v2639_v21 = vpop.f32.mrf.mxu2 }
 0x36d   :  { %v2640_v23 = vadd.f32 %v7624_v54, %v2639_v21  ;;  %v2919_v24 = vpop.f32.mrf.mxu3  ;;  %v6294_v30 = vpop.eup %6293 }
 0x36e   :  { %5557 = vst [vmem:[%s7849_s3 + $0x150] sm:$0xff] %v5454_v19   ;;  %v2092_v27 = vpop.f32.mrf.mxu0  ;;  %v6296_v32 = vpop.eup %6295  ;;  %v3618_v35 = vadd.f32 %v6294_v30, %v3507_v26  ;;  %v2920_v39 = vadd.f32 %v7624_v54, %v2919_v24 }
 0x36f   :  { %6301 = vtanh.f32 %v2640_v23  ;;  %v2367_v31 = vpop.f32.mrf.mxu1  ;;  %v6298_v34 = vpop.eup %6297  ;;  %v2093_v8 = vadd.f32 %v7624_v54, %v2092_v27 }
 0x370   :  { %6303 = vtanh.f32 %v2918_v22  ;;  %v6300_v36 = vpop.eup %6299  ;;  %v3508_v37 = vadd.f32 %v6298_v34, %v6296_v32  ;;  %v2368_v50 = vadd.f32 %v7624_v54, %v2367_v31 }
 0x371   :  { %2131 = vmatmul.bf16.gmra.mxu0 %v5064_v2  ;;  %2681 = vmatmul.bf16.gmra.mxu2 %v5174_v25  ;;  %6305 = vtanh.f32 %v2088_v33  ;;  %v3729_v43 = vadd.f32 %v6300_v36, %v3618_v35  ;;  %v5176_v36 = vld [vmem:[%s7848_s0 + $0x528] sm:$0xff] }
 0x372   :  { %2961 = vmatmul.bf16.gmra.mxu3 %v5230_v28  ;;  %2406 = vmatmul.bf16.gmra.mxu1 %v5119_v29  ;;  %6307 = vtanh.f32 %v2365_v20 }
 0x373   :  { %v3840_v55 = vmul.f32 0.25, %v3729_v43 }
 0x374   :  { %v2642_v38 = vpop.f32.mrf.mxu2 }
 0x375   :  { %v6302_v40 = vpop.eup %6301  ;;  %v2643_v41 = vadd.f32 %v7624_v54, %v2642_v38  ;;  %v2922_v42 = vpop.f32.mrf.mxu3 }
 0x376   :  { %v3619_v45 = vadd.f32 %v6302_v40, %v3508_v37  ;;  %v2094_v47 = vpop.f32.mrf.mxu0  ;;  %v6304_v48 = vpop.eup %6303  ;;  %v2923_v60 = vadd.f32 %v7624_v54, %v2922_v42  ;;  %v5232_v40 = vld [vmem:[%s7848_s0 + $0x6e8] sm:$0xff] }
 0x377   :  { %v2369_v51 = vpop.f32.mrf.mxu1  ;;  %6309 = vtanh.f32 %v2643_v41  ;;  %v6306_v53 = vpop.eup %6305  ;;  %v2095_v21 = vadd.f32 %v7624_v54, %v2094_v47 }
 0x378   :  { %v3730_v52 = vadd.f32 %v6304_v48, %v3619_v45  ;;  %6311 = vtanh.f32 %v2090_v44  ;;  %v6308_v57 = vpop.eup %6307  ;;  %v2370_v10 = vadd.f32 %v7624_v54, %v2369_v51 }
 0x379   :  { %6313 = vtanh.f32 %v2368_v50  ;;  %v3509_v1 = vadd.f32 %v6308_v57, %v6306_v53 }
 0x37a   :  { %v3841_v56 = vmul.f32 0.25, %v3730_v52  ;;  %6315 = vtanh.f32 %v2920_v39 }
 0x37c   :  { %v5459_v58 = vpack.c.bf16 %v3841_v56, %v3840_v55  ;;  %v2644_v59 = vpop.f32.mrf.mxu2 }
 0x37d   :  { %v2645_v61 = vadd.f32 %v7624_v54, %v2644_v59  ;;  %v2924_v62 = vpop.f32.mrf.mxu3  ;;  %v6310_v5 = vpop.eup %6309 }
 0x37e   :  { %5558 = vst [vmem:[%s7849_s3 + $0x158] sm:$0xff] %v5459_v58   ;;  %v2097_v3 = vpop.f32.mrf.mxu0  ;;  %v6312_v7 = vpop.eup %6311  ;;  %v3620_v12 = vadd.f32 %v6310_v5, %v3509_v1  ;;  %v2925_v30 = vadd.f32 %v7624_v54, %v2924_v62 }
 0x37f   :  { %6317 = vtanh.f32 %v2645_v61  ;;  %v2372_v6 = vpop.f32.mrf.mxu1  ;;  %v6314_v9 = vpop.eup %6313  ;;  %v2098_v44 = vadd.f32 %v7624_v54, %v2097_v3 }
 0x380   :  { %6319 = vtanh.f32 %v2923_v60  ;;  %v6316_v13 = vpop.eup %6315  ;;  %v3510_v14 = vadd.f32 %v6314_v9, %v6312_v7  ;;  %v2373_v2 = vadd.f32 %v7624_v54, %v2372_v6 }
 0x381   :  { %2136 = vmatmul.bf16.gmra.mxu0 %v5065_v63  ;;  %2686 = vmatmul.bf16.gmra.mxu2 %v5175_v0  ;;  %6321 = vtanh.f32 %v2093_v8  ;;  %v3731_v19 = vadd.f32 %v6316_v13, %v3620_v12 }
 0x382   :  { %2966 = vmatmul.bf16.gmra.mxu3 %v5231_v4  ;;  %2411 = vmatmul.bf16.gmra.mxu1 %v5120_v49  ;;  %6323 = vtanh.f32 %v2370_v10 }
 0x383   :  { %v3842_v28 = vmul.f32 0.25, %v3731_v19 }
 0x384   :  { %v2647_v15 = vpop.f32.mrf.mxu2 }
 0x385   :  { %v6318_v16 = vpop.eup %6317  ;;  %v2648_v17 = vadd.f32 %v7624_v54, %v2647_v15  ;;  %v2927_v18 = vpop.f32.mrf.mxu3 }
 0x386   :  { %v3621_v22 = vadd.f32 %v6318_v16, %v3510_v14  ;;  %v2099_v23 = vpop.f32.mrf.mxu0  ;;  %v6320_v24 = vpop.eup %6319  ;;  %v2928_v34 = vadd.f32 %v7624_v54, %v2927_v18 }
 0x387   :  { %v2374_v25 = vpop.f32.mrf.mxu1  ;;  %6325 = vtanh.f32 %v2648_v17  ;;  %v6322_v27 = vpop.eup %6321  ;;  %v2100_v57 = vadd.f32 %v7624_v54, %v2099_v23 }
 0x388   :  { %v3732_v26 = vadd.f32 %v6320_v24, %v3621_v22  ;;  %6327 = vtanh.f32 %v2095_v21  ;;  %v6324_v31 = vpop.eup %6323  ;;  %v2375_v47 = vadd.f32 %v7624_v54, %v2374_v25 }
 0x389   :  { %6329 = vtanh.f32 %v2373_v2  ;;  %v3511_v37 = vadd.f32 %v6324_v31, %v6322_v27 }
 0x38a   :  { %v3843_v29 = vmul.f32 0.25, %v3732_v26  ;;  %6331 = vtanh.f32 %v2925_v30 }
 0x38c   :  { %v5464_v32 = vpack.c.bf16 %v3843_v29, %v3842_v28  ;;  %v2649_v33 = vpop.f32.mrf.mxu2 }
 0x38d   :  { %v2650_v20 = vadd.f32 %v7624_v54, %v2649_v33  ;;  %v2929_v35 = vpop.f32.mrf.mxu3  ;;  %v6326_v41 = vpop.eup %6325 }
 0x38e   :  { %5559 = vst [vmem:[%s7849_s3 + $0x160] sm:$0xff] %v5464_v32   ;;  %v2102_v38 = vpop.f32.mrf.mxu0  ;;  %v6328_v43 = vpop.eup %6327  ;;  %v3622_v48 = vadd.f32 %v6326_v41, %v3511_v37  ;;  %v2930_v4 = vadd.f32 %v7624_v54, %v2929_v35 }
 0x38f   :  { %6333 = vtanh.f32 %v2650_v20  ;;  %v2377_v42 = vpop.f32.mrf.mxu1  ;;  %v6330_v45 = vpop.eup %6329  ;;  %v2103_v16 = vadd.f32 %v7624_v54, %v2102_v38 }
 0x390   :  { %6335 = vtanh.f32 %v2928_v34  ;;  %v6332_v50 = vpop.eup %6331  ;;  %v3512_v51 = vadd.f32 %v6330_v45, %v6328_v43  ;;  %v2378_v61 = vadd.f32 %v7624_v54, %v2377_v42 }
 0x391   :  { %2691 = vmatmul.bf16.gmra.mxu2 %v5176_v36  ;;  %6337 = vtanh.f32 %v2098_v44  ;;  %v3733_v39 = vadd.f32 %v6332_v50, %v3622_v48 }
 0x392   :  { %2971 = vmatmul.bf16.gmra.mxu3 %v5232_v40  ;;  %6339 = vtanh.f32 %v2375_v47 }
 0x393   :  { %v3844_v1 = vmul.f32 0.25, %v3733_v39 }
 0x394   :  { %v2652_v52 = vpop.f32.mrf.mxu2 }
 0x395   :  { %v6334_v53 = vpop.eup %6333  ;;  %v2653_v55 = vadd.f32 %v7624_v54, %v2652_v52  ;;  %v2932_v56 = vpop.f32.mrf.mxu3 }
 0x396   :  { %v3623_v58 = vadd.f32 %v6334_v53, %v3512_v51  ;;  %v2104_v59 = vpop.f32.mrf.mxu0  ;;  %v6336_v60 = vpop.eup %6335  ;;  %v2933_v7 = vadd.f32 %v7624_v54, %v2932_v56 }
 0x397   :  { %v2379_v62 = vpop.f32.mrf.mxu1  ;;  %6341 = vtanh.f32 %v2653_v55  ;;  %v6338_v0 = vpop.eup %6337  ;;  %v2105_v27 = vadd.f32 %v7624_v54, %v2104_v59 }
 0x398   :  { %v3734_v63 = vadd.f32 %v6336_v60, %v3623_v58  ;;  %6343 = vtanh.f32 %v2100_v57  ;;  %v6340_v49 = vpop.eup %6339  ;;  %v2380_v18 = vadd.f32 %v7624_v54, %v2379_v62 }
 0x399   :  { %6345 = vtanh.f32 %v2378_v61  ;;  %v3513_v10 = vadd.f32 %v6340_v49, %v6338_v0 }
 0x39a   :  { %v3845_v3 = vmul.f32 0.25, %v3734_v63  ;;  %6347 = vtanh.f32 %v2930_v4 }
 0x39c   :  { %v5469_v5 = vpack.c.bf16 %v3845_v3, %v3844_v1  ;;  %v2654_v6 = vpop.f32.mrf.mxu2 }
 0x39d   :  { %v2655_v8 = vadd.f32 %v7624_v54, %v2654_v6  ;;  %v2934_v9 = vpop.f32.mrf.mxu3  ;;  %v6342_v13 = vpop.eup %6341 }
 0x39e   :  { %5560 = vst [vmem:[%s7849_s3 + $0x168] sm:$0xff] %v5469_v5   ;;  %v2107_v12 = vpop.f32.mrf.mxu0  ;;  %v6344_v15 = vpop.eup %6343  ;;  %v3624_v19 = vadd.f32 %v6342_v13, %v3513_v10  ;;  %v2935_v36 = vadd.f32 %v7624_v54, %v2934_v9 }
 0x39f   :  { %6349 = vtanh.f32 %v2655_v8  ;;  %v2382_v14 = vpop.f32.mrf.mxu1  ;;  %v6346_v17 = vpop.eup %6345  ;;  %v2108_v51 = vadd.f32 %v7624_v54, %v2107_v12 }
 0x3a0   :  { %6351 = vtanh.f32 %v2933_v7  ;;  %v6348_v21 = vpop.eup %6347  ;;  %v3514_v22 = vadd.f32 %v6346_v17, %v6344_v15  ;;  %v2383_v31 = vadd.f32 %v7624_v54, %v2382_v14 }
 0x3a1   :  { %6353 = vtanh.f32 %v2103_v16  ;;  %v3735_v26 = vadd.f32 %v6348_v21, %v3624_v19 }
 0x3a2   :  { %6355 = vtanh.f32 %v2380_v18 }
 0x3a3   :  { %v3846_v20 = vmul.f32 0.25, %v3735_v26 }
 0x3a4   :  { %v2657_v23 = vpop.f32.mrf.mxu2 }
 0x3a5   :  { %v6350_v24 = vpop.eup %6349  ;;  %v2658_v2 = vadd.f32 %v7624_v54, %v2657_v23  ;;  %v2937_v25 = vpop.f32.mrf.mxu3 }
 0x3a6   :  { %v3625_v28 = vadd.f32 %v6350_v24, %v3514_v22  ;;  %v2109_v29 = vpop.f32.mrf.mxu0  ;;  %v6352_v30 = vpop.eup %6351  ;;  %v2938_v41 = vadd.f32 %v7624_v54, %v2937_v25 }
 0x3a7   :  { %v2384_v32 = vpop.f32.mrf.mxu1  ;;  %6357 = vtanh.f32 %v2658_v2  ;;  %v6354_v34 = vpop.eup %6353  ;;  %v2110_v62 = vadd.f32 %v7624_v54, %v2109_v29 }
 0x3a8   :  { %v3736_v33 = vadd.f32 %v6352_v30, %v3625_v28  ;;  %6359 = vtanh.f32 %v2105_v27  ;;  %v6356_v37 = vpop.eup %6355  ;;  %v2385_v53 = vadd.f32 %v7624_v54, %v2384_v32 }
 0x3a9   :  { %6361 = vtanh.f32 %v2383_v31  ;;  %v3515_v44 = vadd.f32 %v6356_v37, %v6354_v34 }
 0x3aa   :  { %v3847_v35 = vmul.f32 0.25, %v3736_v33  ;;  %6363 = vtanh.f32 %v2935_v36 }
 0x3ac   :  { %v5474_v38 = vpack.c.bf16 %v3847_v35, %v3846_v20  ;;  %v2659_v40 = vpop.f32.mrf.mxu2 }
 0x3ad   :  { %v2660_v42 = vadd.f32 %v7624_v54, %v2659_v40  ;;  %v2939_v43 = vpop.f32.mrf.mxu3  ;;  %v6358_v47 = vpop.eup %6357 }
 0x3ae   :  { %5561 = vst [vmem:[%s7849_s3 + $0x170] sm:$0xff] %v5474_v38   ;;  %v2112_v45 = vpop.f32.mrf.mxu0  ;;  %v6360_v50 = vpop.eup %6359  ;;  %v3626_v55 = vadd.f32 %v6358_v47, %v3515_v44  ;;  %v2940_v8 = vadd.f32 %v7624_v54, %v2939_v43 }
 0x3af   :  { %6365 = vtanh.f32 %v2660_v42  ;;  %v2387_v48 = vpop.f32.mrf.mxu1  ;;  %v6362_v52 = vpop.eup %6361  ;;  %v2113_v22 = vadd.f32 %v7624_v54, %v2112_v45 }
 0x3b0   :  { %6367 = vtanh.f32 %v2938_v41  ;;  %v6364_v56 = vpop.eup %6363  ;;  %v3516_v39 = vadd.f32 %v6362_v52, %v6360_v50  ;;  %v2388_v3 = vadd.f32 %v7624_v54, %v2387_v48 }
 0x3b1   :  { %6369 = vtanh.f32 %v2108_v51  ;;  %v3737_v61 = vadd.f32 %v6364_v56, %v3626_v55 }
 0x3b2   :  { %6371 = vtanh.f32 %v2385_v53 }
 0x3b3   :  { %v3848_v6 = vmul.f32 0.25, %v3737_v61 }
 0x3b4   :  { %v2662_v57 = vpop.f32.mrf.mxu2 }
 0x3b5   :  { %v6366_v58 = vpop.eup %6365  ;;  %v2663_v59 = vadd.f32 %v7624_v54, %v2662_v57  ;;  %v2942_v60 = vpop.f32.mrf.mxu3 }
 0x3b6   :  { %v3627_v63 = vadd.f32 %v6366_v58, %v3516_v39  ;;  %v2114_v0 = vpop.f32.mrf.mxu0  ;;  %v6368_v1 = vpop.eup %6367  ;;  %v2943_v13 = vadd.f32 %v7624_v54, %v2942_v60 }
 0x3b7   :  { %v2389_v4 = vpop.f32.mrf.mxu1  ;;  %6373 = vtanh.f32 %v2663_v59  ;;  %v6370_v5 = vpop.eup %6369  ;;  %v2115_v32 = vadd.f32 %v7624_v54, %v2114_v0 }
 0x3b8   :  { %v3738_v49 = vadd.f32 %v6368_v1, %v3627_v63  ;;  %6375 = vtanh.f32 %v2110_v62  ;;  %v6372_v9 = vpop.eup %6371  ;;  %v2390_v24 = vadd.f32 %v7624_v54, %v2389_v4 }
 0x3b9   :  { %6377 = vtanh.f32 %v2388_v3  ;;  %v3517_v16 = vadd.f32 %v6372_v9, %v6370_v5 }
 0x3ba   :  { %v3849_v7 = vmul.f32 0.25, %v3738_v49  ;;  %6379 = vtanh.f32 %v2940_v8 }
 0x3bc   :  { %v5479_v10 = vpack.c.bf16 %v3849_v7, %v3848_v6  ;;  %v2664_v12 = vpop.f32.mrf.mxu2 }
 0x3bd   :  { %v2665_v14 = vadd.f32 %v7624_v54, %v2664_v12  ;;  %v2944_v15 = vpop.f32.mrf.mxu3  ;;  %v6374_v18 = vpop.eup %6373 }
 0x3be   :  { %5562 = vst [vmem:[%s7849_s3 + $0x178] sm:$0xff] %v5479_v10   ;;  %v2117_v17 = vpop.f32.mrf.mxu0  ;;  %v6376_v21 = vpop.eup %6375  ;;  %v3628_v2 = vadd.f32 %v6374_v18, %v3517_v16  ;;  %v2945_v42 = vadd.f32 %v7624_v54, %v2944_v15 }
 0x3bf   :  { %6381 = vtanh.f32 %v2665_v14  ;;  %v2392_v19 = vpop.f32.mrf.mxu1  ;;  %v6378_v23 = vpop.eup %6377  ;;  %v2118_v39 = vadd.f32 %v7624_v54, %v2117_v17 }
 0x3c0   :  { %6383 = vtanh.f32 %v2943_v13  ;;  %v6380_v25 = vpop.eup %6379  ;;  %v3518_v26 = vadd.f32 %v6378_v23, %v6376_v21  ;;  %v2393_v35 = vadd.f32 %v7624_v54, %v2392_v19 }
 0x3c1   :  { %6385 = vtanh.f32 %v2113_v22  ;;  %v3739_v31 = vadd.f32 %v6380_v25, %v3628_v2 }
 0x3c2   :  { %6387 = vtanh.f32 %v2390_v24 }
 0x3c3   :  { %v3850_v40 = vmul.f32 0.25, %v3739_v31 }
 0x3c4   :  { %v2667_v27 = vpop.f32.mrf.mxu2 }
 0x3c5   :  { %v6382_v28 = vpop.eup %6381  ;;  %v2668_v29 = vadd.f32 %v7624_v54, %v2667_v27  ;;  %v2947_v30 = vpop.f32.mrf.mxu3 }
 0x3c6   :  { %v3629_v33 = vadd.f32 %v6382_v28, %v3518_v26  ;;  %v2119_v34 = vpop.f32.mrf.mxu0  ;;  %v6384_v20 = vpop.eup %6383  ;;  %v2948_v47 = vadd.f32 %v7624_v54, %v2947_v30 }
 0x3c7   :  { %v2394_v36 = vpop.f32.mrf.mxu1  ;;  %6389 = vtanh.f32 %v2668_v29  ;;  %v6386_v38 = vpop.eup %6385  ;;  %v2120_v4 = vadd.f32 %v7624_v54, %v2119_v34 }
 0x3c8   :  { %v3740_v37 = vadd.f32 %v6384_v20, %v3629_v33  ;;  %6391 = vtanh.f32 %v2115_v32  ;;  %v6388_v43 = vpop.eup %6387  ;;  %v2395_v58 = vadd.f32 %v7624_v54, %v2394_v36 }
 0x3c9   :  { %6393 = vtanh.f32 %v2393_v35  ;;  %v3519_v51 = vadd.f32 %v6388_v43, %v6386_v38 }
 0x3ca   :  { %v3851_v41 = vmul.f32 0.25, %v3740_v37  ;;  %6395 = vtanh.f32 %v2945_v42 }
 0x3cc   :  { %v5484_v44 = vpack.c.bf16 %v3851_v41, %v3850_v40  ;;  %v2669_v45 = vpop.f32.mrf.mxu2 }
 0x3cd   :  { %v2670_v48 = vadd.f32 %v7624_v54, %v2669_v45  ;;  %v2949_v50 = vpop.f32.mrf.mxu3  ;;  %v6390_v53 = vpop.eup %6389 }
 0x3ce   :  { %5563 = vst [vmem:[%s7849_s3 + $0x180] sm:$0xff] %v5484_v44   ;;  %v2122_v52 = vpop.f32.mrf.mxu0  ;;  %v6392_v56 = vpop.eup %6391  ;;  %v3630_v59 = vadd.f32 %v6390_v53, %v3519_v51  ;;  %v2950_v14 = vadd.f32 %v7624_v54, %v2949_v50 }
 0x3cf   :  { %6397 = vtanh.f32 %v2670_v48  ;;  %v2397_v55 = vpop.f32.mrf.mxu1  ;;  %v6394_v57 = vpop.eup %6393  ;;  %v2123_v25 = vadd.f32 %v7624_v54, %v2122_v52 }
 0x3d0   :  { %6399 = vtanh.f32 %v2948_v47  ;;  %v6396_v60 = vpop.eup %6395  ;;  %v3520_v61 = vadd.f32 %v6394_v57, %v6392_v56  ;;  %v2398_v6 = vadd.f32 %v7624_v54, %v2397_v55 }
 0x3d1   :  { %6401 = vtanh.f32 %v2118_v39  ;;  %v3741_v3 = vadd.f32 %v6396_v60, %v3630_v59 }
 0x3d2   :  { %6403 = vtanh.f32 %v2395_v58 }
 0x3d3   :  { %v3852_v12 = vmul.f32 0.25, %v3741_v3 }
 0x3d4   :  { %v2672_v62 = vpop.f32.mrf.mxu2 }
 0x3d5   :  { %v6398_v63 = vpop.eup %6397  ;;  %v2673_v0 = vadd.f32 %v7624_v54, %v2672_v62  ;;  %v2952_v1 = vpop.f32.mrf.mxu3 }
 0x3d6   :  { %v3631_v49 = vadd.f32 %v6398_v63, %v3520_v61  ;;  %v6400_v5 = vpop.eup %6399  ;;  %v2124_v9 = vpop.f32.mrf.mxu0  ;;  %v2953_v18 = vadd.f32 %v7624_v54, %v2952_v1 }
 0x3d7   :  { %v2399_v7 = vpop.f32.mrf.mxu1  ;;  %6405 = vtanh.f32 %v2673_v0  ;;  %v6402_v10 = vpop.eup %6401  ;;  %v2125_v36 = vadd.f32 %v7624_v54, %v2124_v9 }
 0x3d8   :  { %v3742_v8 = vadd.f32 %v6400_v5, %v3631_v49  ;;  %6407 = vtanh.f32 %v2120_v4  ;;  %v6404_v15 = vpop.eup %6403  ;;  %v2400_v27 = vadd.f32 %v7624_v54, %v2399_v7 }
 0x3d9   :  { %6409 = vtanh.f32 %v2398_v6  ;;  %v3521_v22 = vadd.f32 %v6404_v15, %v6402_v10 }
 0x3da   :  { %v3853_v13 = vmul.f32 0.25, %v3742_v8  ;;  %6411 = vtanh.f32 %v2950_v14 }
 0x3dc   :  { %v5489_v16 = vpack.c.bf16 %v3853_v13, %v3852_v12  ;;  %v2674_v17 = vpop.f32.mrf.mxu2 }
 0x3dd   :  { %v2675_v19 = vadd.f32 %v7624_v54, %v2674_v17  ;;  %v2954_v21 = vpop.f32.mrf.mxu3  ;;  %v6406_v23 = vpop.eup %6405 }
 0x3de   :  { %5564 = vst [vmem:[%s7849_s3 + $0x188] sm:$0xff] %v5489_v16   ;;  %v6408_v2 = vpop.eup %6407  ;;  %v3632_v28 = vadd.f32 %v6406_v23, %v3521_v22  ;;  %v2127_v29 = vpop.f32.mrf.mxu0  ;;  %v2955_v47 = vadd.f32 %v7624_v54, %v2954_v21  ;;  %v7808_v23 = vld [vmem:[%s7847_s2] ss:$0 sm:$0xff] }
 0x3df   :  { %6413 = vtanh.f32 %v2675_v19  ;;  %v2402_v24 = vpop.f32.mrf.mxu1  ;;  %v6410_v26 = vpop.eup %6409  ;;  %v2128_v59 = vadd.f32 %v7624_v54, %v2127_v29 }
 0x3e0   :  { %6415 = vtanh.f32 %v2953_v18  ;;  %v6412_v30 = vpop.eup %6411  ;;  %v3522_v31 = vadd.f32 %v6410_v26, %v6408_v2  ;;  %v2403_v40 = vadd.f32 %v7624_v54, %v2402_v24 }
 0x3e1   :  { %6417 = vtanh.f32 %v2123_v25  ;;  %v3743_v35 = vadd.f32 %v6412_v30, %v3632_v28 }
 0x3e2   :  { %6419 = vtanh.f32 %v2400_v27 }
 0x3e3   :  { %v3854_v44 = vmul.f32 0.25, %v3743_v35 }
 0x3e4   :  { %v2677_v32 = vpop.f32.mrf.mxu2 }
 0x3e5   :  { %v6414_v33 = vpop.eup %6413  ;;  %v2678_v34 = vadd.f32 %v7624_v54, %v2677_v32  ;;  %v2957_v20 = vpop.f32.mrf.mxu3 }
 0x3e6   :  { %v3633_v37 = vadd.f32 %v6414_v33, %v3522_v31  ;;  %v6416_v38 = vpop.eup %6415  ;;  %v2129_v51 = vpop.f32.mrf.mxu0  ;;  %v2958_v53 = vadd.f32 %v7624_v54, %v2957_v20 }
 0x3e7   :  { %v2404_v41 = vpop.f32.mrf.mxu1  ;;  %6421 = vtanh.f32 %v2678_v34  ;;  %v6418_v43 = vpop.eup %6417  ;;  %v2130_v7 = vadd.f32 %v7624_v54, %v2129_v51 }
 0x3e8   :  { %v3744_v42 = vadd.f32 %v6416_v38, %v3633_v37  ;;  %6423 = vtanh.f32 %v2125_v36  ;;  %v6420_v48 = vpop.eup %6419  ;;  %v2405_v62 = vadd.f32 %v7624_v54, %v2404_v41 }
 0x3e9   :  { %6425 = vtanh.f32 %v2403_v40  ;;  %v3523_v39 = vadd.f32 %v6420_v48, %v6418_v43 }
 0x3ea   :  { %v3855_v45 = vmul.f32 0.25, %v3744_v42  ;;  %6427 = vtanh.f32 %v2955_v47 }
 0x3ec   :  { %v5494_v50 = vpack.c.bf16 %v3855_v45, %v3854_v44  ;;  %v2679_v52 = vpop.f32.mrf.mxu2 }
 0x3ed   :  { %v2680_v55 = vadd.f32 %v7624_v54, %v2679_v52  ;;  %v2959_v56 = vpop.f32.mrf.mxu3  ;;  %v6422_v57 = vpop.eup %6421 }
 0x3ee   :  { %5565 = vst [vmem:[%s7849_s3 + $0x190] sm:$0xff] %v5494_v50   ;;  %v6424_v58 = vpop.eup %6423  ;;  %v3634_v63 = vadd.f32 %v6422_v57, %v3523_v39  ;;  %v2132_v9 = vpop.f32.mrf.mxu0  ;;  %v2960_v17 = vadd.f32 %v7624_v54, %v2959_v56 }
 0x3ef   :  { %6429 = vtanh.f32 %v2680_v55  ;;  %v2407_v60 = vpop.f32.mrf.mxu1  ;;  %v6426_v61 = vpop.eup %6425  ;;  %v2133_v28 = vadd.f32 %v7808_v23, %v2132_v9 }
 0x3f0   :  { %6431 = vtanh.f32 %v2958_v53  ;;  %v6428_v0 = vpop.eup %6427  ;;  %v3524_v1 = vadd.f32 %v6426_v61, %v6424_v58  ;;  %v2408_v12 = vadd.f32 %v7624_v54, %v2407_v60 }
 0x3f1   :  { %6433 = vtanh.f32 %v2128_v59  ;;  %v3745_v6 = vadd.f32 %v6428_v0, %v3634_v63 }
 0x3f2   :  { %6435 = vtanh.f32 %v2405_v62 }
 0x3f3   :  { %v3856_v15 = vmul.f32 0.25, %v3745_v6 }
 0x3f4   :  { %v2682_v3 = vpop.f32.mrf.mxu2 }
 0x3f5   :  { %v6430_v4 = vpop.eup %6429  ;;  %v2683_v49 = vadd.f32 %v7624_v54, %v2682_v3  ;;  %v2962_v5 = vpop.f32.mrf.mxu3 }
 0x3f6   :  { %v3635_v8 = vadd.f32 %v6430_v4, %v3524_v1  ;;  %v6432_v10 = vpop.eup %6431  ;;  %v2963_v24 = vadd.f32 %v7808_v23, %v2962_v5  ;;  %v2134_v29 = vpop.f32.mrf.mxu0 }
 0x3f7   :  { %6437 = vtanh.f32 %v2683_v49  ;;  %v6434_v14 = vpop.eup %6433  ;;  %v2409_v18 = vpop.f32.mrf.mxu1  ;;  %v2135_v41 = vadd.f32 %v7808_v23, %v2134_v29 }
 0x3f8   :  { %v3746_v13 = vadd.f32 %v6432_v10, %v3635_v8  ;;  %6439 = vtanh.f32 %v2130_v7  ;;  %v6436_v19 = vpop.eup %6435  ;;  %v2410_v31 = vadd.f32 %v7808_v23, %v2409_v18 }
 0x3f9   :  { %6441 = vtanh.f32 %v2408_v12  ;;  %v3525_v26 = vadd.f32 %v6436_v19, %v6434_v14 }
 0x3fa   :  { %v3857_v16 = vmul.f32 0.25, %v3746_v13  ;;  %6443 = vtanh.f32 %v2960_v17 }
 0x3fc   :  { %v5499_v21 = vpack.c.bf16 %v3857_v16, %v3856_v15  ;;  %v2684_v22 = vpop.f32.mrf.mxu2  ;;  %v2418_v16 = vadd.f32 %v7808_v23, %v6640_v46 }
 0x3fd   :  { %v2685_v2 = vadd.f32 %v7808_v23, %v2684_v22  ;;  %v2964_v25 = vpop.f32.mrf.mxu3  ;;  %v6438_v54 = vpop.eup %6437 }
 0x3fe   :  { %5566 = vst [vmem:[%s7849_s3 + $0x198] sm:$0xff] %v5499_v21   ;;  %v6440_v27 = vpop.eup %6439  ;;  %v3636_v32 = vadd.f32 %v6438_v54, %v3525_v26  ;;  %v2965_v51 = vadd.f32 %v7808_v23, %v2964_v25  ;;  %v2137_v52 = vpop.f32.mrf.mxu0 }
 0x3ff   :  { %6445 = vtanh.f32 %v2685_v2  ;;  %v6442_v30 = vpop.eup %6441  ;;  %v2412_v20 = vpop.f32.mrf.mxu1  ;;  %v2138_v63 = vadd.f32 %v7808_v23, %v2137_v52 }
 0x400   :  { %6447 = vtanh.f32 %v2963_v24  ;;  %v6444_v33 = vpop.eup %6443  ;;  %v3526_v34 = vadd.f32 %v6442_v30, %v6440_v27  ;;  %v2413_v44 = vadd.f32 %v7808_v23, %v2412_v20 }
 0x401   :  { %6449 = vtanh.f32 %v2133_v28  ;;  %v3747_v40 = vadd.f32 %v6444_v33, %v3636_v32 }
 0x402   :  { %6451 = vtanh.f32 %v2410_v31 }
 0x403   :  { %v3858_v48 = vmul.f32 0.25, %v3747_v40 }
 0x404   :  { %v2687_v35 = vpop.f32.mrf.mxu2 }
 0x405   :  { %v6446_v36 = vpop.eup %6445  ;;  %v2688_v37 = vadd.f32 %v7808_v23, %v2687_v35  ;;  %v2967_v38 = vpop.f32.mrf.mxu3 }
 0x406   :  { %v3637_v42 = vadd.f32 %v6446_v36, %v3526_v34  ;;  %v6448_v43 = vpop.eup %6447  ;;  %v2968_v39 = vadd.f32 %v7808_v23, %v2967_v38  ;;  %v2139_v5 = vpop.f32.mrf.mxu0 }
 0x407   :  { %6453 = vtanh.f32 %v2688_v37  ;;  %v6450_v47 = vpop.eup %6449  ;;  %v2414_v60 = vpop.f32.mrf.mxu1  ;;  %v2140_v14 = vadd.f32 %v7808_v23, %v2139_v5 }
 0x408   :  { %v3748_v45 = vadd.f32 %v6448_v43, %v3637_v42  ;;  %6455 = vtanh.f32 %v2135_v41  ;;  %v6452_v53 = vpop.eup %6451  ;;  %v2415_v1 = vadd.f32 %v7808_v23, %v2414_v60 }
 0x409   :  { %6457 = vtanh.f32 %v2413_v44  ;;  %v3527_v59 = vadd.f32 %v6452_v53, %v6450_v47 }
 0x40a   :  { %v3859_v50 = vmul.f32 0.25, %v3748_v45  ;;  %6459 = vtanh.f32 %v2965_v51 }
 0x40c   :  { %v5504_v55 = vpack.c.bf16 %v3859_v50, %v3858_v48  ;;  %v2689_v56 = vpop.f32.mrf.mxu2 }
 0x40d   :  { %v2690_v57 = vadd.f32 %v7808_v23, %v2689_v56  ;;  %v2969_v58 = vpop.f32.mrf.mxu3  ;;  %v6454_v61 = vpop.eup %6453 }
 0x40e   :  { %5567 = vst [vmem:[%s7849_s3 + $0x1a0] sm:$0xff] %v5504_v55   ;;  %v6456_v62 = vpop.eup %6455  ;;  %v3638_v3 = vadd.f32 %v6454_v61, %v3527_v59  ;;  %v2970_v21 = vadd.f32 %v7808_v23, %v2969_v58 }
 0x40f   :  { %6461 = vtanh.f32 %v2690_v57  ;;  %v6458_v0 = vpop.eup %6457 }
 0x410   :  { %6463 = vtanh.f32 %v2968_v39  ;;  %v6460_v4 = vpop.eup %6459  ;;  %v3528_v49 = vadd.f32 %v6458_v0, %v6456_v62 }
 0x411   :  { %6465 = vtanh.f32 %v2138_v63  ;;  %v3749_v10 = vadd.f32 %v6460_v4, %v3638_v3 }
 0x412   :  { %6467 = vtanh.f32 %v2415_v1 }
 0x413   :  { %v3860_v18 = vmul.f32 0.25, %v3749_v10 }
 0x414   :  { %v2692_v6 = vpop.f32.mrf.mxu2 }
 0x415   :  { %v6462_v7 = vpop.eup %6461  ;;  %v2693_v8 = vadd.f32 %v7808_v23, %v2692_v6  ;;  %v2972_v9 = vpop.f32.mrf.mxu3 }
 0x416   :  { %v3639_v12 = vadd.f32 %v6462_v7, %v3528_v49  ;;  %v6464_v13 = vpop.eup %6463  ;;  %v2973_v25 = vadd.f32 %v7808_v23, %v2972_v9 }
 0x417   :  { %6469 = vtanh.f32 %v2693_v8  ;;  %v6466_v17 = vpop.eup %6465 }
 0x418   :  { %v3750_v15 = vadd.f32 %v6464_v13, %v3639_v12  ;;  %v6468_v22 = vpop.eup %6467  ;;  %6471 = vtanh.f32 %v2140_v14 }
 0x419   :  { %6473 = vtanh.f32 %v2418_v16  ;;  %v3529_v46 = vadd.f32 %v6468_v22, %v6466_v17 }
 0x41a   :  { %v3861_v19 = vmul.f32 0.25, %v3750_v15  ;;  %6475 = vtanh.f32 %v2970_v21 }
 0x41c   :  { %v5509_v24 = vpack.c.bf16 %v3861_v19, %v3860_v18  ;;  %v2694_v2 = vpop.f32.mrf.mxu2 }
 0x41d   :  { %v2695_v26 = vadd.f32 %v7808_v23, %v2694_v2  ;;  %v2974_v54 = vpop.f32.mrf.mxu3  ;;  %v6470_v28 = vpop.eup %6469 }
 0x41e   :  { %5568 = vst [vmem:[%s7849_s3 + $0x1a8] sm:$0xff] %v5509_v24   ;;  %v2975_v27 = vadd.f32 %v7808_v23, %v2974_v54  ;;  %v6472_v29 = vpop.eup %6471  ;;  %v3640_v30 = vadd.f32 %v6470_v28, %v3529_v46 }
 0x41f   :  { %6477 = vtanh.f32 %v2695_v26  ;;  %v6474_v31 = vpop.eup %6473 }
 0x420   :  { %6479 = vtanh.f32 %v2975_v27  ;;  %v6476_v32 = vpop.eup %6475  ;;  %v3530_v33 = vadd.f32 %v6474_v31, %v6472_v29 }
 0x421   :  { %6481 = vtanh.f32 %v2973_v25  ;;  %v3751_v35 = vadd.f32 %v6476_v32, %v3640_v30 }
 0x423   :  { %v3862_v42 = vmul.f32 0.25, %v3751_v35 }
 0x425   :  { %v6478_v34 = vpop.eup %6477 }
 0x426   :  { %v6480_v20 = vpop.eup %6479  ;;  %v3641_v36 = vadd.f32 %v6478_v34, %v3530_v33 }
 0x427   :  { %v6482_v37 = vpop.eup %6481  ;;  %v3753_v38 = vadd.f32 %v6480_v20, %v6667_v11 }
 0x428   :  { %v3752_v40 = vadd.f32 %v6482_v37, %v3641_v36 }
 0x429   :  { %v3864_v41 = vmul.f32 0.25, %v3753_v38 }
 0x42a   :  { %v3863_v23 = vmul.f32 0.25, %v3752_v40 }
 0x42b   :  { %v3975_v43 = vpack.c.bf16 %v3864_v41, %v3864_v41 }
 0x42c   :  { %v5514_v44 = vpack.c.bf16 %v3863_v23, %v3862_v42 }
 0x42d   :  { %4086 = vst [vmem:[%s7849_s3 + $0x1b8] sm:$0xf] %v3975_v43 }
 0x42e   :  { %5569 = vst [vmem:[%s7849_s3 + $0x1b0] sm:$0xff] %v5514_v44  }

// kernel: cnn_forward.4
= control target key start
LH: loop header
LB: loop body
LE: loop exit
PB: predicated region body
PF: predicated region fallthrough
CT: control target
= control target key end

     0   :  { %s801_s1 = inlined_call_operand.vmem [shape: bf16[256,128], index: 1, kind: input, shape index: {}]   ;;  %s802_s2 = inlined_call_operand.vmem [shape: f32[1,128], index: 2, kind: input, shape index: {}]   ;;  %s803_s0 = inlined_call_operand.vmem [shape: bf16[4,32,256], index: 0, kind: input, shape index: {}]   ;;  %s804_s3 = inlined_call_operand.vmem [shape: bf16[32,128], index: 3, kind: output, shape index: {}]  }
   0x1   :  { %v535_v0 = vld [vmem:[%s801_s1 + $0x38] sm:$0xff]  ;;  %v534_v2 = vld [vmem:[%s801_s1 + $0x30] sm:$0xff]  ;;  %v533_v4 = vld [vmem:[%s801_s1 + $0x28] sm:$0xff] }
   0x2   :  { %v543_v1 = vld [vmem:[%s801_s1 + $0x78] sm:$0xff]  ;;  %242 = vmatpush.bf16.msra.mxu0 %v535_v0  ;;  %555 = vmatpush.bf16.msra.mxu2 %v535_v0  ;;  %v542_v3 = vld [vmem:[%s801_s1 + $0x70] sm:$0xff]  ;;  %v541_v5 = vld [vmem:[%s801_s1 + $0x68] sm:$0xff] }
   0x3   :  { %291 = vmatpush.bf16.msra.mxu1 %v543_v1  ;;  %563 = vmatpush.bf16.msra.mxu3 %v543_v1  ;;  %v532_v6 = vld [vmem:[%s801_s1 + $0x20] sm:$0xff]  ;;  %v531_v8 = vld [vmem:[%s801_s1 + $0x18] sm:$0xff]  ;;  %v530_v10 = vld [vmem:[%s801_s1 + $0x10] sm:$0xff] }
   0x4   :  { %v540_v7 = vld [vmem:[%s801_s1 + $0x60] sm:$0xff]  ;;  %v539_v9 = vld [vmem:[%s801_s1 + $0x58] sm:$0xff]  ;;  %v538_v11 = vld [vmem:[%s801_s1 + $0x50] sm:$0xff] }
   0x5   :  { %v529_v12 = vld [vmem:[%s801_s1 + $0x8] sm:$0xff]  ;;  %v528_v14 = vld [vmem:[%s801_s1] sm:$0xff]  ;;  %v394_v28 = vld [vmem:[%s803_s0 + $0x10] sm:$0xf] }
   0x6   :  { %243 = vmatpush.bf16.msra.mxu0 %v534_v2  ;;  %556 = vmatpush.bf16.msra.mxu2 %v534_v2  ;;  %v537_v13 = vld [vmem:[%s801_s1 + $0x48] sm:$0xff]  ;;  %v536_v15 = vld [vmem:[%s801_s1 + $0x40] sm:$0xff]  ;;  %v515_v29 = vld [vmem:[%s803_s0 + $0x14] sm:$0xf0] }
   0x7   :  { %292 = vmatpush.bf16.msra.mxu1 %v542_v3  ;;  %564 = vmatpush.bf16.msra.mxu3 %v542_v3  ;;  %v386_v16 = vld [vmem:[%s803_s0] sm:$0xf]  ;;  %v513_v17 = vld [vmem:[%s803_s0 + $0x4] sm:$0xf0]  ;;  %v512_v20 = vld [vmem:[%s803_s0 + $0x4] sm:$0xf]  ;;  %v395_v36 = vor.u32 %v515_v29, %v394_v28 }
   0x8   :  { %v418_v18 = vld [vmem:[%s803_s0 + $0x40] sm:$0xf]  ;;  %v521_v19 = vld [vmem:[%s803_s0 + $0x44] sm:$0xf0]  ;;  %v388_v21 = vld [vmem:[%s803_s0 + $0x8] sm:$0xf0]  ;;  %v387_v24 = vor.u32 %v513_v17, %v386_v16 }
   0x9   :  { %v520_v22 = vld [vmem:[%s803_s0 + $0x44] sm:$0xf]  ;;  %v420_v23 = vld [vmem:[%s803_s0 + $0x48] sm:$0xf0]  ;;  %v419_v25 = vor.u32 %v521_v19, %v418_v18  ;;  %v391_v26 = vor.u32 %v512_v20, %v388_v21  ;;  %v426_v30 = vld [vmem:[%s803_s0 + $0x50] sm:$0xf] }
   0xa   :  { %244 = vmatpush.bf16.msra.mxu0 %v533_v4  ;;  %557 = vmatpush.bf16.msra.mxu2 %v533_v4  ;;  %v423_v27 = vor.u32 %v520_v22, %v420_v23  ;;  %v523_v31 = vld [vmem:[%s803_s0 + $0x54] sm:$0xf0]  ;;  %v514_v32 = vld [vmem:[%s803_s0 + $0x14] sm:$0xf]  ;;  %v396_v33 = vld [vmem:[%s803_s0 + $0x18] sm:$0xf0] }
   0xb   :  { %293 = vmatpush.bf16.msra.mxu1 %v541_v5  ;;  %565 = vmatpush.bf16.msra.mxu3 %v541_v5  ;;  %v522_v34 = vld [vmem:[%s803_s0 + $0x54] sm:$0xf]  ;;  %v428_v35 = vld [vmem:[%s803_s0 + $0x58] sm:$0xf0]  ;;  %v427_v37 = vor.u32 %v523_v31, %v426_v30  ;;  %v399_v38 = vor.u32 %v514_v32, %v396_v33  ;;  %v402_v40 = vld [vmem:[%s803_s0 + $0x20] sm:$0xf] }
   0xc   :  { %v431_v39 = vor.u32 %v522_v34, %v428_v35  ;;  %v517_v41 = vld [vmem:[%s803_s0 + $0x24] sm:$0xf0]  ;;  %v434_v42 = vld [vmem:[%s803_s0 + $0x60] sm:$0xf]  ;;  %v516_v44 = vld [vmem:[%s803_s0 + $0x24] sm:$0xf] }
   0xd   :  { %v525_v43 = vld [vmem:[%s803_s0 + $0x64] sm:$0xf0]  ;;  %v404_v45 = vld [vmem:[%s803_s0 + $0x28] sm:$0xf0]  ;;  %v524_v46 = vld [vmem:[%s803_s0 + $0x64] sm:$0xf]  ;;  %v403_v48 = vor.u32 %v517_v41, %v402_v40 }
   0xe   :  { %245 = vmatpush.bf16.msra.mxu0 %v532_v6  ;;  %558 = vmatpush.bf16.msra.mxu2 %v532_v6  ;;  %v436_v47 = vld [vmem:[%s803_s0 + $0x68] sm:$0xf0]  ;;  %v435_v49 = vor.u32 %v525_v43, %v434_v42  ;;  %v407_v50 = vor.u32 %v516_v44, %v404_v45  ;;  %v410_v52 = vld [vmem:[%s803_s0 + $0x30] sm:$0xf]  ;;  %v519_v53 = vld [vmem:[%s803_s0 + $0x34] sm:$0xf0] }
   0xf   :  { %294 = vmatpush.bf16.msra.mxu1 %v540_v7  ;;  %566 = vmatpush.bf16.msra.mxu3 %v540_v7  ;;  %v439_v51 = vor.u32 %v524_v46, %v436_v47  ;;  %v442_v54 = vld [vmem:[%s803_s0 + $0x70] sm:$0xf]  ;;  %v527_v55 = vld [vmem:[%s803_s0 + $0x74] sm:$0xf0]  ;;  %v518_v56 = vld [vmem:[%s803_s0 + $0x34] sm:$0xf]  ;;  %v411_v60 = vor.u32 %v519_v53, %v410_v52 }
  0x10   :  { %v412_v57 = vld [vmem:[%s803_s0 + $0x38] sm:$0xf0]  ;;  %v526_v58 = vld [vmem:[%s803_s0 + $0x74] sm:$0xf]  ;;  %v443_v61 = vor.u32 %v527_v55, %v442_v54 }
  0x11   :  { %v444_v59 = vld [vmem:[%s803_s0 + $0x78] sm:$0xf0]  ;;  %v415_v62 = vor.u32 %v518_v56, %v412_v57 }
  0x12   :  { %246 = vmatpush.bf16.msra.mxu0 %v531_v8  ;;  %559 = vmatpush.bf16.msra.mxu2 %v531_v8  ;;  %v447_v63 = vor.u32 %v526_v58, %v444_v59 }
  0x13   :  { %295 = vmatpush.bf16.msra.mxu1 %v539_v9  ;;  %567 = vmatpush.bf16.msra.mxu3 %v539_v9 }
  0x16   :  { %247 = vmatpush.bf16.msra.mxu0 %v530_v10  ;;  %560 = vmatpush.bf16.msra.mxu2 %v530_v10 }
  0x17   :  { %296 = vmatpush.bf16.msra.mxu1 %v538_v11  ;;  %568 = vmatpush.bf16.msra.mxu3 %v538_v11 }
  0x1a   :  { %248 = vmatpush.bf16.msra.mxu0 %v529_v12  ;;  %561 = vmatpush.bf16.msra.mxu2 %v529_v12 }
  0x1b   :  { %297 = vmatpush.bf16.msra.mxu1 %v537_v13  ;;  %569 = vmatpush.bf16.msra.mxu3 %v537_v13 }
  0x1e   :  { %249 = vmatpush.bf16.msra.mxu0 %v528_v14  ;;  %562 = vmatpush.bf16.msra.mxu2 %v528_v14 }
  0x1f   :  { %298 = vmatpush.bf16.msra.mxu1 %v536_v15  ;;  %570 = vmatpush.bf16.msra.mxu3 %v536_v15  ;;  %v773_v15 = vld [vmem:[%s802_s2] ss:$0 sm:$0xff] }
  0x21   :  { %250 = vmatmul.bf16.vlgmr.msra.gmra.mxu0 %v387_v24  ;;  %270 = vmatmul.bf16.vlgmr.msra.gmra.mxu2 %v419_v25 }
  0x22   :  { %299 = vmatmul.bf16.vlgmr.msra.gmra.mxu1 %v391_v26  ;;  %319 = vmatmul.bf16.vlgmr.msra.gmra.mxu3 %v423_v27 }
  0x31   :  { %255 = vmatmul.bf16.gmra.mxu0 %v395_v36  ;;  %275 = vmatmul.bf16.gmra.mxu2 %v427_v37 }
  0x32   :  { %304 = vmatmul.bf16.gmra.mxu1 %v399_v38  ;;  %324 = vmatmul.bf16.gmra.mxu3 %v431_v39 }
  0x41   :  { %260 = vmatmul.bf16.gmra.mxu0 %v403_v48  ;;  %280 = vmatmul.bf16.gmra.mxu2 %v435_v49 }
  0x42   :  { %309 = vmatmul.bf16.gmra.mxu1 %v407_v50  ;;  %329 = vmatmul.bf16.gmra.mxu3 %v439_v51 }
  0x51   :  { %265 = vmatmul.bf16.gmra.mxu0 %v411_v60  ;;  %285 = vmatmul.bf16.gmra.mxu2 %v443_v61 }
  0x52   :  { %314 = vmatmul.bf16.gmra.mxu1 %v415_v62  ;;  %334 = vmatmul.bf16.gmra.mxu3 %v447_v63 }
  0x9e   :  { %v251_v0 = vpop.f32.mrf.mxu0 }
  0x9f   :  { %v300_v1 = vpop.f32.mrf.mxu1  ;;  %v252_v20 = vadd.f32 %v773_v15, %v251_v0 }
  0xa1   :  { %v301_v25 = vadd.f32 %v300_v1, %v252_v20 }
  0xa4   :  { %v271_v2 = vpop.f32.mrf.mxu2 }
  0xa5   :  { %v320_v3 = vpop.f32.mrf.mxu3  ;;  %v272_v23 = vadd.f32 %v773_v15, %v271_v2 }
  0xa6   :  { %v253_v4 = vpop.f32.mrf.mxu0 }
  0xa7   :  { %v302_v5 = vpop.f32.mrf.mxu1  ;;  %v254_v21 = vadd.f32 %v773_v15, %v253_v4  ;;  %v321_v33 = vadd.f32 %v320_v3, %v272_v23 }
  0xa9   :  { %v303_v28 = vadd.f32 %v302_v5, %v254_v21 }
  0xac   :  { %v273_v6 = vpop.f32.mrf.mxu2 }
  0xad   :  { %v322_v7 = vpop.f32.mrf.mxu3  ;;  %v274_v30 = vadd.f32 %v773_v15, %v273_v6 }
  0xae   :  { %v256_v8 = vpop.f32.mrf.mxu0 }
  0xaf   :  { %v305_v9 = vpop.f32.mrf.mxu1  ;;  %v323_v36 = vadd.f32 %v322_v7, %v274_v30  ;;  %v257_v49 = vadd.f32 %v773_v15, %v256_v8 }
  0xb1   :  { %v306_v59 = vadd.f32 %v305_v9, %v257_v49 }
  0xb4   :  { %v276_v10 = vpop.f32.mrf.mxu2 }
  0xb5   :  { %v768_v11 = vpop.f32.mrf.mxu3  ;;  %v277_v55 = vadd.f32 %v773_v15, %v276_v10 }
  0xb6   :  { %v258_v12 = vpop.f32.mrf.mxu0 }
  0xb7   :  { %v307_v13 = vpop.f32.mrf.mxu1  ;;  %v259_v51 = vadd.f32 %v773_v15, %v258_v12  ;;  %v326_v5 = vadd.f32 %v768_v11, %v277_v55 }
  0xb9   :  { %v308_v62 = vadd.f32 %v307_v13, %v259_v51 }
  0xbc   :  { %v278_v14 = vpop.f32.mrf.mxu2 }
  0xbd   :  { %v775_v16 = vpop.f32.mrf.mxu3  ;;  %v279_v3 = vadd.f32 %v773_v15, %v278_v14 }
  0xbe   :  { %v261_v17 = vpop.f32.mrf.mxu0 }
  0xbf   :  { %v262_v18 = vadd.f32 %v773_v15, %v261_v17  ;;  %v310_v19 = vpop.f32.mrf.mxu1  ;;  %v328_v13 = vadd.f32 %v775_v16, %v279_v3 }
  0xc1   :  { %v311_v22 = vadd.f32 %v310_v19, %v262_v18 }
  0xc3   :  { %572 = vtanh.f32 %v311_v22 }
  0xc4   :  { %v281_v24 = vpop.f32.mrf.mxu2  ;;  %574 = vtanh.f32 %v301_v25 }
  0xc5   :  { %v282_v26 = vadd.f32 %v773_v15, %v281_v24  ;;  %v330_v27 = vpop.f32.mrf.mxu3  ;;  %576 = vtanh.f32 %v303_v28 }
  0xc6   :  { %v263_v29 = vpop.f32.mrf.mxu0 }
  0xc7   :  { %v264_v31 = vadd.f32 %v773_v15, %v263_v29  ;;  %v312_v32 = vpop.f32.mrf.mxu1  ;;  %v331_v34 = vadd.f32 %v330_v27, %v282_v26 }
  0xc9   :  { %v313_v35 = vadd.f32 %v312_v32, %v264_v31  ;;  %v573_v38 = vpop.eup %572 }
  0xca   :  { %v575_v42 = vpop.eup %574 }
  0xcb   :  { %578 = vtanh.f32 %v313_v35  ;;  %v577_v46 = vpop.eup %576  ;;  %v356_v47 = vadd.f32 %v575_v42, %v573_v38 }
  0xcc   :  { %580 = vtanh.f32 %v321_v33  ;;  %v283_v37 = vpop.f32.mrf.mxu2 }
  0xcd   :  { %582 = vtanh.f32 %v331_v34  ;;  %v284_v39 = vadd.f32 %v773_v15, %v283_v37  ;;  %v332_v40 = vpop.f32.mrf.mxu3 }
  0xce   :  { %v266_v41 = vpop.f32.mrf.mxu0  ;;  %584 = vtanh.f32 %v323_v36 }
  0xcf   :  { %v333_v43 = vadd.f32 %v332_v40, %v284_v39  ;;  %v267_v44 = vadd.f32 %v773_v15, %v266_v41  ;;  %v315_v45 = vpop.f32.mrf.mxu1 }
  0xd1   :  { %v579_v48 = vpop.eup %578  ;;  %586 = vtanh.f32 %v333_v43  ;;  %v316_v54 = vadd.f32 %v315_v45, %v267_v44 }
  0xd2   :  { %v581_v50 = vpop.eup %580  ;;  %v357_v52 = vadd.f32 %v579_v48, %v577_v46 }
  0xd3   :  { %v583_v53 = vpop.eup %582  ;;  %v360_v56 = vadd.f32 %v581_v50, %v356_v47  ;;  %588 = vtanh.f32 %v316_v54 }
  0xd4   :  { %v286_v57 = vpop.f32.mrf.mxu2  ;;  %v585_v58 = vpop.eup %584  ;;  %590 = vtanh.f32 %v306_v59 }
  0xd5   :  { %v287_v60 = vadd.f32 %v773_v15, %v286_v57  ;;  %v335_v61 = vpop.f32.mrf.mxu3  ;;  %v364_v63 = vadd.f32 %v583_v53, %v360_v56  ;;  %v361_v0 = vadd.f32 %v585_v58, %v357_v52  ;;  %592 = vtanh.f32 %v308_v62 }
  0xd6   :  { %v268_v1 = vpop.f32.mrf.mxu0 }
  0xd7   :  { %v587_v2 = vpop.eup %586  ;;  %v269_v4 = vadd.f32 %v773_v15, %v268_v1  ;;  %v317_v7 = vpop.f32.mrf.mxu1  ;;  %v336_v8 = vadd.f32 %v335_v61, %v287_v60  ;;  %v368_v10 = vmul.f32 0.25, %v364_v63 }
  0xd8   :  { %v365_v6 = vadd.f32 %v587_v2, %v361_v0 }
  0xd9   :  { %v318_v9 = vadd.f32 %v317_v7, %v269_v4  ;;  %v589_v14 = vpop.eup %588 }
  0xda   :  { %v369_v12 = vmul.f32 0.25, %v365_v6  ;;  %v591_v20 = vpop.eup %590 }
  0xdb   :  { %594 = vtanh.f32 %v318_v9  ;;  %v593_v22 = vpop.eup %592  ;;  %v358_v23 = vadd.f32 %v591_v20, %v589_v14 }
  0xdc   :  { %596 = vtanh.f32 %v326_v5  ;;  %v547_v17 = vpack.c.bf16 %v369_v12, %v368_v10  ;;  %v288_v18 = vpop.f32.mrf.mxu2 }
  0xdd   :  { %598 = vtanh.f32 %v336_v8  ;;  %v289_v19 = vadd.f32 %v773_v15, %v288_v18  ;;  %v337_v11 = vpop.f32.mrf.mxu3 }
  0xde   :  { %548 = vst [vmem:[%s804_s3] sm:$0xff] %v547_v17   ;;  %600 = vtanh.f32 %v328_v13 }
  0xdf   :  { %v338_v21 = vadd.f32 %v337_v11, %v289_v19 }
  0xe1   :  { %v595_v24 = vpop.eup %594  ;;  %602 = vtanh.f32 %v338_v21 }
  0xe2   :  { %v597_v16 = vpop.eup %596  ;;  %v359_v25 = vadd.f32 %v595_v24, %v593_v22 }
  0xe3   :  { %v599_v26 = vpop.eup %598  ;;  %v362_v27 = vadd.f32 %v597_v16, %v358_v23 }
  0xe4   :  { %v601_v28 = vpop.eup %600 }
  0xe5   :  { %v366_v29 = vadd.f32 %v599_v26, %v362_v27  ;;  %v363_v30 = vadd.f32 %v601_v28, %v359_v25 }
  0xe7   :  { %v603_v15 = vpop.eup %602  ;;  %v370_v32 = vmul.f32 0.25, %v366_v29 }
  0xe8   :  { %v367_v31 = vadd.f32 %v603_v15, %v363_v30 }
  0xea   :  { %v371_v33 = vmul.f32 0.25, %v367_v31 }
  0xec   :  { %v552_v34 = vpack.c.bf16 %v371_v33, %v370_v32 }
  0xee   :  { %554 = vst [vmem:[%s804_s3 + $0x8] sm:$0xff] %v552_v34  }

// kernel: cnn_forward.5
= control target key start
LH: loop header
LB: loop body
LE: loop exit
PB: predicated region body
PF: predicated region fallthrough
CT: control target
= control target key end

     0   :  { %s705_s1 = inlined_call_operand.vmem [shape: bf16[256,128], index: 1, kind: input, shape index: {}]   ;;  %s706_s3 = inlined_call_operand.vmem [shape: bf16[128,128], index: 3, kind: input, shape index: {}]   ;;  %s707_s2 = inlined_call_operand.vmem [shape: f32[1,128], index: 2, kind: input, shape index: {}]   ;;  %s708_s0 = inlined_call_operand.vmem [shape: bf16[8,256], index: 0, kind: input, shape index: {}]   ;;  %s709_s4 = inlined_call_operand.vmem [shape: f32[1,128], index: 4, kind: input, shape index: {}]   ;;  %s710_s5 = inlined_call_operand.vmem [shape: bf16[128,128], index: 5, kind: input, shape index: {}]   ;;  %s711_s6 = inlined_call_operand.vmem [shape: f32[1,128], index: 6, kind: input, shape index: {}]   ;;  %s712_s7 = inlined_call_operand.vmem [shape: f32[8,128], index: 7, kind: output, shape index: {}]  }
   0x1   :  { %v518_v0 = vld [vmem:[%s705_s1 + $0x38] sm:$0xff]  ;;  %v517_v2 = vld [vmem:[%s705_s1 + $0x30] sm:$0xff]  ;;  %v516_v5 = vld [vmem:[%s705_s1 + $0x28] sm:$0xff] }
   0x2   :  { %v526_v1 = vld [vmem:[%s705_s1 + $0x78] sm:$0xff]  ;;  %166 = vmatpush.bf16.msra.mxu0 %v518_v0  ;;  %v525_v3 = vld [vmem:[%s705_s1 + $0x70] sm:$0xff]  ;;  %v524_v6 = vld [vmem:[%s705_s1 + $0x68] sm:$0xff] }
   0x3   :  { %179 = vmatpush.bf16.msra.mxu1 %v526_v1  ;;  %v534_v4 = vld [vmem:[%s706_s3 + $0x38] sm:$0xff]  ;;  %v533_v7 = vld [vmem:[%s706_s3 + $0x30] sm:$0xff]  ;;  %v515_v8 = vld [vmem:[%s705_s1 + $0x20] sm:$0xff] }
   0x4   :  { %262 = vmatpush.bf16.msra.mxu2 %v534_v4  ;;  %v523_v9 = vld [vmem:[%s705_s1 + $0x60] sm:$0xff]  ;;  %v532_v10 = vld [vmem:[%s706_s3 + $0x28] sm:$0xff]  ;;  %v514_v11 = vld [vmem:[%s705_s1 + $0x18] sm:$0xff] }
   0x5   :  { %v522_v12 = vld [vmem:[%s705_s1 + $0x58] sm:$0xff]  ;;  %v531_v13 = vld [vmem:[%s706_s3 + $0x20] sm:$0xff]  ;;  %v513_v14 = vld [vmem:[%s705_s1 + $0x10] sm:$0xff] }
   0x6   :  { %167 = vmatpush.bf16.msra.mxu0 %v517_v2  ;;  %v521_v15 = vld [vmem:[%s705_s1 + $0x50] sm:$0xff]  ;;  %v530_v16 = vld [vmem:[%s706_s3 + $0x18] sm:$0xff]  ;;  %v512_v17 = vld [vmem:[%s705_s1 + $0x8] sm:$0xff] }
   0x7   :  { %180 = vmatpush.bf16.msra.mxu1 %v525_v3  ;;  %v520_v18 = vld [vmem:[%s705_s1 + $0x48] sm:$0xff]  ;;  %v26_v19 = vld [vmem:[%s708_s0] sm:$0xff]  ;;  %v529_v26 = vld [vmem:[%s706_s3 + $0x10] sm:$0xff] }
   0x8   :  { %263 = vmatpush.bf16.msra.mxu2 %v533_v7  ;;  %v64_v20 = vunpack.c.l.b16 %v26_v19  ;;  %v65_v21 = vunpack.c.h.b16 %v26_v19  ;;  %v511_v22 = vld [vmem:[%s705_s1] sm:$0xff]  ;;  %v528_v27 = vld [vmem:[%s706_s3 + $0x8] sm:$0xff]  ;;  %v542_v29 = vld [vmem:[%s710_s5 + $0x38] sm:$0xff] }
   0x9   :  { %v519_v23 = vld [vmem:[%s705_s1 + $0x40] sm:$0xff]  ;;  %345 = vmatpush.bf16.msra.mxu3 %v542_v29  ;;  %v541_v30 = vld [vmem:[%s710_s5 + $0x30] sm:$0xff]  ;;  %v540_v31 = vld [vmem:[%s710_s5 + $0x28] sm:$0xff] }
   0xa   :  { %168 = vmatpush.bf16.msra.mxu0 %v516_v5  ;;  %v66_v24 = vpack.c.b16 %v64_v20, %v64_v20  ;;  %v67_v25 = vpack.c.b16 %v65_v21, %v65_v21  ;;  %v527_v28 = vld [vmem:[%s706_s3] sm:$0xff]  ;;  %v538_v33 = vld [vmem:[%s710_s5 + $0x18] sm:$0xff]  ;;  %v537_v43 = vld [vmem:[%s710_s5 + $0x10] sm:$0xff] }
   0xb   :  { %181 = vmatpush.bf16.msra.mxu1 %v524_v6  ;;  %v539_v32 = vld [vmem:[%s710_s5 + $0x20] sm:$0xff]  ;;  %v536_v44 = vld [vmem:[%s710_s5 + $0x8] sm:$0xff] }
   0xc   :  { %264 = vmatpush.bf16.msra.mxu2 %v532_v10  ;;  %v543_v34 = vld [vmem:[%s707_s2] ss:$0 sm:$0xff] }
   0xd   :  { %346 = vmatpush.bf16.msra.mxu3 %v541_v30  ;;  %v535_v45 = vld [vmem:[%s710_s5] sm:$0xff] }
   0xe   :  { %169 = vmatpush.bf16.msra.mxu0 %v515_v8  ;;  %v544_v46 = vld [vmem:[%s709_s4] ss:$0 sm:$0xff] }
   0xf   :  { %182 = vmatpush.bf16.msra.mxu1 %v523_v9  ;;  %v545_v52 = vld [vmem:[%s711_s6] ss:$0 sm:$0xff] }
  0x10   :  { %265 = vmatpush.bf16.msra.mxu2 %v531_v13 }
  0x11   :  { %347 = vmatpush.bf16.msra.mxu3 %v540_v31 }
  0x12   :  { %170 = vmatpush.bf16.msra.mxu0 %v514_v11 }
  0x13   :  { %183 = vmatpush.bf16.msra.mxu1 %v522_v12 }
  0x14   :  { %266 = vmatpush.bf16.msra.mxu2 %v530_v16 }
  0x15   :  { %348 = vmatpush.bf16.msra.mxu3 %v539_v32 }
  0x16   :  { %171 = vmatpush.bf16.msra.mxu0 %v513_v14 }
  0x17   :  { %184 = vmatpush.bf16.msra.mxu1 %v521_v15 }
  0x18   :  { %267 = vmatpush.bf16.msra.mxu2 %v529_v26 }
  0x19   :  { %349 = vmatpush.bf16.msra.mxu3 %v538_v33 }
  0x1a   :  { %172 = vmatpush.bf16.msra.mxu0 %v512_v17 }
  0x1b   :  { %185 = vmatpush.bf16.msra.mxu1 %v520_v18 }
  0x1c   :  { %268 = vmatpush.bf16.msra.mxu2 %v528_v27 }
  0x1d   :  { %350 = vmatpush.bf16.msra.mxu3 %v537_v43 }
  0x1e   :  { %173 = vmatpush.bf16.msra.mxu0 %v511_v22 }
  0x1f   :  { %186 = vmatpush.bf16.msra.mxu1 %v519_v23 }
  0x20   :  { %269 = vmatpush.bf16.msra.mxu2 %v527_v28 }
  0x21   :  { %174 = vmatmul.bf16.vlgmr.msra.gmra.mxu0 %v66_v24  ;;  %351 = vmatpush.bf16.msra.mxu3 %v536_v44 }
  0x22   :  { %187 = vmatmul.bf16.vlgmr.msra.gmra.mxu1 %v67_v25 }
  0x25   :  { %352 = vmatpush.bf16.msra.mxu3 %v535_v45 }
  0x9e   :  { %v175_v35 = vpop.f32.mrf.mxu0 }
  0x9f   :  { %v188_v36 = vpop.f32.mrf.mxu1  ;;  %v176_v37 = vadd.f32 %v543_v34, %v175_v35 }
  0xa1   :  { %v189_v38 = vadd.f32 %v188_v36, %v176_v37 }
  0xa3   :  { %546 = vtanh.f32 %v189_v38 }
  0xa6   :  { %v177_v39 = vpop.f32.mrf.mxu0 }
  0xa7   :  { %v190_v40 = vpop.f32.mrf.mxu1 }
  0xa9   :  { %v547_v41 = vpop.eup %546 }
  0xaa   :  { %v193_v42 = vpack.c.bf16 %v547_v41, %v547_v41 }
  0xac   :  { %270 = vmatmul.bf16.vlgmr.msra.gmra.mxu2 %v193_v42 }
 0x12f   :  { %v271_v47 = vpop.f32.mrf.mxu2 }
 0x130   :  { %v272_v48 = vadd.f32 %v544_v46, %v271_v47 }
 0x132   :  { %548 = vtanh.f32 %v272_v48 }
 0x137   :  { %v273_v49 = vpop.f32.mrf.mxu2 }
 0x138   :  { %v549_v50 = vpop.eup %548 }
 0x139   :  { %v276_v51 = vpack.c.bf16 %v549_v50, %v549_v50 }
 0x13b   :  { %353 = vmatmul.bf16.vlgmr.msra.gmra.mxu3 %v276_v51 }
 0x1be   :  { %v354_v53 = vpop.f32.mrf.mxu3 }
 0x1bf   :  { %v355_v54 = vadd.f32 %v545_v52, %v354_v53 }
 0x1c1   :  { %v510_v55 = vmul.f32 -1.442695, %v355_v54 }
 0x1c3   :  { %550 = vpow2.f32 %v510_v55 }
 0x1c6   :  { %v356_v56 = vpop.f32.mrf.mxu3 }
 0x1c9   :  { %v551_v57 = vpop.eup %550 }
 0x1ca   :  { %v361_v58 = vadd.f32 1.0, %v551_v57 }
 0x1cc   :  { %552 = vrcp.f32 %v361_v58  ;;  %v373_v62 = vand.u32 2147483648, %v361_v58  ;;  %v371_v0 = vand.u32 2147483647, %v361_v58  ;;  %vm367_vm1 = vweird.f32 %v361_v58 }
 0x1ce   :  { %v374_v2 = vor.u32 1.1754944e-38, %v373_v62  ;;  %vm372_vm3 = vcmp.eq.f32.partialorder %v371_v0, 8.507059e+37 }
 0x1d2   :  { %v553_v59 = vpop.eup %552 }
 0x1d3   :  { %v363_v60 = vmul.f32 %v553_v59, %v361_v58  ;;  %vm368_vm0 = vweird.f32 %v553_v59 }
 0x1d4   :  { %vm369_vm2 = vmor %vm367_vm1, %vm368_vm0 }
 0x1d5   :  { %v364_v61 = vsub.f32 1.0, %v363_v60 }
 0x1d7   :  { %v365_v63 = vmul.f32 %v553_v59, %v364_v61 }
 0x1d9   :  { %v366_v1 = vadd.f32 %v553_v59, %v365_v63 }
 0x1db   :  { %v370_v3 = vsel %vm369_vm2, %v553_v59, %v366_v1 }
 0x1dc   :  { %v375_v4 = vsel %vm372_vm3, %v374_v2, %v370_v3 }
 0x1dd   :  { %377 = vst [vmem:[%s712_s7] sm:$0xff] %v375_v4 }

</bundles_post_ra>
